<compile_context>
chip_gen: v7x
topology: tpu7x:2x2x1
jax: 0.10.0
libtpu: 0.0.40
codegen_flags: <defaults>
</compile_context>

<pallas_src>
import jax
import jax.numpy as jnp
from jax.experimental import pallas as pl
from jax.experimental.pallas import tpu as pltpu

H_IN = 20          # input spatial size (N, 1, 20, 20)
H_C1 = 16          # conv1 output spatial size
H_P = 8            # pooled spatial size
C1 = 16            # conv1 channels
C2 = 32            # conv2 channels
D1 = 512           # L1 hidden size
K_C1 = 5 * H_IN    # conv1 contraction length (100), padded to 128
K_PAD = 128
OUT_PAD = 128      # classifier padded to a lane-dense width


# ----------------------------- fused Pallas kernel -----------------------------

def fused_cnn_kernel(x_ref, t1_ref, b1_ref, m2_ref, b2_ref, w3_ref, b3_ref,
                     w4_ref, b4_ref, o_ref):
    nb = o_ref.shape[0]                      # samples in this batch block

    # conv1 (5x5 valid, 1->16): single K=128 bf16 matmul over the h-im2col'd input.
    # rows = (h_out, n_local), cols = (w_out, c1)  -> (16*nb, 256) f32
    xs = x_ref[...]                          # (16*nb, 128) bf16
    y1 = jnp.maximum(
        jnp.dot(xs, t1_ref[...], preferred_element_type=jnp.float32) + b1_ref[...],
        0.0)

    # conv2 (1x1, 16->32): even-W / odd-W output columns fused in one (256, 512)
    # bf16 weight; max of the two 256-lane halves == W half of the 2x2 max-pool.
    y2 = jnp.dot(y1.astype(jnp.bfloat16), m2_ref[...],
                 preferred_element_type=jnp.float32)          # (16*nb, 512)
    wmax = jnp.maximum(y2[:, :H_P * C2], y2[:, H_P * C2:])    # (16*nb, 256) cols=(pw,c2)

    # H half of the pool: rows are (h_out, n_local), so even/odd h rows are
    # contiguous nb-row slices. Bias + ReLU after the max is exact (bias uniform
    # over the window, ReLU monotone).  Per-ph results concatenated along lanes
    # -> one (nb, 2048) bf16 activation, cols ordered (ph, pw, c2).
    b2 = b2_ref[...]
    parts = []
    for ph in range(H_P):
        top = wmax[(2 * ph) * nb:(2 * ph + 1) * nb]
        bot = wmax[(2 * ph + 1) * nb:(2 * ph + 2) * nb]
        parts.append(
            jnp.maximum(jnp.maximum(top, bot) + b2, 0.0).astype(jnp.bfloat16))
    pooled = jnp.concatenate(parts, axis=-1)                  # (nb, 2048) bf16

    # L1 (2048 -> 512): single bf16 x bf16 MXU matmul, f32 accumulation.
    h = jnp.tanh(
        jnp.dot(pooled, w3_ref[...], preferred_element_type=jnp.float32)
        + b3_ref[...])                                        # (nb, 512) f32

    # L2 (512 -> 128 padded): lane-dense output store.
    o_ref[...] = (jnp.dot(h, w4_ref[...], preferred_element_type=jnp.float32)
                  + b4_ref[...])


# ----------------------------- wrapper -----------------------------

def cnn_forward(x_nchw, params, out_classes=2, block_n=128):
    n = x_nchw.shape[0]
    assert x_nchw.shape[1:] == (1, H_IN, H_IN), "only in_chann==1, 20x20 supported"

    nb = int(min(block_n, max(8, -(-n // 8) * 8)))    # batch block (multiple of 8)
    n_pad = -(-n // nb) * nb
    n_blocks = n_pad // nb

    # h-im2col in the wrapper: xcol[n, h, kh*20 + w] = x[n, h+kh, w], K padded to 128,
    # then per-block rows reordered to (h_out, n_local) so the kernel never reshapes
    # across the sublane axis and the H-pool is contiguous row slices.
    x = x_nchw.astype(jnp.float32)[:, 0]                       # (n, 20, 20)
    x = jnp.pad(x, ((0, n_pad - n), (0, 0), (0, 0)))
    windows = [x[:, kh:kh + H_C1, :] for kh in range(5)]       # each (n_pad, 16, 20)
    xcol = jnp.concatenate(windows, axis=-1)                   # (n_pad, 16, 100)
    xcol = jnp.pad(xcol, ((0, 0), (0, 0), (0, K_PAD - K_C1)))  # (n_pad, 16, 128)
    xcol = (xcol.reshape(n_blocks, nb, H_C1, K_PAD)
                .transpose(0, 2, 1, 3)
                .reshape(n_blocks, H_C1 * nb, K_PAD)
                .astype(jnp.bfloat16))                         # (blocks, 16*nb, 128)

    const2 = lambda i: (0, 0)   # weights: VMEM-resident across all grid steps

    out = pl.pallas_call(
        fused_cnn_kernel,
        out_shape=jax.ShapeDtypeStruct((n_pad, OUT_PAD), jnp.float32),
        grid=(n_blocks,),
        in_specs=[
            pl.BlockSpec((None, H_C1 * nb, K_PAD), lambda i: (i, 0, 0)),  # xcol
            pl.BlockSpec((K_PAD, H_C1 * C1), const2),                     # t1
            pl.BlockSpec((1, H_C1 * C1), const2),                         # b1
            pl.BlockSpec((H_C1 * C1, 2 * H_P * C2), const2),              # m2
            pl.BlockSpec((1, H_P * C2), const2),                          # b2
            pl.BlockSpec((H_P * H_P * C2, D1), const2),                   # w3
            pl.BlockSpec((1, D1), const2),                                # b3
            pl.BlockSpec((D1, OUT_PAD), const2),                          # w4
            pl.BlockSpec((1, OUT_PAD), const2),                           # b4
        ],
        out_specs=pl.BlockSpec((nb, OUT_PAD), lambda i: (i, 0)),
        compiler_params=pltpu.CompilerParams(
            dimension_semantics=("parallel",),
            vmem_limit_bytes=32 * 1024 * 1024,
        ),
    )(xcol, params["t1"], params["b1"], params["m2"], params["b2"],
      params["w3"], params["b3"], params["w4"], params["b4"])

    return out[:n, :out_classes]


# ----------------------------- params -----------------------------

def init_raw_params(key, in_chann=1, out_classes=2):
    ks = jax.random.split(key, 8)
    return dict(
        w1=jax.random.normal(ks[0], (C1, in_chann, 5, 5), jnp.float32) * 0.1,
        b1=jax.random.normal(ks[1], (C1,), jnp.float32) * 0.1,
        w2=jax.random.normal(ks[2], (C2, C1, 1, 1), jnp.float32) * 0.1,
        b2=jax.random.normal(ks[3], (C2,), jnp.float32) * 0.1,
        l1w=jax.random.normal(ks[4], (D1, C2 * H_P * H_P), jnp.float32) * 0.02,
        l1b=jax.random.normal(ks[5], (D1,), jnp.float32) * 0.02,
        l2w=jax.random.normal(ks[6], (out_classes, D1), jnp.float32) * 0.02,
        l2b=jax.random.normal(ks[7], (out_classes,), jnp.float32) * 0.02,
    )


def pack_params(raw, out_classes=2):
    # conv1 -> Toeplitz bands over W (one per kh) fused along K:
    #   t1[kh*20 + w_in, w_out*16 + c] = w1[c, 0, kh, w_in - w_out]  (0 <= diff < 5)
    w_in = jnp.arange(H_IN)[:, None]
    w_out = jnp.arange(H_C1)[None, :]
    diff = w_in - w_out                                          # (20, 16)
    valid = ((diff >= 0) & (diff < 5)).astype(jnp.float32)
    w1_k = jnp.transpose(raw["w1"][:, 0, :, :], (1, 2, 0))       # (kh, kw, c1)
    t1 = (w1_k[:, jnp.clip(diff, 0, 4), :] * valid[None, :, :, None])
    t1 = t1.reshape(K_C1, H_C1 * C1)                             # (100, 256)
    t1 = jnp.pad(t1, ((0, K_PAD - K_C1), (0, 0))).astype(jnp.bfloat16)

    # conv2 (1x1) even/odd-W column weights fused into one (256, 512) bf16 matrix:
    #   cols [0:256]  -> w == 2*pw ; cols [256:512] -> w == 2*pw+1 ; col = pw*32 + cout
    w2_mat = raw["w2"].reshape(C2, C1).T                         # (cin, cout)
    w_idx = jnp.arange(H_C1)[:, None]
    pw_idx = jnp.arange(H_P)[None, :]
    sel_e = (w_idx == 2 * pw_idx).astype(jnp.float32)
    sel_o = (w_idx == 2 * pw_idx + 1).astype(jnp.float32)
    m_even = jnp.einsum("wp,cd->wcpd", sel_e, w2_mat).reshape(H_C1 * C1, H_P * C2)
    m_odd = jnp.einsum("wp,cd->wcpd", sel_o, w2_mat).reshape(H_C1 * C1, H_P * C2)
    m2 = jnp.concatenate([m_even, m_odd], axis=1).astype(jnp.bfloat16)

    # L1 weight: PyTorch flatten order is (c2, ph, pw); kernel cols are (ph, pw, c2).
    w3 = (raw["l1w"].reshape(D1, C2, H_P, H_P).transpose(2, 3, 1, 0)
              .reshape(H_P * H_P * C2, D1).astype(jnp.bfloat16))  # (2048, 512)

    # L2 padded to 128 lane-dense output columns.
    w4 = jnp.zeros((D1, OUT_PAD), jnp.float32).at[:, :out_classes].set(raw["l2w"].T)
    b4 = jnp.zeros((1, OUT_PAD), jnp.float32).at[0, :out_classes].set(raw["l2b"])

    return dict(
        t1=t1,
        b1=jnp.tile(raw["b1"], H_C1).reshape(1, H_C1 * C1),      # col (w, c)  -> b1[c]
        m2=m2,
        b2=jnp.tile(raw["b2"], H_P).reshape(1, H_P * C2),        # col (pw, c) -> b2[c]
        w3=w3, b3=raw["l1b"].reshape(1, D1),
        w4=w4, b4=b4,
    )


# ----------------------------- pure-JAX reference -----------------------------

def reference_forward(x, raw):
    dn = ("NCHW", "OIHW", "NCHW")
    y1 = jax.lax.conv_general_dilated(x, raw["w1"], (1, 1), "VALID",
                                      dimension_numbers=dn)
    y1 = jnp.maximum(y1 + raw["b1"][None, :, None, None], 0.0)
    y2 = jax.lax.conv_general_dilated(y1, raw["w2"], (1, 1), "VALID",
                                      dimension_numbers=dn)
    y2 = y2 + raw["b2"][None, :, None, None]
    y3 = jnp.maximum(jax.lax.reduce_window(y2, -jnp.inf, jax.lax.max,
                                           (1, 1, 2, 2), (1, 1, 2, 2), "VALID"), 0.0)
    y4 = jnp.tanh(y3.reshape(y3.shape[0], -1) @ raw["l1w"].T + raw["l1b"])
    return y4 @ raw["l2w"].T + raw["l2b"]


if __name__ == "__main__":
    key = jax.random.PRNGKey(0)
    kx, kp = jax.random.split(key)
    # Input implied by H = 32*8*8 and the 5x5 valid conv + 2x2 pool: (N, 1, 20, 20).
    x = jax.random.normal(kx, (2, 1, 20, 20), jnp.float32)
    raw = init_raw_params(kp, in_chann=1, out_classes=2)
    params = pack_params(raw, out_classes=2)

    out = jax.jit(lambda xx: cnn_forward(xx, params, out_classes=2))(x)
    jax.block_until_ready(out)
    assert out.shape == (2, 2) and out.dtype == jnp.float32

    ref = reference_forward(x, raw)
    jax.block_until_ready(ref)
    # bf16 conv/L1 weights with f32 accumulation -> small deviation from f32 reference.
    assert float(jnp.max(jnp.abs(out - ref))) < 2e-2

    print("KERNEL_OK")
</pallas_src>

<mosaic_0001>
module attributes {stable_mosaic.version = 11 : i64} {
  func.func @fused_cnn_kernel(%arg0: i32, %arg1: memref<1x128x128xbf16, #tpu.memory_space<vmem>>, %arg2: memref<128x256xbf16, #tpu.memory_space<vmem>>, %arg3: memref<1x256xf32, #tpu.memory_space<vmem>>, %arg4: memref<256x512xbf16, #tpu.memory_space<vmem>>, %arg5: memref<1x256xf32, #tpu.memory_space<vmem>>, %arg6: memref<2048x512xbf16, #tpu.memory_space<vmem>>, %arg7: memref<1x512xf32, #tpu.memory_space<vmem>>, %arg8: memref<512x128xf32, #tpu.memory_space<vmem>>, %arg9: memref<1x128xf32, #tpu.memory_space<vmem>>, %arg10: memref<8x128xf32, #tpu.memory_space<vmem>>) attributes {dimension_semantics = [#tpu.dimension_semantics<parallel>], iteration_bounds = array<i64: 1>, scalar_prefetch = 0 : i64, scratch_operands = 0 : i64, tpu.core_type = #tpu.core_type<tc>, window_params = [{transform_indices = @transform_0, window_bounds = array<i64: 1, 128, 128>}, {pipeline_mode = #tpu.pipeline_mode<synchronous>, transform_indices = @transform_1, window_bounds = array<i64: 128, 256>}, {pipeline_mode = #tpu.pipeline_mode<synchronous>, transform_indices = @transform_2, window_bounds = array<i64: 1, 256>}, {pipeline_mode = #tpu.pipeline_mode<synchronous>, transform_indices = @transform_3, window_bounds = array<i64: 256, 512>}, {pipeline_mode = #tpu.pipeline_mode<synchronous>, transform_indices = @transform_4, window_bounds = array<i64: 1, 256>}, {pipeline_mode = #tpu.pipeline_mode<synchronous>, transform_indices = @transform_5, window_bounds = array<i64: 2048, 512>}, {pipeline_mode = #tpu.pipeline_mode<synchronous>, transform_indices = @transform_6, window_bounds = array<i64: 1, 512>}, {pipeline_mode = #tpu.pipeline_mode<synchronous>, transform_indices = @transform_7, window_bounds = array<i64: 512, 128>}, {pipeline_mode = #tpu.pipeline_mode<synchronous>, transform_indices = @transform_8, window_bounds = array<i64: 1, 128>}, {transform_indices = @transform_9, window_bounds = array<i64: 8, 128>}]} {
    %c0 = arith.constant 0 : index
    %c0_0 = arith.constant 0 : index
    %c0_1 = arith.constant 0 : index
    %0 = vector.load %arg1[%c0, %c0_0, %c0_1] : memref<1x128x128xbf16, #tpu.memory_space<vmem>>, vector<1x128x128xbf16>
    %1 = vector.shape_cast %0 : vector<1x128x128xbf16> to vector<128x128xbf16>
    %c0_2 = arith.constant 0 : index
    %c0_3 = arith.constant 0 : index
    %2 = vector.load %arg2[%c0_2, %c0_3] : memref<128x256xbf16, #tpu.memory_space<vmem>>, vector<128x256xbf16>
    %cst = arith.constant dense<0.000000e+00> : vector<128x256xf32>
    %3 = tpu.matmul %1, %2, %cst {dimension_numbers = #tpu.dot_dimension_numbers<[1], [0], [0], [1], [0, 0, 1, 1], [], []>} : vector<128x128xbf16>, vector<128x256xbf16>, vector<128x256xf32> -> vector<128x256xf32>
    %c0_4 = arith.constant 0 : index
    %c0_5 = arith.constant 0 : index
    %4 = vector.load %arg3[%c0_4, %c0_5] : memref<1x256xf32, #tpu.memory_space<vmem>>, vector<1x256xf32>
    %5 = vector.broadcast %4 : vector<1x256xf32> to vector<128x256xf32>
    %6 = arith.addf %3, %5 : vector<128x256xf32>
    %cst_6 = arith.constant 0.000000e+00 : f32
    %7 = vector.broadcast %cst_6 : f32 to vector<128x256xf32>
    %8 = arith.maximumf %6, %7 : vector<128x256xf32>
    %9 = arith.truncf %8 : vector<128x256xf32> to vector<128x256xbf16>
    %c0_7 = arith.constant 0 : index
    %c0_8 = arith.constant 0 : index
    %10 = vector.load %arg4[%c0_7, %c0_8] : memref<256x512xbf16, #tpu.memory_space<vmem>>, vector<256x512xbf16>
    %cst_9 = arith.constant dense<0.000000e+00> : vector<128x512xf32>
    %11 = tpu.matmul %9, %10, %cst_9 {dimension_numbers = #tpu.dot_dimension_numbers<[1], [0], [0], [1], [0, 0, 1, 1], [], []>} : vector<128x256xbf16>, vector<256x512xbf16>, vector<128x512xf32> -> vector<128x512xf32>
    %12 = vector.extract_strided_slice %11 {offsets = [0, 0], sizes = [128, 256], strides = [1, 1]} : vector<128x512xf32> to vector<128x256xf32>
    %13 = vector.extract_strided_slice %11 {offsets = [0, 256], sizes = [128, 256], strides = [1, 1]} : vector<128x512xf32> to vector<128x256xf32>
    %14 = arith.maximumf %12, %13 : vector<128x256xf32>
    %c0_10 = arith.constant 0 : index
    %c0_11 = arith.constant 0 : index
    %15 = vector.load %arg5[%c0_10, %c0_11] : memref<1x256xf32, #tpu.memory_space<vmem>>, vector<1x256xf32>
    %16 = vector.extract_strided_slice %14 {offsets = [0, 0], sizes = [8, 256], strides = [1, 1]} : vector<128x256xf32> to vector<8x256xf32>
    %17 = vector.extract_strided_slice %14 {offsets = [8, 0], sizes = [8, 256], strides = [1, 1]} : vector<128x256xf32> to vector<8x256xf32>
    %18 = arith.maximumf %16, %17 : vector<8x256xf32>
    %19 = vector.broadcast %15 : vector<1x256xf32> to vector<8x256xf32>
    %20 = arith.addf %18, %19 : vector<8x256xf32>
    %cst_12 = arith.constant 0.000000e+00 : f32
    %21 = vector.broadcast %cst_12 : f32 to vector<8x256xf32>
    %22 = arith.maximumf %20, %21 : vector<8x256xf32>
    %23 = arith.truncf %22 : vector<8x256xf32> to vector<8x256xbf16>
    %24 = vector.extract_strided_slice %14 {offsets = [16, 0], sizes = [8, 256], strides = [1, 1]} : vector<128x256xf32> to vector<8x256xf32>
    %25 = vector.extract_strided_slice %14 {offsets = [24, 0], sizes = [8, 256], strides = [1, 1]} : vector<128x256xf32> to vector<8x256xf32>
    %26 = arith.maximumf %24, %25 : vector<8x256xf32>
    %27 = vector.broadcast %15 : vector<1x256xf32> to vector<8x256xf32>
    %28 = arith.addf %26, %27 : vector<8x256xf32>
    %cst_13 = arith.constant 0.000000e+00 : f32
    %29 = vector.broadcast %cst_13 : f32 to vector<8x256xf32>
    %30 = arith.maximumf %28, %29 : vector<8x256xf32>
    %31 = arith.truncf %30 : vector<8x256xf32> to vector<8x256xbf16>
    %32 = vector.extract_strided_slice %14 {offsets = [32, 0], sizes = [8, 256], strides = [1, 1]} : vector<128x256xf32> to vector<8x256xf32>
    %33 = vector.extract_strided_slice %14 {offsets = [40, 0], sizes = [8, 256], strides = [1, 1]} : vector<128x256xf32> to vector<8x256xf32>
    %34 = arith.maximumf %32, %33 : vector<8x256xf32>
    %35 = vector.broadcast %15 : vector<1x256xf32> to vector<8x256xf32>
    %36 = arith.addf %34, %35 : vector<8x256xf32>
    %cst_14 = arith.constant 0.000000e+00 : f32
    %37 = vector.broadcast %cst_14 : f32 to vector<8x256xf32>
    %38 = arith.maximumf %36, %37 : vector<8x256xf32>
    %39 = arith.truncf %38 : vector<8x256xf32> to vector<8x256xbf16>
    %40 = vector.extract_strided_slice %14 {offsets = [48, 0], sizes = [8, 256], strides = [1, 1]} : vector<128x256xf32> to vector<8x256xf32>
    %41 = vector.extract_strided_slice %14 {offsets = [56, 0], sizes = [8, 256], strides = [1, 1]} : vector<128x256xf32> to vector<8x256xf32>
    %42 = arith.maximumf %40, %41 : vector<8x256xf32>
    %43 = vector.broadcast %15 : vector<1x256xf32> to vector<8x256xf32>
    %44 = arith.addf %42, %43 : vector<8x256xf32>
    %cst_15 = arith.constant 0.000000e+00 : f32
    %45 = vector.broadcast %cst_15 : f32 to vector<8x256xf32>
    %46 = arith.maximumf %44, %45 : vector<8x256xf32>
    %47 = arith.truncf %46 : vector<8x256xf32> to vector<8x256xbf16>
    %48 = vector.extract_strided_slice %14 {offsets = [64, 0], sizes = [8, 256], strides = [1, 1]} : vector<128x256xf32> to vector<8x256xf32>
    %49 = vector.extract_strided_slice %14 {offsets = [72, 0], sizes = [8, 256], strides = [1, 1]} : vector<128x256xf32> to vector<8x256xf32>
    %50 = arith.maximumf %48, %49 : vector<8x256xf32>
    %51 = vector.broadcast %15 : vector<1x256xf32> to vector<8x256xf32>
    %52 = arith.addf %50, %51 : vector<8x256xf32>
    %cst_16 = arith.constant 0.000000e+00 : f32
    %53 = vector.broadcast %cst_16 : f32 to vector<8x256xf32>
    %54 = arith.maximumf %52, %53 : vector<8x256xf32>
    %55 = arith.truncf %54 : vector<8x256xf32> to vector<8x256xbf16>
    %56 = vector.extract_strided_slice %14 {offsets = [80, 0], sizes = [8, 256], strides = [1, 1]} : vector<128x256xf32> to vector<8x256xf32>
    %57 = vector.extract_strided_slice %14 {offsets = [88, 0], sizes = [8, 256], strides = [1, 1]} : vector<128x256xf32> to vector<8x256xf32>
    %58 = arith.maximumf %56, %57 : vector<8x256xf32>
    %59 = vector.broadcast %15 : vector<1x256xf32> to vector<8x256xf32>
    %60 = arith.addf %58, %59 : vector<8x256xf32>
    %cst_17 = arith.constant 0.000000e+00 : f32
    %61 = vector.broadcast %cst_17 : f32 to vector<8x256xf32>
    %62 = arith.maximumf %60, %61 : vector<8x256xf32>
    %63 = arith.truncf %62 : vector<8x256xf32> to vector<8x256xbf16>
    %64 = vector.extract_strided_slice %14 {offsets = [96, 0], sizes = [8, 256], strides = [1, 1]} : vector<128x256xf32> to vector<8x256xf32>
    %65 = vector.extract_strided_slice %14 {offsets = [104, 0], sizes = [8, 256], strides = [1, 1]} : vector<128x256xf32> to vector<8x256xf32>
    %66 = arith.maximumf %64, %65 : vector<8x256xf32>
    %67 = vector.broadcast %15 : vector<1x256xf32> to vector<8x256xf32>
    %68 = arith.addf %66, %67 : vector<8x256xf32>
    %cst_18 = arith.constant 0.000000e+00 : f32
    %69 = vector.broadcast %cst_18 : f32 to vector<8x256xf32>
    %70 = arith.maximumf %68, %69 : vector<8x256xf32>
    %71 = arith.truncf %70 : vector<8x256xf32> to vector<8x256xbf16>
    %72 = vector.extract_strided_slice %14 {offsets = [112, 0], sizes = [8, 256], strides = [1, 1]} : vector<128x256xf32> to vector<8x256xf32>
    %73 = vector.extract_strided_slice %14 {offsets = [120, 0], sizes = [8, 256], strides = [1, 1]} : vector<128x256xf32> to vector<8x256xf32>
    %74 = arith.maximumf %72, %73 : vector<8x256xf32>
    %75 = vector.broadcast %15 : vector<1x256xf32> to vector<8x256xf32>
    %76 = arith.addf %74, %75 : vector<8x256xf32>
    %cst_19 = arith.constant 0.000000e+00 : f32
    %77 = vector.broadcast %cst_19 : f32 to vector<8x256xf32>
    %78 = arith.maximumf %76, %77 : vector<8x256xf32>
    %79 = arith.truncf %78 : vector<8x256xf32> to vector<8x256xbf16>
    %80 = tpu.concatenate %23, %31, %39, %47, %55, %63, %71, %79 in 1 : vector<8x256xbf16>, vector<8x256xbf16>, vector<8x256xbf16>, vector<8x256xbf16>, vector<8x256xbf16>, vector<8x256xbf16>, vector<8x256xbf16>, vector<8x256xbf16> -> vector<8x2048xbf16>
    %c0_20 = arith.constant 0 : index
    %c0_21 = arith.constant 0 : index
    %81 = vector.load %arg6[%c0_20, %c0_21] : memref<2048x512xbf16, #tpu.memory_space<vmem>>, vector<2048x512xbf16>
    %cst_22 = arith.constant dense<0.000000e+00> : vector<8x512xf32>
    %82 = tpu.matmul %80, %81, %cst_22 {dimension_numbers = #tpu.dot_dimension_numbers<[1], [0], [0], [1], [0, 0, 1, 1], [], []>} : vector<8x2048xbf16>, vector<2048x512xbf16>, vector<8x512xf32> -> vector<8x512xf32>
    %c0_23 = arith.constant 0 : index
    %c0_24 = arith.constant 0 : index
    %83 = vector.load %arg7[%c0_23, %c0_24] : memref<1x512xf32, #tpu.memory_space<vmem>>, vector<1x512xf32>
    %84 = vector.broadcast %83 : vector<1x512xf32> to vector<8x512xf32>
    %85 = arith.addf %82, %84 : vector<8x512xf32>
    %86 = math.tanh %85 : vector<8x512xf32>
    %c0_25 = arith.constant 0 : index
    %c0_26 = arith.constant 0 : index
    %87 = vector.load %arg8[%c0_25, %c0_26] : memref<512x128xf32, #tpu.memory_space<vmem>>, vector<512x128xf32>
    %cst_27 = arith.constant dense<0.000000e+00> : vector<8x128xf32>
    %88 = tpu.matmul %86, %87, %cst_27 {dimension_numbers = #tpu.dot_dimension_numbers<[1], [0], [0], [1], [0, 0, 1, 1], [], []>} : vector<8x512xf32>, vector<512x128xf32>, vector<8x128xf32> -> vector<8x128xf32>
    %c0_28 = arith.constant 0 : index
    %c0_29 = arith.constant 0 : index
    %89 = vector.load %arg9[%c0_28, %c0_29] : memref<1x128xf32, #tpu.memory_space<vmem>>, vector<1x128xf32>
    %90 = vector.broadcast %89 : vector<1x128xf32> to vector<8x128xf32>
    %91 = arith.addf %88, %90 : vector<8x128xf32>
    %c0_30 = arith.constant 0 : index
    %c0_31 = arith.constant 0 : index
    %92 = vector.load %arg10[%c0_30, %c0_31] : memref<8x128xf32, #tpu.memory_space<vmem>>, vector<8x128xf32>
    tpu.vector_store %arg10[%c0_30, %c0_31], %91 {strides = array<i32>} : memref<8x128xf32, #tpu.memory_space<vmem>>, vector<8x128xf32>,
    return
  }
  func.func @transform_0(%arg0: i32) -> (i32, i32, i32) {
    %c0_i32 = arith.constant 0 : i32
    %c0_i32_0 = arith.constant 0 : i32
    %c0_i32_1 = arith.constant 0 : i32
    return %arg0, %c0_i32, %c0_i32_0 : i32, i32, i32
  }
  func.func @transform_1(%arg0: i32) -> (i32, i32) {
    %c0_i32 = arith.constant 0 : i32
    %c0_i32_0 = arith.constant 0 : i32
    %c0_i32_1 = arith.constant 0 : i32
    return %c0_i32, %c0_i32_0 : i32, i32
  }
  func.func @transform_2(%arg0: i32) -> (i32, i32) {
    %c0_i32 = arith.constant 0 : i32
    %c0_i32_0 = arith.constant 0 : i32
    %c0_i32_1 = arith.constant 0 : i32
    return %c0_i32, %c0_i32_0 : i32, i32
  }
  func.func @transform_3(%arg0: i32) -> (i32, i32) {
    %c0_i32 = arith.constant 0 : i32
    %c0_i32_0 = arith.constant 0 : i32
    %c0_i32_1 = arith.constant 0 : i32
    return %c0_i32, %c0_i32_0 : i32, i32
  }
  func.func @transform_4(%arg0: i32) -> (i32, i32) {
    %c0_i32 = arith.constant 0 : i32
    %c0_i32_0 = arith.constant 0 : i32
    %c0_i32_1 = arith.constant 0 : i32
    return %c0_i32, %c0_i32_0 : i32, i32
  }
  func.func @transform_5(%arg0: i32) -> (i32, i32) {
    %c0_i32 = arith.constant 0 : i32
    %c0_i32_0 = arith.constant 0 : i32
    %c0_i32_1 = arith.constant 0 : i32
    return %c0_i32, %c0_i32_0 : i32, i32
  }
  func.func @transform_6(%arg0: i32) -> (i32, i32) {
    %c0_i32 = arith.constant 0 : i32
    %c0_i32_0 = arith.constant 0 : i32
    %c0_i32_1 = arith.constant 0 : i32
    return %c0_i32, %c0_i32_0 : i32, i32
  }
  func.func @transform_7(%arg0: i32) -> (i32, i32) {
    %c0_i32 = arith.constant 0 : i32
    %c0_i32_0 = arith.constant 0 : i32
    %c0_i32_1 = arith.constant 0 : i32
    return %c0_i32, %c0_i32_0 : i32, i32
  }
  func.func @transform_8(%arg0: i32) -> (i32, i32) {
    %c0_i32 = arith.constant 0 : i32
    %c0_i32_0 = arith.constant 0 : i32
    %c0_i32_1 = arith.constant 0 : i32
    return %c0_i32, %c0_i32_0 : i32, i32
  }
  func.func @transform_9(%arg0: i32) -> (i32, i32) {
    %c0_i32 = arith.constant 0 : i32
    %c0_i32_0 = arith.constant 0 : i32
    return %arg0, %c0_i32 : i32, i32
  }
}

</mosaic_0001>

<bundles_post_ra>
// kernel: _lambda_.1
= control target key start
LH: loop header
LB: loop body
LE: loop exit
PB: predicated region body
PF: predicated region fallthrough
CT: control target
= control target key end

     0   :  { %v6754_v1 = vmov 0   ;;  %s8931_s1 = inlined_call_operand.vmem [shape: bf16[128,256], index: 1, kind: input, shape index: {}]   ;;  %s8932_s0 = inlined_call_operand.vmem [shape: bf16[1,128,128], index: 0, kind: input, shape index: {}]   ;;  %s8933_s3 = inlined_call_operand.vmem [shape: bf16[256,512], index: 3, kind: input, shape index: {}]   ;;  %s8934_s5 = inlined_call_operand.vmem [shape: bf16[2048,512], index: 5, kind: input, shape index: {}]   ;;  %s8935_s2 = inlined_call_operand.vmem [shape: f32[1,256], index: 2, kind: input, shape index: {}]   ;;  %s8936_s4 = inlined_call_operand.vmem [shape: f32[1,256], index: 4, kind: input, shape index: {}]   ;;  %s8937_s7 = inlined_call_operand.vmem [shape: f32[512,128], index: 7, kind: input, shape index: {}]   ;;  %s8938_s6 = inlined_call_operand.vmem [shape: f32[1,512], index: 6, kind: input, shape index: {}]   ;;  %s8939_s8 = inlined_call_operand.vmem [shape: f32[1,128], index: 8, kind: input, shape index: {}]   ;;  %s8940_s9 = inlined_call_operand.vmem [shape: f32[8,128], index: 9, kind: output, shape index: {}]  }
   0x1   :  { %v5850_v0 = vld [vmem:[%s8931_s1 + $0x4] ss:$8 sps:$4 sm:$0xff]   ;;  %237 = vmatprep.mubr.bf16.mxu0 %v6754_v1  ;;  %v5852_v2 = vld [vmem:[%s8931_s1] ss:$8 sps:$4 sm:$0xff]   ;;  %v5853_v3 = vld [vmem:[%s8931_s1 + $0x14] ss:$8 sps:$4 sm:$0xff]  }
   0x2   :  { %205 = vmatprep.subr.bf16.mxu0 %v5850_v0  ;;  %v5855_v4 = vld [vmem:[%s8931_s1 + $0x10] ss:$8 sps:$4 sm:$0xff]   ;;  %v5856_v5 = vld [vmem:[%s8931_s1 + $0x24] ss:$8 sps:$4 sm:$0xff]   ;;  %v5858_v6 = vld [vmem:[%s8931_s1 + $0x20] ss:$8 sps:$4 sm:$0xff]  }
   0x3   :  { %206 = vmatpush1.bf16.msra.mxu0 %v5852_v2  ;;  %v5859_v7 = vld [vmem:[%s8931_s1 + $0x34] ss:$8 sps:$4 sm:$0xff]   ;;  %v5861_v8 = vld [vmem:[%s8931_s1 + $0x30] ss:$8 sps:$4 sm:$0xff]   ;;  %v5862_v9 = vld [vmem:[%s8931_s1 + $0x44] ss:$8 sps:$4 sm:$0xff]  }
   0x4   :  { %207 = vmatprep.subr.bf16.mxu0 %v5853_v3  ;;  %v5864_v10 = vld [vmem:[%s8931_s1 + $0x40] ss:$8 sps:$4 sm:$0xff]   ;;  %v5865_v11 = vld [vmem:[%s8931_s1 + $0x54] ss:$8 sps:$4 sm:$0xff]   ;;  %v5867_v16 = vld [vmem:[%s8931_s1 + $0x50] ss:$8 sps:$4 sm:$0xff]  }
   0x5   :  { %v5880_v12 = vld [vmem:[%s8933_s3 + $0x4] ss:$16 sps:$4 sm:$0xff]   ;;  %v5882_v13 = vld [vmem:[%s8933_s3] ss:$16 sps:$4 sm:$0xff]   ;;  %v5879_v26 = vld [vmem:[%s8933_s3 + $0xc] ss:$16 sps:$4 sm:$0xff]  }
   0x6   :  { %750 = vmatprep.subr.bf16.mxu1 %v5880_v12  ;;  %v5886_v14 = vld [vmem:[%s8933_s3 + $0x24] ss:$16 sps:$4 sm:$0xff]   ;;  %v5888_v15 = vld [vmem:[%s8933_s3 + $0x20] ss:$16 sps:$4 sm:$0xff]   ;;  %v5877_v29 = vld [vmem:[%s8933_s3 + $0x8] ss:$16 sps:$4 sm:$0xff]  }
   0x7   :  { %208 = vmatpush1.bf16.msra.mxu0 %v5855_v4  ;;  %751 = vmatpush1.bf16.msra.mxu1 %v5882_v13  ;;  %v5868_v17 = vld [vmem:[%s8931_s1 + $0x64] ss:$8 sps:$4 sm:$0xff]   ;;  %v5870_v19 = vld [vmem:[%s8931_s1 + $0x60] ss:$8 sps:$4 sm:$0xff]   ;;  %v5871_v22 = vld [vmem:[%s8931_s1 + $0x74] ss:$8 sps:$4 sm:$0xff]  }
   0x8   :  { %209 = vmatprep.subr.bf16.mxu0 %v5856_v5  ;;  %752 = vmatprep.subr.bf16.mxu1 %v5886_v14  ;;  %v5892_v18 = vld [vmem:[%s8933_s3 + $0x44] ss:$16 sps:$4 sm:$0xff]   ;;  %v5894_v20 = vld [vmem:[%s8933_s3 + $0x40] ss:$16 sps:$4 sm:$0xff]   ;;  %v5885_v30 = vld [vmem:[%s8933_s3 + $0x2c] ss:$16 sps:$4 sm:$0xff]  }
   0x9   :  { %v5898_v21 = vld [vmem:[%s8933_s3 + $0x64] ss:$16 sps:$4 sm:$0xff]   ;;  %v5900_v23 = vld [vmem:[%s8933_s3 + $0x60] ss:$16 sps:$4 sm:$0xff]   ;;  %v5883_v33 = vld [vmem:[%s8933_s3 + $0x28] ss:$16 sps:$4 sm:$0xff]  }
   0xa   :  { %v5873_v24 = vld [vmem:[%s8931_s1 + $0x70] ss:$8 sps:$4 sm:$0xff]   ;;  %v5904_v25 = vld [vmem:[%s8933_s3 + $0x84] ss:$16 sps:$4 sm:$0xff]   ;;  %v5891_v35 = vld [vmem:[%s8933_s3 + $0x4c] ss:$16 sps:$4 sm:$0xff]  }
   0xb   :  { %210 = vmatpush1.bf16.msra.mxu0 %v5858_v6  ;;  %753 = vmatpush1.bf16.msra.mxu1 %v5888_v15  ;;  %v5874_v27 = vld [vmem:[%s8932_s0] sm:$0xff]   ;;  %v5875_v36 = vld [vmem:[%s8932_s0 + $0x8] sm:$0xff]   ;;  %v5876_v45 = vld [vmem:[%s8932_s0 + $0x10] sm:$0xff]  }
   0xc   :  { %211 = vmatprep.subr.bf16.mxu0 %v5859_v7  ;;  %754 = vmatprep.subr.bf16.mxu1 %v5892_v18  ;;  %v5907_v28 = vld [vmem:[%s8933_s3 + $0x80] ss:$16 sps:$4 sm:$0xff]   ;;  %v5911_v31 = vld [vmem:[%s8933_s3 + $0xa4] ss:$16 sps:$4 sm:$0xff]   ;;  %v5889_v38 = vld [vmem:[%s8933_s3 + $0x48] ss:$16 sps:$4 sm:$0xff]  }
   0xd   :  { %v5913_v32 = vld [vmem:[%s8933_s3 + $0xa0] ss:$16 sps:$4 sm:$0xff]   ;;  %v5917_v34 = vld [vmem:[%s8933_s3 + $0xc4] ss:$16 sps:$4 sm:$0xff]   ;;  %v5897_v39 = vld [vmem:[%s8933_s3 + $0x6c] ss:$16 sps:$4 sm:$0xff]  }
   0xe   :  { %v5920_v37 = vld [vmem:[%s8933_s3 + $0xc0] ss:$16 sps:$4 sm:$0xff]   ;;  %v5924_v40 = vld [vmem:[%s8933_s3 + $0xe4] ss:$16 sps:$4 sm:$0xff]   ;;  %v5895_v41 = vld [vmem:[%s8933_s3 + $0x68] ss:$16 sps:$4 sm:$0xff]  }
   0xf   :  { %212 = vmatpush1.bf16.msra.mxu0 %v5861_v8  ;;  %755 = vmatpush1.bf16.msra.mxu1 %v5894_v20  ;;  %v5926_v42 = vld [vmem:[%s8933_s3 + $0xe0] ss:$16 sps:$4 sm:$0xff]   ;;  %v5930_v43 = vld [vmem:[%s8933_s3 + $0x104] ss:$16 sps:$4 sm:$0xff]   ;;  %v5903_v44 = vld [vmem:[%s8933_s3 + $0x8c] ss:$16 sps:$4 sm:$0xff]  }
  0x10   :  { %213 = vmatprep.subr.bf16.mxu0 %v5862_v9  ;;  %756 = vmatprep.subr.bf16.mxu1 %v5898_v21  ;;  %v5901_v46 = vld [vmem:[%s8933_s3 + $0x88] ss:$16 sps:$4 sm:$0xff]   ;;  %v5933_v47 = vld [vmem:[%s8933_s3 + $0x100] ss:$16 sps:$4 sm:$0xff]   ;;  %v5910_v48 = vld [vmem:[%s8933_s3 + $0xac] ss:$16 sps:$4 sm:$0xff]  }
  0x11   :  { %v5937_v49 = vld [vmem:[%s8933_s3 + $0x124] ss:$16 sps:$4 sm:$0xff]   ;;  %v5908_v50 = vld [vmem:[%s8933_s3 + $0xa8] ss:$16 sps:$4 sm:$0xff]   ;;  %v5939_v51 = vld [vmem:[%s8933_s3 + $0x120] ss:$16 sps:$4 sm:$0xff]  }
  0x12   :  { %v5943_v52 = vld [vmem:[%s8933_s3 + $0x144] ss:$16 sps:$4 sm:$0xff]   ;;  %v5916_v53 = vld [vmem:[%s8933_s3 + $0xcc] ss:$16 sps:$4 sm:$0xff]   ;;  %v5914_v55 = vld [vmem:[%s8933_s3 + $0xc8] ss:$16 sps:$4 sm:$0xff]  }
  0x13   :  { %214 = vmatpush1.bf16.msra.mxu0 %v5864_v10  ;;  %757 = vmatpush1.bf16.msra.mxu1 %v5900_v23  ;;  %v5906_v54 = vld [vmem:[%s8932_s0 + $0x18] sm:$0xff]   ;;  %v5946_v56 = vld [vmem:[%s8933_s3 + $0x140] ss:$16 sps:$4 sm:$0xff]   ;;  %v5950_v58 = vld [vmem:[%s8933_s3 + $0x164] ss:$16 sps:$4 sm:$0xff]  }
  0x14   :  { %215 = vmatprep.subr.bf16.mxu0 %v5865_v11  ;;  %758 = vmatprep.subr.bf16.mxu1 %v5904_v25  ;;  %v5923_v57 = vld [vmem:[%s8933_s3 + $0xec] ss:$16 sps:$4 sm:$0xff]   ;;  %v5952_v59 = vld [vmem:[%s8933_s3 + $0x160] ss:$16 sps:$4 sm:$0xff]   ;;  %v5921_v60 = vld [vmem:[%s8933_s3 + $0xe8] ss:$16 sps:$4 sm:$0xff]  }
  0x15   :  { %v5956_v61 = vld [vmem:[%s8933_s3 + $0x184] ss:$16 sps:$4 sm:$0xff]   ;;  %v5929_v62 = vld [vmem:[%s8933_s3 + $0x10c] ss:$16 sps:$4 sm:$0xff]   ;;  %v5959_v0 = vld [vmem:[%s8933_s3 + $0x180] ss:$16 sps:$4 sm:$0xff]  }
  0x16   :  { %v5919_v63 = vld [vmem:[%s8932_s0 + $0x20] sm:$0xff]   ;;  %v5927_v2 = vld [vmem:[%s8933_s3 + $0x108] ss:$16 sps:$4 sm:$0xff]   ;;  %v5936_v3 = vld [vmem:[%s8933_s3 + $0x12c] ss:$16 sps:$4 sm:$0xff]  }
  0x17   :  { %216 = vmatpush1.bf16.msra.mxu0 %v5867_v16  ;;  %759 = vmatpush1.bf16.msra.mxu1 %v5907_v28  ;;  %v5963_v4 = vld [vmem:[%s8933_s3 + $0x1a4] ss:$16 sps:$4 sm:$0xff]   ;;  %v5934_v5 = vld [vmem:[%s8933_s3 + $0x128] ss:$16 sps:$4 sm:$0xff]   ;;  %v5942_v6 = vld [vmem:[%s8933_s3 + $0x14c] ss:$16 sps:$4 sm:$0xff]  }
  0x18   :  { %217 = vmatprep.subr.bf16.mxu0 %v5868_v17  ;;  %760 = vmatprep.subr.bf16.mxu1 %v5911_v31  ;;  %v5932_v7 = vld [vmem:[%s8932_s0 + $0x28] sm:$0xff]   ;;  %v5945_v12 = vld [vmem:[%s8932_s0 + $0x30] sm:$0xff]   ;;  %v5958_v16 = vld [vmem:[%s8932_s0 + $0x38] sm:$0xff]  }
  0x19   :  { %v5940_v8 = vld [vmem:[%s8933_s3 + $0x148] ss:$16 sps:$4 sm:$0xff]   ;;  %v5949_v9 = vld [vmem:[%s8933_s3 + $0x16c] ss:$16 sps:$4 sm:$0xff]   ;;  %v5965_v17 = vld [vmem:[%s8933_s3 + $0x1a0] ss:$16 sps:$4 sm:$0xff]  }
  0x1a   :  { %v5947_v10 = vld [vmem:[%s8933_s3 + $0x168] ss:$16 sps:$4 sm:$0xff]   ;;  %v5955_v11 = vld [vmem:[%s8933_s3 + $0x18c] ss:$16 sps:$4 sm:$0xff]   ;;  %v5969_v18 = vld [vmem:[%s8933_s3 + $0x1c4] ss:$16 sps:$4 sm:$0xff]  }
  0x1b   :  { %218 = vmatpush1.bf16.msra.mxu0 %v5870_v19  ;;  %761 = vmatpush1.bf16.msra.mxu1 %v5913_v32  ;;  %v5953_v13 = vld [vmem:[%s8933_s3 + $0x188] ss:$16 sps:$4 sm:$0xff]   ;;  %v5962_v14 = vld [vmem:[%s8933_s3 + $0x1ac] ss:$16 sps:$4 sm:$0xff]   ;;  %v5971_v20 = vld [vmem:[%s8933_s3 + $0x1c0] ss:$16 sps:$4 sm:$0xff]  }
  0x1c   :  { %219 = vmatprep.subr.bf16.mxu0 %v5871_v22  ;;  %762 = vmatprep.subr.bf16.mxu1 %v5917_v34  ;;  %v5960_v15 = vld [vmem:[%s8933_s3 + $0x1a8] ss:$16 sps:$4 sm:$0xff]   ;;  %v5974_v21 = vld [vmem:[%s8933_s3 + $0x1ec] ss:$16 sps:$4 sm:$0xff]   ;;  %v5975_v22 = vld [vmem:[%s8933_s3 + $0x1e4] ss:$16 sps:$4 sm:$0xff]  }
  0x1d   :  { %v5966_v19 = vld [vmem:[%s8933_s3 + $0x1c8] ss:$16 sps:$4 sm:$0xff]   ;;  %v5980_v25 = vld [vmem:[%s8934_s5 + $0x4] ss:$16 sps:$4 sm:$0xff]  }
  0x1e   :  { %v5972_v23 = vld [vmem:[%s8933_s3 + $0x1e8] ss:$16 sps:$4 sm:$0xff]  }
  0x1f   :  { %220 = vmatpush1.bf16.msra.mxu0 %v5873_v24  ;;  %763 = vmatpush1.bf16.msra.mxu1 %v5920_v37  ;;  %v5977_v24 = vld [vmem:[%s8933_s3 + $0x1e0] ss:$16 sps:$4 sm:$0xff]  }
  0x20   :  { %863 = vmatprep.subr.bf16.mxu0 %v5879_v26  ;;  %764 = vmatprep.subr.bf16.mxu1 %v5924_v40  ;;  %v5983_v26 = vld [vmem:[%s8934_s5 + $0xc] ss:$16 sps:$4 sm:$0xff]  }
  0x22   :  { %238 = vmatmul.mubr.bf16.vlgmr.msra.gmra.mrb[0].mxu0 %v5874_v27  ;;  %v67_v27 = vlaneseq }
  0x23   :  { %247 = vmatprep.mubr.bf16.mxu0 %v6754_v1  ;;  %864 = vmatpush1.bf16.msra.mxu0 %v5877_v29  ;;  %v65_v29 = vld [vmem:[%s8935_s2] sm:$0x3] }
  0x24   :  { %865 = vmatprep.subr.bf16.mxu0 %v5885_v30  ;;  %765 = vmatpush1.bf16.msra.mxu1 %v5926_v42  ;;  %v7083_v28 = vshrl.u32 %v67_v27, 7  ;;  %v6005_v27 = vld [vmem:[%s8934_s5 + $0x88] ss:$16 sps:$4 sm:$0xff]  }
  0x25   :  { %766 = vmatprep.subr.bf16.mxu1 %v5930_v43 }
  0x26   :  { %v7089_v30 = vsub.s32 0, %v7083_v28  ;;  %v7092_v31 = vsub.s32 1, %v7083_v28 }
  0x27   :  { %866 = vmatpush1.bf16.msra.mxu0 %v5883_v33 }
  0x28   :  { %867 = vmatprep.subr.bf16.mxu0 %v5891_v35  ;;  %767 = vmatpush1.bf16.msra.mxu1 %v5933_v47  ;;  %v7095_v32 = vrot.slane %v65_v29, %v7089_v30  ;;  %v7098_v33 = vrot.slane %v65_v29, %v7092_v31  ;;  %v5981_v47 = vld [vmem:[%s8934_s5 + $0x8] ss:$16 sps:$4 sm:$0xff]  }
  0x29   :  { %768 = vmatprep.subr.bf16.mxu1 %v5937_v49  ;;  %v5986_v49 = vld [vmem:[%s8934_s5 + $0x24] ss:$16 sps:$4 sm:$0xff]  }
  0x2a   :  { %248 = vmatmul.mubr.bf16.gmra.mrb[4].mxu0 %v5875_v36 }
  0x2b   :  { %257 = vmatprep.mubr.bf16.mxu0 %v6754_v1  ;;  %868 = vmatpush1.bf16.msra.mxu0 %v5889_v38 }
  0x2c   :  { %869 = vmatprep.subr.bf16.mxu0 %v5897_v39  ;;  %769 = vmatpush1.bf16.msra.mxu1 %v5939_v51 }
  0x2d   :  { %770 = vmatprep.subr.bf16.mxu1 %v5943_v52 }
  0x2f   :  { %870 = vmatpush1.bf16.msra.mxu0 %v5895_v41 }
  0x30   :  { %871 = vmatprep.subr.bf16.mxu0 %v5903_v44  ;;  %771 = vmatpush1.bf16.msra.mxu1 %v5946_v56 }
  0x31   :  { %772 = vmatprep.subr.bf16.mxu1 %v5950_v58  ;;  %v5987_v58 = vld [vmem:[%s8934_s5 + $0x28] ss:$16 sps:$4 sm:$0xff]  }
  0x32   :  { %258 = vmatmul.mubr.bf16.gmra.mrb[8].mxu0 %v5876_v45 }
  0x33   :  { %267 = vmatprep.mubr.bf16.mxu0 %v6754_v1  ;;  %872 = vmatpush1.bf16.msra.mxu0 %v5901_v46  ;;  %v5978_v46 = vld [vmem:[%s8934_s5] ss:$16 sps:$4 sm:$0xff]  }
  0x34   :  { %873 = vmatprep.subr.bf16.mxu0 %v5910_v48  ;;  %773 = vmatpush1.bf16.msra.mxu1 %v5952_v59 }
  0x35   :  { %774 = vmatprep.subr.bf16.mxu1 %v5956_v61 }
  0x37   :  { %874 = vmatpush1.bf16.msra.mxu0 %v5908_v50  ;;  %v5989_v50 = vld [vmem:[%s8934_s5 + $0x2c] ss:$16 sps:$4 sm:$0xff]  }
  0x38   :  { %875 = vmatprep.subr.bf16.mxu0 %v5916_v53  ;;  %775 = vmatpush1.bf16.msra.mxu1 %v5959_v0 }
  0x39   :  { %776 = vmatprep.subr.bf16.mxu1 %v5963_v4 }
  0x3a   :  { %268 = vmatmul.mubr.bf16.gmra.mrb[12].mxu0 %v5906_v54 }
  0x3b   :  { %277 = vmatprep.mubr.bf16.mxu0 %v6754_v1  ;;  %876 = vmatpush1.bf16.msra.mxu0 %v5914_v55 }
  0x3c   :  { %877 = vmatprep.subr.bf16.mxu0 %v5923_v57  ;;  %777 = vmatpush1.bf16.msra.mxu1 %v5965_v17  ;;  %v5984_v57 = vld [vmem:[%s8934_s5 + $0x20] ss:$16 sps:$4 sm:$0xff]   ;;  %v5999_v17 = vld [vmem:[%s8934_s5 + $0x68] ss:$16 sps:$4 sm:$0xff]  }
  0x3d   :  { %778 = vmatprep.subr.bf16.mxu1 %v5969_v18 }
  0x3f   :  { %878 = vmatpush1.bf16.msra.mxu0 %v5921_v60 }
  0x40   :  { %879 = vmatprep.subr.bf16.mxu0 %v5929_v62  ;;  %779 = vmatpush1.bf16.msra.mxu1 %v5971_v20  ;;  %v5992_v62 = vld [vmem:[%s8934_s5 + $0x44] ss:$16 sps:$4 sm:$0xff]  }
  0x41   :  { %780 = vmatprep.subr.bf16.mxu1 %v5975_v22  ;;  %v6004_v20 = vld [vmem:[%s8934_s5 + $0x84] ss:$16 sps:$4 sm:$0xff]  }
  0x42   :  { %278 = vmatmul.mubr.bf16.gmra.mrb[16].mxu0 %v5919_v63  ;;  %v5995_v63 = vld [vmem:[%s8934_s5 + $0x4c] ss:$16 sps:$4 sm:$0xff]  }
  0x43   :  { %287 = vmatprep.mubr.bf16.mxu0 %v6754_v1  ;;  %880 = vmatpush1.bf16.msra.mxu0 %v5927_v2 }
  0x44   :  { %881 = vmatprep.subr.bf16.mxu0 %v5936_v3  ;;  %781 = vmatpush1.bf16.msra.mxu1 %v5977_v24 }
  0x45   :  { %4178 = vmatprep.subr.bf16.mxu1 %v5980_v25 }
  0x47   :  { %882 = vmatpush1.bf16.msra.mxu0 %v5934_v5  ;;  %v5990_v5 = vld [vmem:[%s8934_s5 + $0x40] ss:$16 sps:$4 sm:$0xff]  }
  0x48   :  { %883 = vmatprep.subr.bf16.mxu0 %v5942_v6  ;;  %v5993_v6 = vld [vmem:[%s8934_s5 + $0x48] ss:$16 sps:$4 sm:$0xff]  }
  0x4a   :  { %288 = vmatmul.mubr.bf16.gmra.mrb[20].mxu0 %v5932_v7 }
  0x4b   :  { %297 = vmatprep.mubr.bf16.mxu0 %v6754_v1  ;;  %884 = vmatpush1.bf16.msra.mxu0 %v5940_v8  ;;  %v5998_v8 = vld [vmem:[%s8934_s5 + $0x64] ss:$16 sps:$4 sm:$0xff]  }
  0x4c   :  { %885 = vmatprep.subr.bf16.mxu0 %v5949_v9  ;;  %v6001_v9 = vld [vmem:[%s8934_s5 + $0x6c] ss:$16 sps:$4 sm:$0xff]  }
  0x4f   :  { %886 = vmatpush1.bf16.msra.mxu0 %v5947_v10 }
  0x50   :  { %887 = vmatprep.subr.bf16.mxu0 %v5955_v11 }
  0x52   :  { %298 = vmatmul.mubr.bf16.gmra.mrb[24].mxu0 %v5945_v12 }
  0x53   :  { %307 = vmatprep.mubr.bf16.mxu0 %v6754_v1  ;;  %888 = vmatpush1.bf16.msra.mxu0 %v5953_v13  ;;  %v5968_v1 = vld [vmem:[%s8933_s3 + $0x1cc] ss:$16 sps:$4 sm:$0xff]  }
  0x54   :  { %889 = vmatprep.subr.bf16.mxu0 %v5962_v14 }
  0x57   :  { %890 = vmatpush1.bf16.msra.mxu0 %v5960_v15 }
  0x58   :  { %891 = vmatprep.subr.bf16.mxu0 %v5968_v1 }
  0x5a   :  { %308 = vmatmul.mubr.bf16.gmra.mrb[28].mxu0 %v5958_v16  ;;  %v5996_v16 = vld [vmem:[%s8934_s5 + $0x60] ss:$16 sps:$4 sm:$0xff]  }
  0x5b   :  { %892 = vmatpush1.bf16.msra.mxu0 %v5966_v19 }
  0x5c   :  { %893 = vmatprep.subr.bf16.mxu0 %v5974_v21  ;;  %v6007_v21 = vld [vmem:[%s8934_s5 + $0x8c] ss:$16 sps:$4 sm:$0xff]  }
  0x5f   :  { %894 = vmatpush1.bf16.msra.mxu0 %v5972_v23 }
  0x60   :  { %4506 = vmatprep.subr.bf16.mxu0 %v5983_v26  ;;  %v6002_v26 = vld [vmem:[%s8934_s5 + $0x80] ss:$16 sps:$4 sm:$0xff]  }
  0xf5   :  { %v239_v34 = vpop.f32.mrb[0].mxu0 }
  0xf6   :  { %v240_v35 = vadd.f32 %v239_v34, %v7095_v32  ;;  %v241_v36 = vpop.f32.mrb[1].mxu0  ;;  %v6010_v34 = vld [vmem:[%s8934_s5 + $0xa4] ss:$16 sps:$4 sm:$0xff]  }
  0xf7   :  { %v242_v37 = vadd.f32 %v241_v36, %v7098_v33  ;;  %v243_v38 = vpop.f32.mrb[2].mxu0 }
  0xf8   :  { %v244_v39 = vadd.f32 %v243_v38, %v7095_v32  ;;  %v245_v40 = vpop.f32.mrb[3].mxu0  ;;  %v318_v42 = vmax.f32 %v240_v35, 0.0  ;;  %v6013_v35 = vld [vmem:[%s8934_s5 + $0xac] ss:$16 sps:$4 sm:$0xff]  }
  0xf9   :  { %v246_v41 = vadd.f32 %v245_v40, %v7098_v33  ;;  %v319_v44 = vmax.f32 %v242_v37, 0.0 }
  0xfa   :  { %v320_v43 = vmax.f32 %v244_v39, 0.0 }
  0xfb   :  { %v321_v45 = vmax.f32 %v246_v41, 0.0 }
  0xfc   :  { %v350_v48 = vpack.c.bf16 %v320_v43, %v318_v42  ;;  %v6008_v42 = vld [vmem:[%s8934_s5 + $0xa0] ss:$16 sps:$4 sm:$0xff]   ;;  %v6011_v43 = vld [vmem:[%s8934_s5 + $0xa8] ss:$16 sps:$4 sm:$0xff]  }
  0xfd   :  { %v351_v51 = vpack.c.bf16 %v321_v45, %v319_v44  ;;  %v249_v52 = vpop.f32.mrb[4].mxu0 }
  0xfe   :  { %v250_v53 = vadd.f32 %v249_v52, %v7095_v32  ;;  %v251_v54 = vpop.f32.mrb[5].mxu0 }
  0xff   :  { %782 = vmatprep.mubr.bf16.mxu1 %v351_v51  ;;  %895 = vmatprep.mubr.bf16.mxu0 %v351_v51  ;;  %v252_v55 = vadd.f32 %v251_v54, %v7098_v33  ;;  %v253_v56 = vpop.f32.mrb[6].mxu0  ;;  %v6017_v54 = vld [vmem:[%s8934_s5 + $0xc8] ss:$16 sps:$4 sm:$0xff]  }
 0x100   :  { %783 = vmatmul.mubr.bf16.vlgmr.msra.gmra.mrb[0].mxu1 %v350_v48  ;;  %896 = vmatmul.mubr.bf16.vlgmr.msra.gmra.mrb[32].mxu0 %v350_v48  ;;  %v322_v59 = vmax.f32 %v250_v53, 0.0  ;;  %v254_v60 = vadd.f32 %v253_v56, %v7095_v32  ;;  %v255_v61 = vpop.f32.mrb[7].mxu0  ;;  %v6019_v48 = vld [vmem:[%s8934_s5 + $0xcc] ss:$16 sps:$4 sm:$0xff]   ;;  %v6014_v53 = vld [vmem:[%s8934_s5 + $0xc0] ss:$16 sps:$4 sm:$0xff]  }
 0x101   :  { %v323_v0 = vmax.f32 %v252_v55, 0.0  ;;  %v256_v2 = vadd.f32 %v255_v61, %v7098_v33  ;;  %4179 = vmatpush1.bf16.msra.mxu1 %v5978_v46  ;;  %4507 = vmatpush1.bf16.msra.mxu0 %v5981_v47  ;;  %v6016_v47 = vld [vmem:[%s8934_s5 + $0xc4] ss:$16 sps:$4 sm:$0xff]  }
 0x102   :  { %v324_v3 = vmax.f32 %v254_v60, 0.0  ;;  %4180 = vmatprep.subr.bf16.mxu1 %v5986_v49  ;;  %4508 = vmatprep.subr.bf16.mxu0 %v5989_v50  ;;  %v6022_v56 = vld [vmem:[%s8934_s5 + $0xe4] ss:$16 sps:$4 sm:$0xff]  }
 0x103   :  { %v325_v4 = vmax.f32 %v256_v2, 0.0  ;;  %v6023_v2 = vld [vmem:[%s8934_s5 + $0xe8] ss:$16 sps:$4 sm:$0xff]  }
 0x104   :  { %v352_v7 = vpack.c.bf16 %v324_v3, %v322_v59 }
 0x105   :  { %v353_v10 = vpack.c.bf16 %v325_v4, %v323_v0  ;;  %v259_v11 = vpop.f32.mrb[8].mxu0  ;;  %4181 = vmatpush1.bf16.msra.mxu1 %v5984_v57  ;;  %4509 = vmatpush1.bf16.msra.mxu0 %v5987_v58  ;;  %v6025_v57 = vld [vmem:[%s8934_s5 + $0xec] ss:$16 sps:$4 sm:$0xff]   ;;  %v6020_v0 = vld [vmem:[%s8934_s5 + $0xe0] ss:$16 sps:$4 sm:$0xff]  }
 0x106   :  { %v260_v12 = vadd.f32 %v259_v11, %v7095_v32  ;;  %v261_v13 = vpop.f32.mrb[9].mxu0  ;;  %4182 = vmatprep.subr.bf16.mxu1 %v5992_v62  ;;  %4510 = vmatprep.subr.bf16.mxu0 %v5995_v63 }
 0x107   :  { %792 = vmatprep.mubr.bf16.mxu1 %v353_v10  ;;  %905 = vmatprep.mubr.bf16.mxu0 %v353_v10  ;;  %v262_v14 = vadd.f32 %v261_v13, %v7098_v33  ;;  %v263_v15 = vpop.f32.mrb[10].mxu0  ;;  %v6029_v13 = vld [vmem:[%s8934_s5 + $0x108] ss:$16 sps:$4 sm:$0xff]  }
 0x108   :  { %793 = vmatmul.mubr.bf16.gmra.mrb[4].mxu1 %v352_v7  ;;  %906 = vmatmul.mubr.bf16.gmra.mrb[36].mxu0 %v352_v7  ;;  %v326_v1 = vmax.f32 %v260_v12, 0.0  ;;  %v264_v18 = vadd.f32 %v263_v15, %v7095_v32  ;;  %v265_v19 = vpop.f32.mrb[11].mxu0  ;;  %v6031_v7 = vld [vmem:[%s8934_s5 + $0x10c] ss:$16 sps:$4 sm:$0xff]   ;;  %v6026_v12 = vld [vmem:[%s8934_s5 + $0x100] ss:$16 sps:$4 sm:$0xff]  }
 0x109   :  { %v327_v22 = vmax.f32 %v262_v14, 0.0  ;;  %v266_v23 = vadd.f32 %v265_v19, %v7098_v33  ;;  %4183 = vmatpush1.bf16.msra.mxu1 %v5990_v5  ;;  %4511 = vmatpush1.bf16.msra.mxu0 %v5993_v6  ;;  %v6028_v6 = vld [vmem:[%s8934_s5 + $0x104] ss:$16 sps:$4 sm:$0xff]  }
 0x10a   :  { %v328_v24 = vmax.f32 %v264_v18, 0.0  ;;  %4184 = vmatprep.subr.bf16.mxu1 %v5998_v8  ;;  %4512 = vmatprep.subr.bf16.mxu0 %v6001_v9  ;;  %v6034_v15 = vld [vmem:[%s8934_s5 + $0x124] ss:$16 sps:$4 sm:$0xff]  }
 0x10b   :  { %v329_v25 = vmax.f32 %v266_v23, 0.0  ;;  %v6035_v23 = vld [vmem:[%s8934_s5 + $0x128] ss:$16 sps:$4 sm:$0xff]  }
 0x10c   :  { %v354_v29 = vpack.c.bf16 %v328_v24, %v326_v1 }
 0x10d   :  { %v355_v36 = vpack.c.bf16 %v329_v25, %v327_v22  ;;  %v269_v37 = vpop.f32.mrb[12].mxu0  ;;  %4185 = vmatpush1.bf16.msra.mxu1 %v5996_v16  ;;  %4513 = vmatpush1.bf16.msra.mxu0 %v5999_v17  ;;  %v6037_v16 = vld [vmem:[%s8934_s5 + $0x12c] ss:$16 sps:$4 sm:$0xff]   ;;  %v6032_v22 = vld [vmem:[%s8934_s5 + $0x120] ss:$16 sps:$4 sm:$0xff]  }
 0x10e   :  { %v270_v38 = vadd.f32 %v269_v37, %v7095_v32  ;;  %v271_v39 = vpop.f32.mrb[13].mxu0  ;;  %4186 = vmatprep.subr.bf16.mxu1 %v6004_v20  ;;  %4514 = vmatprep.subr.bf16.mxu0 %v6007_v21 }
 0x10f   :  { %802 = vmatprep.mubr.bf16.mxu1 %v355_v36  ;;  %915 = vmatprep.mubr.bf16.mxu0 %v355_v36  ;;  %v272_v40 = vadd.f32 %v271_v39, %v7098_v33  ;;  %v273_v41 = vpop.f32.mrb[14].mxu0  ;;  %v6041_v39 = vld [vmem:[%s8934_s5 + $0x148] ss:$16 sps:$4 sm:$0xff]  }
 0x110   :  { %803 = vmatmul.mubr.bf16.gmra.mrb[8].mxu1 %v354_v29  ;;  %916 = vmatmul.mubr.bf16.gmra.mrb[40].mxu0 %v354_v29  ;;  %v330_v44 = vmax.f32 %v270_v38, 0.0  ;;  %v274_v45 = vadd.f32 %v273_v41, %v7095_v32  ;;  %v275_v46 = vpop.f32.mrb[15].mxu0  ;;  %v6043_v29 = vld [vmem:[%s8934_s5 + $0x14c] ss:$16 sps:$4 sm:$0xff]   ;;  %v6038_v38 = vld [vmem:[%s8934_s5 + $0x140] ss:$16 sps:$4 sm:$0xff]  }
 0x111   :  { %v331_v49 = vmax.f32 %v272_v40, 0.0  ;;  %v276_v50 = vadd.f32 %v275_v46, %v7098_v33  ;;  %4187 = vmatpush1.bf16.msra.mxu1 %v6002_v26  ;;  %4515 = vmatpush1.bf16.msra.mxu0 %v6005_v27  ;;  %v6040_v27 = vld [vmem:[%s8934_s5 + $0x144] ss:$16 sps:$4 sm:$0xff]  }
 0x112   :  { %v332_v51 = vmax.f32 %v274_v45, 0.0  ;;  %4188 = vmatprep.subr.bf16.mxu1 %v6010_v34  ;;  %4516 = vmatprep.subr.bf16.mxu0 %v6013_v35  ;;  %v6046_v41 = vld [vmem:[%s8934_s5 + $0x164] ss:$16 sps:$4 sm:$0xff]  }
 0x113   :  { %v333_v52 = vmax.f32 %v276_v50, 0.0  ;;  %v6047_v50 = vld [vmem:[%s8934_s5 + $0x168] ss:$16 sps:$4 sm:$0xff]  }
 0x114   :  { %v356_v55 = vpack.c.bf16 %v332_v51, %v330_v44 }
 0x115   :  { %v357_v58 = vpack.c.bf16 %v333_v52, %v331_v49  ;;  %v279_v59 = vpop.f32.mrb[16].mxu0  ;;  %4189 = vmatpush1.bf16.msra.mxu1 %v6008_v42  ;;  %4517 = vmatpush1.bf16.msra.mxu0 %v6011_v43  ;;  %v6049_v42 = vld [vmem:[%s8934_s5 + $0x16c] ss:$16 sps:$4 sm:$0xff]   ;;  %v6044_v49 = vld [vmem:[%s8934_s5 + $0x160] ss:$16 sps:$4 sm:$0xff]  }
 0x116   :  { %v280_v60 = vadd.f32 %v279_v59, %v7095_v32  ;;  %v281_v61 = vpop.f32.mrb[17].mxu0  ;;  %4190 = vmatprep.subr.bf16.mxu1 %v6016_v47  ;;  %4518 = vmatprep.subr.bf16.mxu0 %v6019_v48 }
 0x117   :  { %v282_v62 = vadd.f32 %v281_v61, %v7098_v33  ;;  %v283_v63 = vpop.f32.mrb[18].mxu0  ;;  %812 = vmatprep.mubr.bf16.mxu1 %v357_v58  ;;  %925 = vmatprep.mubr.bf16.mxu0 %v357_v58  ;;  %v6053_v61 = vld [vmem:[%s8934_s5 + $0x188] ss:$16 sps:$4 sm:$0xff]  }
 0x118   :  { %v334_v3 = vmax.f32 %v280_v60, 0.0  ;;  %v284_v4 = vadd.f32 %v283_v63, %v7095_v32  ;;  %v285_v5 = vpop.f32.mrb[19].mxu0  ;;  %813 = vmatmul.mubr.bf16.gmra.mrb[12].mxu1 %v356_v55  ;;  %926 = vmatmul.mubr.bf16.gmra.mrb[44].mxu0 %v356_v55  ;;  %v6055_v55 = vld [vmem:[%s8934_s5 + $0x18c] ss:$16 sps:$4 sm:$0xff]   ;;  %v6050_v60 = vld [vmem:[%s8934_s5 + $0x180] ss:$16 sps:$4 sm:$0xff]  }
 0x119   :  { %v335_v8 = vmax.f32 %v282_v62, 0.0  ;;  %v286_v9 = vadd.f32 %v285_v5, %v7098_v33  ;;  %4191 = vmatpush1.bf16.msra.mxu1 %v6014_v53  ;;  %4519 = vmatpush1.bf16.msra.mxu0 %v6017_v54  ;;  %v6052_v54 = vld [vmem:[%s8934_s5 + $0x184] ss:$16 sps:$4 sm:$0xff]  }
 0x11a   :  { %v336_v10 = vmax.f32 %v284_v4, 0.0  ;;  %4192 = vmatprep.subr.bf16.mxu1 %v6022_v56  ;;  %4520 = vmatprep.subr.bf16.mxu0 %v6025_v57 }
 0x11b   :  { %v337_v11 = vmax.f32 %v286_v9, 0.0 }
 0x11c   :  { %v358_v14 = vpack.c.bf16 %v336_v10, %v334_v3 }
 0x11d   :  { %v359_v17 = vpack.c.bf16 %v337_v11, %v335_v8  ;;  %v289_v1 = vpop.f32.mrb[20].mxu0  ;;  %4193 = vmatpush1.bf16.msra.mxu1 %v6020_v0  ;;  %4521 = vmatpush1.bf16.msra.mxu0 %v6023_v2 }
 0x11e   :  { %v290_v18 = vadd.f32 %v289_v1, %v7095_v32  ;;  %v291_v19 = vpop.f32.mrb[21].mxu0  ;;  %4194 = vmatprep.subr.bf16.mxu1 %v6028_v6  ;;  %4522 = vmatprep.subr.bf16.mxu0 %v6031_v7  ;;  %v6067_v1 = vld [vmem:[%s8934_s5 + $0x1cc] ss:$16 sps:$4 sm:$0xff]  }
 0x11f   :  { %v292_v20 = vadd.f32 %v291_v19, %v7098_v33  ;;  %v293_v21 = vpop.f32.mrb[22].mxu0  ;;  %822 = vmatprep.mubr.bf16.mxu1 %v359_v17  ;;  %935 = vmatprep.mubr.bf16.mxu0 %v359_v17  ;;  %v6064_v17 = vld [vmem:[%s8934_s5 + $0x1c4] ss:$16 sps:$4 sm:$0xff]   ;;  %v6065_v19 = vld [vmem:[%s8934_s5 + $0x1c8] ss:$16 sps:$4 sm:$0xff]  }
 0x120   :  { %v338_v24 = vmax.f32 %v290_v18, 0.0  ;;  %v294_v25 = vadd.f32 %v293_v21, %v7095_v32  ;;  %v295_v26 = vpop.f32.mrb[23].mxu0  ;;  %823 = vmatmul.mubr.bf16.gmra.mrb[16].mxu1 %v358_v14  ;;  %936 = vmatmul.mubr.bf16.gmra.mrb[48].mxu0 %v358_v14  ;;  %v6062_v18 = vld [vmem:[%s8934_s5 + $0x1c0] ss:$16 sps:$4 sm:$0xff]   ;;  %v6073_v21 = vld [vmem:[%s8934_s5 + $0x1ec] ss:$16 sps:$4 sm:$0xff]  }
 0x121   :  { %v339_v34 = vmax.f32 %v292_v20, 0.0  ;;  %v296_v35 = vadd.f32 %v295_v26, %v7098_v33  ;;  %4195 = vmatpush1.bf16.msra.mxu1 %v6026_v12  ;;  %4523 = vmatpush1.bf16.msra.mxu0 %v6029_v13  ;;  %v6070_v20 = vld [vmem:[%s8934_s5 + $0x1e4] ss:$16 sps:$4 sm:$0xff]  }
 0x122   :  { %v340_v36 = vmax.f32 %v294_v25, 0.0  ;;  %4196 = vmatprep.subr.bf16.mxu1 %v6034_v15  ;;  %4524 = vmatprep.subr.bf16.mxu0 %v6037_v16  ;;  %v6061_v15 = vld [vmem:[%s8934_s5 + $0x1ac] ss:$16 sps:$4 sm:$0xff]   ;;  %v6059_v16 = vld [vmem:[%s8934_s5 + $0x1a8] ss:$16 sps:$4 sm:$0xff]  }
 0x123   :  { %v341_v37 = vmax.f32 %v296_v35, 0.0  ;;  %v6079_v25 = vld [vmem:[%s8934_s5 + $0x20c] ss:$16 sps:$4 sm:$0xff]  }
 0x124   :  { %v360_v40 = vpack.c.bf16 %v340_v36, %v338_v24  ;;  %v6076_v24 = vld [vmem:[%s8934_s5 + $0x204] ss:$16 sps:$4 sm:$0xff]  }
 0x125   :  { %v361_v43 = vpack.c.bf16 %v341_v37, %v339_v34  ;;  %v299_v44 = vpop.f32.mrb[24].mxu0  ;;  %4197 = vmatpush1.bf16.msra.mxu1 %v6032_v22  ;;  %4525 = vmatpush1.bf16.msra.mxu0 %v6035_v23  ;;  %v6068_v22 = vld [vmem:[%s8934_s5 + $0x1e0] ss:$16 sps:$4 sm:$0xff]   ;;  %v6071_v23 = vld [vmem:[%s8934_s5 + $0x1e8] ss:$16 sps:$4 sm:$0xff]  }
 0x126   :  { %v300_v45 = vadd.f32 %v299_v44, %v7095_v32  ;;  %v301_v46 = vpop.f32.mrb[25].mxu0  ;;  %4198 = vmatprep.subr.bf16.mxu1 %v6040_v27  ;;  %4526 = vmatprep.subr.bf16.mxu0 %v6043_v29  ;;  %v1008_v29 = vld [vmem:[%s8936_s4] sm:$0x3] }
 0x127   :  { %v302_v47 = vadd.f32 %v301_v46, %v7098_v33  ;;  %v303_v48 = vpop.f32.mrb[26].mxu0  ;;  %832 = vmatprep.mubr.bf16.mxu1 %v361_v43  ;;  %945 = vmatprep.mubr.bf16.mxu0 %v361_v43 }
 0x128   :  { %v342_v51 = vmax.f32 %v300_v45, 0.0  ;;  %v304_v52 = vadd.f32 %v303_v48, %v7095_v32  ;;  %v305_v53 = vpop.f32.mrb[27].mxu0  ;;  %833 = vmatmul.mubr.bf16.gmra.mrb[20].mxu1 %v360_v40  ;;  %946 = vmatmul.mubr.bf16.gmra.mrb[52].mxu0 %v360_v40  ;;  %v7331_v45 = vrot.slane %v1008_v29, %v7092_v31 }
 0x129   :  { %v343_v56 = vmax.f32 %v302_v47, 0.0  ;;  %v306_v57 = vadd.f32 %v305_v53, %v7098_v33  ;;  %4199 = vmatpush1.bf16.msra.mxu1 %v6038_v38  ;;  %4527 = vmatpush1.bf16.msra.mxu0 %v6041_v39 }
 0x12a   :  { %v344_v58 = vmax.f32 %v304_v52, 0.0  ;;  %4200 = vmatprep.subr.bf16.mxu1 %v6046_v41  ;;  %4528 = vmatprep.subr.bf16.mxu0 %v6049_v42  ;;  %v7328_v41 = vrot.slane %v1008_v29, %v7089_v30  ;;  %v6097_v29 = vld [vmem:[%s8934_s5 + $0x26c] ss:$16 sps:$4 sm:$0xff]  }
 0x12b   :  { %v345_v59 = vmax.f32 %v306_v57, 0.0 }
 0x12c   :  { %v362_v62 = vpack.c.bf16 %v344_v58, %v342_v51 }
 0x12d   :  { %v363_v63 = vpack.c.bf16 %v345_v59, %v343_v56  ;;  %v309_v0 = vpop.f32.mrb[28].mxu0  ;;  %4201 = vmatpush1.bf16.msra.mxu1 %v6044_v49  ;;  %4529 = vmatpush1.bf16.msra.mxu0 %v6047_v50 }
 0x12e   :  { %v310_v2 = vadd.f32 %v309_v0, %v7095_v32  ;;  %v311_v3 = vpop.f32.mrb[29].mxu0  ;;  %4202 = vmatprep.subr.bf16.mxu1 %v6052_v54  ;;  %4530 = vmatprep.subr.bf16.mxu0 %v6055_v55  ;;  %v6074_v0 = vld [vmem:[%s8934_s5 + $0x200] ss:$16 sps:$4 sm:$0xff]  }
 0x12f   :  { %v312_v4 = vadd.f32 %v311_v3, %v7098_v33  ;;  %v313_v5 = vpop.f32.mrb[30].mxu0  ;;  %842 = vmatprep.mubr.bf16.mxu1 %v363_v63  ;;  %955 = vmatprep.mubr.bf16.mxu0 %v363_v63 }
 0x130   :  { %v346_v6 = vmax.f32 %v310_v2, 0.0  ;;  %v314_v7 = vadd.f32 %v313_v5, %v7095_v32  ;;  %v315_v8 = vpop.f32.mrb[31].mxu0  ;;  %843 = vmatmul.mubr.bf16.gmra.mrb[24].mxu1 %v362_v62  ;;  %956 = vmatmul.mubr.bf16.gmra.mrb[56].mxu0 %v362_v62  ;;  %v6058_v32 = vld [vmem:[%s8934_s5 + $0x1a4] ss:$16 sps:$4 sm:$0xff]   ;;  %v6077_v2 = vld [vmem:[%s8934_s5 + $0x208] ss:$16 sps:$4 sm:$0xff]  }
 0x131   :  { %v347_v9 = vmax.f32 %v312_v4, 0.0  ;;  %v316_v10 = vadd.f32 %v315_v8, %v7098_v33  ;;  %4203 = vmatpush1.bf16.msra.mxu1 %v6050_v60  ;;  %4531 = vmatpush1.bf16.msra.mxu0 %v6053_v61  ;;  %v6056_v33 = vld [vmem:[%s8934_s5 + $0x1a0] ss:$16 sps:$4 sm:$0xff]   ;;  %v6082_v5 = vld [vmem:[%s8934_s5 + $0x224] ss:$16 sps:$4 sm:$0xff]  }
 0x132   :  { %v348_v11 = vmax.f32 %v314_v7, 0.0  ;;  %4204 = vmatprep.subr.bf16.mxu1 %v6058_v32  ;;  %4532 = vmatprep.subr.bf16.mxu0 %v6061_v15  ;;  %v6091_v32 = vld [vmem:[%s8934_s5 + $0x24c] ss:$16 sps:$4 sm:$0xff]  }
 0x133   :  { %v349_v12 = vmax.f32 %v316_v10, 0.0  ;;  %v6083_v10 = vld [vmem:[%s8934_s5 + $0x228] ss:$16 sps:$4 sm:$0xff]  }
 0x134   :  { %v364_v13 = vpack.c.bf16 %v348_v11, %v346_v6  ;;  %v6085_v6 = vld [vmem:[%s8934_s5 + $0x22c] ss:$16 sps:$4 sm:$0xff]  }
 0x135   :  { %v365_v14 = vpack.c.bf16 %v349_v12, %v347_v9  ;;  %4205 = vmatpush1.bf16.msra.mxu1 %v6056_v33  ;;  %4533 = vmatpush1.bf16.msra.mxu0 %v6059_v16  ;;  %v6080_v9 = vld [vmem:[%s8934_s5 + $0x220] ss:$16 sps:$4 sm:$0xff]  }
 0x136   :  { %4206 = vmatprep.subr.bf16.mxu1 %v6064_v17  ;;  %4534 = vmatprep.subr.bf16.mxu0 %v6067_v1 }
 0x137   :  { %852 = vmatprep.mubr.bf16.mxu1 %v365_v14  ;;  %965 = vmatprep.mubr.bf16.mxu0 %v365_v14  ;;  %v6088_v14 = vld [vmem:[%s8934_s5 + $0x244] ss:$16 sps:$4 sm:$0xff]  }
 0x138   :  { %853 = vmatmul.mubr.bf16.gmra.mrb[28].mxu1 %v364_v13  ;;  %966 = vmatmul.mubr.bf16.gmra.mrb[60].mxu0 %v364_v13 }
 0x139   :  { %4207 = vmatpush1.bf16.msra.mxu1 %v6062_v18  ;;  %4535 = vmatpush1.bf16.msra.mxu0 %v6065_v19 }
 0x13a   :  { %4208 = vmatprep.subr.bf16.mxu1 %v6070_v20  ;;  %4536 = vmatprep.subr.bf16.mxu0 %v6073_v21 }
 0x13d   :  { %4209 = vmatpush1.bf16.msra.mxu1 %v6068_v22  ;;  %4537 = vmatpush1.bf16.msra.mxu0 %v6071_v23  ;;  %v6086_v23 = vld [vmem:[%s8934_s5 + $0x240] ss:$16 sps:$4 sm:$0xff]  }
 0x13e   :  { %4219 = vmatprep.subr.bf16.mxu1 %v6076_v24  ;;  %4547 = vmatprep.subr.bf16.mxu0 %v6079_v25  ;;  %v6089_v24 = vld [vmem:[%s8934_s5 + $0x248] ss:$16 sps:$4 sm:$0xff]  }
 0x1d3   :  { %v784_v26 = vpop.f32.mrb[0].mxu1  ;;  %v897_v27 = vpop.f32.mrb[32].mxu0 }
 0x1d4   :  { %v976_v34 = vmax.f32 %v784_v26, %v897_v27  ;;  %v786_v35 = vpop.f32.mrb[1].mxu1  ;;  %v899_v36 = vpop.f32.mrb[33].mxu0  ;;  %v6094_v27 = vld [vmem:[%s8934_s5 + $0x264] ss:$16 sps:$4 sm:$0xff]  }
 0x1d5   :  { %v977_v37 = vmax.f32 %v786_v35, %v899_v36  ;;  %v788_v38 = vpop.f32.mrb[2].mxu1  ;;  %v901_v39 = vpop.f32.mrb[34].mxu0  ;;  %v6092_v36 = vld [vmem:[%s8934_s5 + $0x260] ss:$16 sps:$4 sm:$0xff]  }
 0x1d6   :  { %v978_v40 = vmax.f32 %v788_v38, %v901_v39  ;;  %v790_v42 = vpop.f32.mrb[3].mxu1  ;;  %v903_v43 = vpop.f32.mrb[35].mxu0  ;;  %v6100_v38 = vld [vmem:[%s8934_s5 + $0x284] ss:$16 sps:$4 sm:$0xff]   ;;  %v6103_v39 = vld [vmem:[%s8934_s5 + $0x28c] ss:$16 sps:$4 sm:$0xff]  }
 0x1d7   :  { %v979_v44 = vmax.f32 %v790_v42, %v903_v43  ;;  %v6101_v42 = vld [vmem:[%s8934_s5 + $0x288] ss:$16 sps:$4 sm:$0xff]   ;;  %v6106_v43 = vld [vmem:[%s8934_s5 + $0x2a4] ss:$16 sps:$4 sm:$0xff]  }
 0x1d8   :  { %v1009_v46 = vmax.f32 %v976_v34, %v978_v40  ;;  %v6098_v40 = vld [vmem:[%s8934_s5 + $0x280] ss:$16 sps:$4 sm:$0xff]  }
 0x1d9   :  { %v1010_v47 = vmax.f32 %v977_v37, %v979_v44  ;;  %v6095_v37 = vld [vmem:[%s8934_s5 + $0x268] ss:$16 sps:$4 sm:$0xff]   ;;  %v6109_v44 = vld [vmem:[%s8934_s5 + $0x2ac] ss:$16 sps:$4 sm:$0xff]  }
 0x1da   :  { %v1022_v48 = vadd.f32 %v7328_v41, %v1009_v46  ;;  %v6104_v46 = vld [vmem:[%s8934_s5 + $0x2a0] ss:$16 sps:$4 sm:$0xff]  }
 0x1db   :  { %v1023_v49 = vadd.f32 %v7331_v45, %v1010_v47  ;;  %v794_v50 = vpop.f32.mrb[4].mxu1  ;;  %v907_v51 = vpop.f32.mrb[36].mxu0  ;;  %v6107_v47 = vld [vmem:[%s8934_s5 + $0x2a8] ss:$16 sps:$4 sm:$0xff]  }
 0x1dc   :  { %v1024_v52 = vmax.f32 %v1022_v48, 0.0  ;;  %v980_v53 = vmax.f32 %v794_v50, %v907_v51  ;;  %v796_v54 = vpop.f32.mrb[5].mxu1  ;;  %v909_v55 = vpop.f32.mrb[37].mxu0  ;;  %v6112_v48 = vld [vmem:[%s8934_s5 + $0x2c4] ss:$16 sps:$4 sm:$0xff]  }
 0x1dd   :  { %v1025_v56 = vmax.f32 %v1023_v49, 0.0  ;;  %v981_v57 = vmax.f32 %v796_v54, %v909_v55  ;;  %v798_v58 = vpop.f32.mrb[6].mxu1  ;;  %v911_v59 = vpop.f32.mrb[38].mxu0  ;;  %v6115_v49 = vld [vmem:[%s8934_s5 + $0x2cc] ss:$16 sps:$4 sm:$0xff]  }
 0x1de   :  { %v982_v60 = vmax.f32 %v798_v58, %v911_v59  ;;  %v800_v61 = vpop.f32.mrb[7].mxu1  ;;  %v913_v62 = vpop.f32.mrb[39].mxu0  ;;  %v1026_v4 = vpack.c.bf16 %v1024_v52, %v1024_v52  ;;  %v6110_v50 = vld [vmem:[%s8934_s5 + $0x2c0] ss:$16 sps:$4 sm:$0xff]   ;;  %v6113_v51 = vld [vmem:[%s8934_s5 + $0x2c8] ss:$16 sps:$4 sm:$0xff]  }
 0x1df   :  { %v1027_v63 = vpack.c.bf16 %v1025_v56, %v1025_v56  ;;  %v983_v3 = vmax.f32 %v800_v61, %v913_v62  ;;  %v6118_v52 = vld [vmem:[%s8934_s5 + $0x2e4] ss:$16 sps:$4 sm:$0xff]   ;;  %v6116_v54 = vld [vmem:[%s8934_s5 + $0x2e0] ss:$16 sps:$4 sm:$0xff]   ;;  %v6119_v55 = vld [vmem:[%s8934_s5 + $0x2e8] ss:$16 sps:$4 sm:$0xff]  }
 0x1e0   :  { %v7347_v7 = vmax.f32 %v980_v53, %v982_v60  ;;  %v6121_v53 = vld [vmem:[%s8934_s5 + $0x2ec] ss:$16 sps:$4 sm:$0xff]   ;;  %v6124_v56 = vld [vmem:[%s8934_s5 + $0x304] ss:$16 sps:$4 sm:$0xff]   ;;  %v6122_v58 = vld [vmem:[%s8934_s5 + $0x300] ss:$16 sps:$4 sm:$0xff]  }
 0x1e1   :  { %4210 = vmatprep.mubr.bf16.mxu1 %v1027_v63  ;;  %4538 = vmatprep.mubr.bf16.mxu0 %v1027_v63  ;;  %v1029_v8 = vmax.f32 %v981_v57, %v983_v3  ;;  %v6127_v57 = vld [vmem:[%s8934_s5 + $0x30c] ss:$16 sps:$4 sm:$0xff]   ;;  %v6125_v59 = vld [vmem:[%s8934_s5 + $0x308] ss:$16 sps:$4 sm:$0xff]   ;;  %v6130_v60 = vld [vmem:[%s8934_s5 + $0x324] ss:$16 sps:$4 sm:$0xff]  }
 0x1e2   :  { %4211 = vmatmul.mubr.bf16.vlgmr.msra.gmra.mrb[32].mxu1 %v1026_v4  ;;  %4539 = vmatmul.mubr.bf16.vlgmr.msra.gmra.mrb[64].mxu0 %v1026_v4  ;;  %v6133_v61 = vld [vmem:[%s8934_s5 + $0x32c] ss:$16 sps:$4 sm:$0xff]   ;;  %v6131_v3 = vld [vmem:[%s8934_s5 + $0x328] ss:$16 sps:$4 sm:$0xff]  }
 0x1e3   :  { %4220 = vmatpush1.bf16.msra.mxu1 %v6074_v0  ;;  %4548 = vmatpush1.bf16.msra.mxu0 %v6077_v2  ;;  %v1031_v11 = vadd.f32 %v1029_v8, %v7331_v45  ;;  %v804_v12 = vpop.f32.mrb[8].mxu1  ;;  %v917_v13 = vpop.f32.mrb[40].mxu0  ;;  %v6128_v2 = vld [vmem:[%s8934_s5 + $0x320] ss:$16 sps:$4 sm:$0xff]   ;;  %v6139_v8 = vld [vmem:[%s8934_s5 + $0x34c] ss:$16 sps:$4 sm:$0xff]  }
 0x1e4   :  { %4221 = vmatprep.subr.bf16.mxu1 %v6082_v5  ;;  %4549 = vmatprep.subr.bf16.mxu0 %v6085_v6  ;;  %v984_v15 = vmax.f32 %v804_v12, %v917_v13  ;;  %v806_v33 = vpop.f32.mrb[9].mxu1  ;;  %v919_v16 = vpop.f32.mrb[41].mxu0  ;;  %v6136_v6 = vld [vmem:[%s8934_s5 + $0x344] ss:$16 sps:$4 sm:$0xff]  }
 0x1e5   :  { %v1033_v17 = vmax.f32 %v1031_v11, 0.0  ;;  %v985_v1 = vmax.f32 %v806_v33, %v919_v16  ;;  %v808_v18 = vpop.f32.mrb[10].mxu1  ;;  %v921_v19 = vpop.f32.mrb[42].mxu0  ;;  %v6137_v33 = vld [vmem:[%s8934_s5 + $0x348] ss:$16 sps:$4 sm:$0xff]  }
 0x1e6   :  { %v986_v20 = vmax.f32 %v808_v18, %v921_v19  ;;  %v810_v21 = vpop.f32.mrb[11].mxu1  ;;  %v923_v22 = vpop.f32.mrb[43].mxu0 }
 0x1e7   :  { %4222 = vmatpush1.bf16.msra.mxu1 %v6080_v9  ;;  %4550 = vmatpush1.bf16.msra.mxu0 %v6083_v10  ;;  %v1035_v25 = vpack.c.bf16 %v1033_v17, %v1033_v17  ;;  %v987_v26 = vmax.f32 %v810_v21, %v923_v22  ;;  %v6142_v17 = vld [vmem:[%s8934_s5 + $0x364] ss:$16 sps:$4 sm:$0xff]   ;;  %v6140_v22 = vld [vmem:[%s8934_s5 + $0x360] ss:$16 sps:$4 sm:$0xff]  }
 0x1e8   :  { %4223 = vmatprep.subr.bf16.mxu1 %v6088_v14  ;;  %4551 = vmatprep.subr.bf16.mxu0 %v6091_v32  ;;  %v7374_v34 = vmax.f32 %v984_v15, %v986_v20  ;;  %v6134_v15 = vld [vmem:[%s8934_s5 + $0x340] ss:$16 sps:$4 sm:$0xff]  }
 0x1e9   :  { %4251 = vmatprep.mubr.bf16.mxu1 %v1035_v25  ;;  %4579 = vmatprep.mubr.bf16.mxu0 %v1035_v25  ;;  %v7376_v35 = vmax.f32 %v985_v1, %v987_v26  ;;  %v6145_v1 = vld [vmem:[%s8934_s5 + $0x36c] ss:$16 sps:$4 sm:$0xff]   ;;  %v6148_v26 = vld [vmem:[%s8934_s5 + $0x384] ss:$16 sps:$4 sm:$0xff]  }
 0x1eb   :  { %4224 = vmatpush1.bf16.msra.mxu1 %v6086_v23  ;;  %4552 = vmatpush1.bf16.msra.mxu0 %v6089_v24  ;;  %v814_v62 = vpop.f32.mrb[12].mxu1  ;;  %v927_v63 = vpop.f32.mrb[44].mxu0  ;;  %v6143_v23 = vld [vmem:[%s8934_s5 + $0x368] ss:$16 sps:$4 sm:$0xff]  }
 0x1ec   :  { %4225 = vmatprep.subr.bf16.mxu1 %v6094_v27  ;;  %4553 = vmatprep.subr.bf16.mxu0 %v6097_v29  ;;  %v988_v0 = vmax.f32 %v814_v62, %v927_v63  ;;  %v816_v4 = vpop.f32.mrb[13].mxu1  ;;  %v929_v5 = vpop.f32.mrb[45].mxu0  ;;  %v6151_v27 = vld [vmem:[%s8934_s5 + $0x38c] ss:$16 sps:$4 sm:$0xff]  }
 0x1ed   :  { %v989_v9 = vmax.f32 %v816_v4, %v929_v5  ;;  %v818_v10 = vpop.f32.mrb[14].mxu1  ;;  %v931_v11 = vpop.f32.mrb[46].mxu0  ;;  %v6161_v4 = vld [vmem:[%s8934_s5 + $0x3c8] ss:$16 sps:$4 sm:$0xff]  }
 0x1ee   :  { %v990_v12 = vmax.f32 %v818_v10, %v931_v11  ;;  %v820_v13 = vpop.f32.mrb[15].mxu1  ;;  %v933_v14 = vpop.f32.mrb[47].mxu0 }
 0x1ef   :  { %4226 = vmatpush1.bf16.msra.mxu1 %v6092_v36  ;;  %4554 = vmatpush1.bf16.msra.mxu0 %v6095_v37  ;;  %v991_v32 = vmax.f32 %v820_v13, %v933_v14  ;;  %v1039_v13 = vadd.f32 %v7376_v35, %v7331_v45  ;;  %v6175_v35 = vld [vmem:[%s8934_s5 + $0x40c] ss:$16 sps:$4 sm:$0xff]  }
 0x1f0   :  { %4227 = vmatprep.subr.bf16.mxu1 %v6100_v38  ;;  %4555 = vmatprep.subr.bf16.mxu0 %v6103_v39  ;;  %v7468_v16 = vmax.f32 %v988_v0, %v990_v12 }
 0x1f1   :  { %v7476_v18 = vmax.f32 %v989_v9, %v991_v32  ;;  %v6169_v9 = vld [vmem:[%s8934_s5 + $0x3ec] ss:$16 sps:$4 sm:$0xff]   ;;  %v6167_v32 = vld [vmem:[%s8934_s5 + $0x3e8] ss:$16 sps:$4 sm:$0xff]  }
 0x1f3   :  { %4228 = vmatpush1.bf16.msra.mxu1 %v6098_v40  ;;  %4556 = vmatpush1.bf16.msra.mxu0 %v6101_v42  ;;  %v824_v19 = vpop.f32.mrb[16].mxu1  ;;  %v937_v20 = vpop.f32.mrb[48].mxu0 }
 0x1f4   :  { %4229 = vmatprep.subr.bf16.mxu1 %v6106_v43  ;;  %4557 = vmatprep.subr.bf16.mxu0 %v6109_v44  ;;  %v992_v21 = vmax.f32 %v824_v19, %v937_v20  ;;  %v826_v24 = vpop.f32.mrb[17].mxu1  ;;  %v939_v25 = vpop.f32.mrb[49].mxu0  ;;  %v6146_v43 = vld [vmem:[%s8934_s5 + $0x380] ss:$16 sps:$4 sm:$0xff]   ;;  %v6149_v44 = vld [vmem:[%s8934_s5 + $0x388] ss:$16 sps:$4 sm:$0xff]  }
 0x1f5   :  { %v993_v29 = vmax.f32 %v826_v24, %v939_v25  ;;  %v828_v36 = vpop.f32.mrb[18].mxu1  ;;  %v941_v37 = vpop.f32.mrb[50].mxu0 }
 0x1f6   :  { %v994_v38 = vmax.f32 %v828_v36, %v941_v37  ;;  %v830_v39 = vpop.f32.mrb[19].mxu1  ;;  %v943_v40 = vpop.f32.mrb[51].mxu0 }
 0x1f7   :  { %4230 = vmatpush1.bf16.msra.mxu1 %v6104_v46  ;;  %4558 = vmatpush1.bf16.msra.mxu0 %v6107_v47  ;;  %v995_v42 = vmax.f32 %v830_v39, %v943_v40  ;;  %v6154_v47 = vld [vmem:[%s8934_s5 + $0x3a4] ss:$16 sps:$4 sm:$0xff]   ;;  %v6181_v39 = vld [vmem:[%s8934_s5 + $0x42c] ss:$16 sps:$4 sm:$0xff]  }
 0x1f8   :  { %4231 = vmatprep.subr.bf16.mxu1 %v6112_v48  ;;  %4559 = vmatprep.subr.bf16.mxu0 %v6115_v49  ;;  %v7496_v46 = vmax.f32 %v992_v21, %v994_v38  ;;  %v6157_v48 = vld [vmem:[%s8934_s5 + $0x3ac] ss:$16 sps:$4 sm:$0xff]   ;;  %v6178_v38 = vld [vmem:[%s8934_s5 + $0x424] ss:$16 sps:$4 sm:$0xff]  }
 0x1f9   :  { %v7504_v49 = vmax.f32 %v993_v29, %v995_v42  ;;  %v6173_v29 = vld [vmem:[%s8934_s5 + $0x408] ss:$16 sps:$4 sm:$0xff]  }
 0x1fb   :  { %4232 = vmatpush1.bf16.msra.mxu1 %v6110_v50  ;;  %4560 = vmatpush1.bf16.msra.mxu0 %v6113_v51  ;;  %v834_v50 = vpop.f32.mrb[20].mxu1  ;;  %v947_v51 = vpop.f32.mrb[52].mxu0 }
 0x1fc   :  { %4233 = vmatprep.subr.bf16.mxu1 %v6118_v52  ;;  %4561 = vmatprep.subr.bf16.mxu0 %v6121_v53  ;;  %v996_v52 = vmax.f32 %v834_v50, %v947_v51  ;;  %v6152_v53 = vld [vmem:[%s8934_s5 + $0x3a0] ss:$16 sps:$4 sm:$0xff]   ;;  %v6184_v51 = vld [vmem:[%s8934_s5 + $0x444] ss:$16 sps:$4 sm:$0xff]  }
 0x1ff   :  { %4234 = vmatpush1.bf16.msra.mxu1 %v6116_v54  ;;  %4562 = vmatpush1.bf16.msra.mxu0 %v6119_v55  ;;  %v6155_v54 = vld [vmem:[%s8934_s5 + $0x3a8] ss:$16 sps:$4 sm:$0xff]   ;;  %v836_v55 = vpop.f32.mrb[21].mxu1 }
 0x200   :  { %4235 = vmatprep.subr.bf16.mxu1 %v6124_v56  ;;  %4563 = vmatprep.subr.bf16.mxu0 %v6127_v57  ;;  %v949_v56 = vpop.f32.mrb[53].mxu0  ;;  %v6160_v57 = vld [vmem:[%s8934_s5 + $0x3c4] ss:$16 sps:$4 sm:$0xff]  }
 0x203   :  { %4236 = vmatpush1.bf16.msra.mxu1 %v6122_v58  ;;  %4564 = vmatpush1.bf16.msra.mxu0 %v6125_v59  ;;  %v6163_v58 = vld [vmem:[%s8934_s5 + $0x3cc] ss:$16 sps:$4 sm:$0xff]   ;;  %v997_v59 = vmax.f32 %v836_v55, %v949_v56 }
 0x204   :  { %4237 = vmatprep.subr.bf16.mxu1 %v6130_v60  ;;  %4565 = vmatprep.subr.bf16.mxu0 %v6133_v61  ;;  %v838_v60 = vpop.f32.mrb[22].mxu1  ;;  %v951_v61 = vpop.f32.mrb[54].mxu0 }
 0x205   :  { %v998_v62 = vmax.f32 %v838_v60, %v951_v61  ;;  %v840_v63 = vpop.f32.mrb[23].mxu1  ;;  %v953_v0 = vpop.f32.mrb[55].mxu0  ;;  %v6182_v61 = vld [vmem:[%s8934_s5 + $0x440] ss:$16 sps:$4 sm:$0xff]  }
 0x206   :  { %v844_v11 = vpop.f32.mrb[24].mxu1  ;;  %v957_v12 = vpop.f32.mrb[56].mxu0 }
 0x207   :  { %4238 = vmatpush1.bf16.msra.mxu1 %v6128_v2  ;;  %4566 = vmatpush1.bf16.msra.mxu0 %v6131_v3  ;;  %v999_v2 = vmax.f32 %v840_v63, %v953_v0  ;;  %v6158_v3 = vld [vmem:[%s8934_s5 + $0x3c0] ss:$16 sps:$4 sm:$0xff]   ;;  %v7524_v5 = vmax.f32 %v996_v52, %v998_v62  ;;  %v1000_v14 = vmax.f32 %v844_v11, %v957_v12  ;;  %v6187_v52 = vld [vmem:[%s8934_s5 + $0x44c] ss:$16 sps:$4 sm:$0xff]   ;;  %v6185_v62 = vld [vmem:[%s8934_s5 + $0x448] ss:$16 sps:$4 sm:$0xff]  }
 0x208   :  { %4239 = vmatprep.subr.bf16.mxu1 %v6136_v6  ;;  %4567 = vmatprep.subr.bf16.mxu0 %v6139_v8  ;;  %v1030_v6 = vadd.f32 %v7347_v7, %v7328_v41  ;;  %v6166_v8 = vld [vmem:[%s8934_s5 + $0x3e4] ss:$16 sps:$4 sm:$0xff]   ;;  %v6164_v7 = vld [vmem:[%s8934_s5 + $0x3e0] ss:$16 sps:$4 sm:$0xff]   ;;  %v6199_v11 = vld [vmem:[%s8934_s5 + $0x48c] ss:$16 sps:$4 sm:$0xff]  }
 0x209   :  { %v7534_v10 = vmax.f32 %v997_v59, %v999_v2  ;;  %v6190_v0 = vld [vmem:[%s8934_s5 + $0x464] ss:$16 sps:$4 sm:$0xff]   ;;  %v6193_v2 = vld [vmem:[%s8934_s5 + $0x46c] ss:$16 sps:$4 sm:$0xff]   ;;  %v6194_v12 = vld [vmem:[%s8934_s5 + $0x480] ss:$16 sps:$4 sm:$0xff]  }
 0x20b   :  { %4240 = vmatpush1.bf16.msra.mxu1 %v6134_v15  ;;  %4568 = vmatpush1.bf16.msra.mxu0 %v6137_v33  ;;  %v6172_v15 = vld [vmem:[%s8934_s5 + $0x404] ss:$16 sps:$4 sm:$0xff]   ;;  %v846_v33 = vpop.f32.mrb[25].mxu1 }
 0x20c   :  { %4241 = vmatprep.subr.bf16.mxu1 %v6142_v17  ;;  %4569 = vmatprep.subr.bf16.mxu0 %v6145_v1  ;;  %v959_v17 = vpop.f32.mrb[57].mxu0  ;;  %v1032_v1 = vmax.f32 %v1030_v6, 0.0  ;;  %v848_v20 = vpop.f32.mrb[26].mxu1  ;;  %v6188_v6 = vld [vmem:[%s8934_s5 + $0x460] ss:$16 sps:$4 sm:$0xff]  }
 0x20d   :  { %v1001_v19 = vmax.f32 %v846_v33, %v959_v17  ;;  %v961_v21 = vpop.f32.mrb[58].mxu0  ;;  %v850_v24 = vpop.f32.mrb[27].mxu1  ;;  %v6208_v33 = vld [vmem:[%s8934_s5 + $0x4c4] ss:$16 sps:$4 sm:$0xff]   ;;  %v6211_v17 = vld [vmem:[%s8934_s5 + $0x4cc] ss:$16 sps:$4 sm:$0xff]  }
 0x20e   :  { %v963_v25 = vpop.f32.mrb[59].mxu0  ;;  %v1034_v37 = vpack.c.bf16 %v1032_v1, %v1032_v1  ;;  %v6206_v1 = vld [vmem:[%s8934_s5 + $0x4c0] ss:$16 sps:$4 sm:$0xff]  }
 0x20f   :  { %4242 = vmatpush1.bf16.msra.mxu1 %v6140_v22  ;;  %4570 = vmatpush1.bf16.msra.mxu0 %v6143_v23  ;;  %v1041_v22 = vmax.f32 %v1039_v13, 0.0  ;;  %v1002_v23 = vmax.f32 %v848_v20, %v961_v21  ;;  %v6197_v13 = vld [vmem:[%s8934_s5 + $0x488] ss:$16 sps:$4 sm:$0xff]   ;;  %v6217_v20 = vld [vmem:[%s8934_s5 + $0x4ec] ss:$16 sps:$4 sm:$0xff]  }
 0x210   :  { %4243 = vmatprep.subr.bf16.mxu1 %v6148_v26  ;;  %4571 = vmatprep.subr.bf16.mxu0 %v6151_v27  ;;  %v1003_v26 = vmax.f32 %v850_v24, %v963_v25  ;;  %v6170_v27 = vld [vmem:[%s8934_s5 + $0x400] ss:$16 sps:$4 sm:$0xff]   ;;  %v6223_v24 = vld [vmem:[%s8934_s5 + $0x50c] ss:$16 sps:$4 sm:$0xff]  }
 0x211   :  { %v7556_v36 = vmax.f32 %v1000_v14, %v1002_v23  ;;  %v1043_v42 = vpack.c.bf16 %v1041_v22, %v1041_v22  ;;  %v6202_v14 = vld [vmem:[%s8934_s5 + $0x4a4] ss:$16 sps:$4 sm:$0xff]   ;;  %v6212_v21 = vld [vmem:[%s8934_s5 + $0x4e0] ss:$16 sps:$4 sm:$0xff]   ;;  %v6215_v22 = vld [vmem:[%s8934_s5 + $0x4e8] ss:$16 sps:$4 sm:$0xff]  }
 0x212   :  { %v7564_v40 = vmax.f32 %v1001_v19, %v1003_v26  ;;  %v6214_v19 = vld [vmem:[%s8934_s5 + $0x4e4] ss:$16 sps:$4 sm:$0xff]   ;;  %v6218_v25 = vld [vmem:[%s8934_s5 + $0x500] ss:$16 sps:$4 sm:$0xff]   ;;  %v6221_v26 = vld [vmem:[%s8934_s5 + $0x508] ss:$16 sps:$4 sm:$0xff]  }
 0x213   :  { %4244 = vmatpush1.bf16.msra.mxu1 %v6146_v43  ;;  %4572 = vmatpush1.bf16.msra.mxu0 %v6149_v44  ;;  %v854_v43 = vpop.f32.mrb[28].mxu1  ;;  %v967_v44 = vpop.f32.mrb[60].mxu0  ;;  %v6220_v23 = vld [vmem:[%s8934_s5 + $0x504] ss:$16 sps:$4 sm:$0xff]  }
 0x214   :  { %4245 = vmatprep.subr.bf16.mxu1 %v6154_v47  ;;  %4573 = vmatprep.subr.bf16.mxu0 %v6157_v48  ;;  %v6176_v47 = vld [vmem:[%s8934_s5 + $0x420] ss:$16 sps:$4 sm:$0xff]   ;;  %v6179_v48 = vld [vmem:[%s8934_s5 + $0x428] ss:$16 sps:$4 sm:$0xff]   ;;  %v1004_v50 = vmax.f32 %v854_v43, %v967_v44 }
 0x215   :  { %v6230_v43 = vld [vmem:[%s8934_s5 + $0x540] ss:$16 sps:$4 sm:$0xff]   ;;  %v6233_v44 = vld [vmem:[%s8934_s5 + $0x548] ss:$16 sps:$4 sm:$0xff]  }
 0x217   :  { %4246 = vmatpush1.bf16.msra.mxu1 %v6152_v53  ;;  %4574 = vmatpush1.bf16.msra.mxu0 %v6155_v54  ;;  %v856_v53 = vpop.f32.mrb[29].mxu1  ;;  %v969_v54 = vpop.f32.mrb[61].mxu0 }
 0x218   :  { %4247 = vmatprep.subr.bf16.mxu1 %v6160_v57  ;;  %4575 = vmatprep.subr.bf16.mxu0 %v6163_v58  ;;  %v1005_v55 = vmax.f32 %v856_v53, %v969_v54  ;;  %v858_v56 = vpop.f32.mrb[30].mxu1  ;;  %v971_v57 = vpop.f32.mrb[62].mxu0  ;;  %v6247_v53 = vld [vmem:[%s8934_s5 + $0x58c] ss:$16 sps:$4 sm:$0xff]   ;;  %v6242_v54 = vld [vmem:[%s8934_s5 + $0x580] ss:$16 sps:$4 sm:$0xff]  }
 0x219   :  { %v1006_v58 = vmax.f32 %v858_v56, %v971_v57  ;;  %v860_v59 = vpop.f32.mrb[31].mxu1  ;;  %v973_v60 = vpop.f32.mrb[63].mxu0  ;;  %v6250_v56 = vld [vmem:[%s8934_s5 + $0x5a4] ss:$16 sps:$4 sm:$0xff]   ;;  %v6253_v57 = vld [vmem:[%s8934_s5 + $0x5ac] ss:$16 sps:$4 sm:$0xff]  }
 0x21a   :  { %v1007_v63 = vmax.f32 %v860_v59, %v973_v60  ;;  %v6251_v59 = vld [vmem:[%s8934_s5 + $0x5a8] ss:$16 sps:$4 sm:$0xff]   ;;  %v6256_v60 = vld [vmem:[%s8934_s5 + $0x5c4] ss:$16 sps:$4 sm:$0xff]  }
 0x21b   :  { %4248 = vmatpush1.bf16.msra.mxu1 %v6158_v3  ;;  %4576 = vmatpush1.bf16.msra.mxu0 %v6161_v4  ;;  %v7590_v3 = vmax.f32 %v1004_v50, %v1006_v58  ;;  %v6236_v50 = vld [vmem:[%s8934_s5 + $0x560] ss:$16 sps:$4 sm:$0xff]  }
 0x21c   :  { %4249 = vmatprep.subr.bf16.mxu1 %v6166_v8  ;;  %4577 = vmatprep.subr.bf16.mxu0 %v6169_v9  ;;  %v7592_v4 = vmax.f32 %v1005_v55, %v1007_v63  ;;  %v6191_v8 = vld [vmem:[%s8934_s5 + $0x468] ss:$16 sps:$4 sm:$0xff]   ;;  %v6196_v9 = vld [vmem:[%s8934_s5 + $0x484] ss:$16 sps:$4 sm:$0xff]   ;;  %v6248_v58 = vld [vmem:[%s8934_s5 + $0x5a0] ss:$16 sps:$4 sm:$0xff]  }
 0x21d   :  { %v6245_v55 = vld [vmem:[%s8934_s5 + $0x588] ss:$16 sps:$4 sm:$0xff]  }
 0x21e   :  { %v6257_v63 = vld [vmem:[%s8934_s5 + $0x5c8] ss:$16 sps:$4 sm:$0xff]  }
 0x21f   :  { %4250 = vmatpush1.bf16.msra.mxu1 %v6164_v7  ;;  %4578 = vmatpush1.bf16.msra.mxu0 %v6167_v32  ;;  %v6205_v7 = vld [vmem:[%s8934_s5 + $0x4ac] ss:$16 sps:$4 sm:$0xff]   ;;  %v6200_v32 = vld [vmem:[%s8934_s5 + $0x4a0] ss:$16 sps:$4 sm:$0xff]  }
 0x220   :  { %4260 = vmatprep.subr.bf16.mxu1 %v6172_v15  ;;  %4588 = vmatprep.subr.bf16.mxu0 %v6175_v35  ;;  %v6203_v15 = vld [vmem:[%s8934_s5 + $0x4a8] ss:$16 sps:$4 sm:$0xff]  }
 0x221   :  { %v6209_v35 = vld [vmem:[%s8934_s5 + $0x4c8] ss:$16 sps:$4 sm:$0xff]  }
 0x222   :  { %4252 = vmatmul.mubr.bf16.vlgmr.msra.gmra.mrb[32].mxu1 %v1034_v37  ;;  %4580 = vmatmul.mubr.bf16.vlgmr.msra.gmra.mrb[64].mxu0 %v1034_v37  ;;  %v6224_v37 = vld [vmem:[%s8934_s5 + $0x520] ss:$16 sps:$4 sm:$0xff]  }
 0x223   :  { %4261 = vmatpush1.bf16.msra.mxu1 %v6170_v27  ;;  %4589 = vmatpush1.bf16.msra.mxu0 %v6173_v29  ;;  %v6226_v27 = vld [vmem:[%s8934_s5 + $0x524] ss:$16 sps:$4 sm:$0xff]   ;;  %v6229_v29 = vld [vmem:[%s8934_s5 + $0x52c] ss:$16 sps:$4 sm:$0xff]  }
 0x224   :  { %4262 = vmatprep.subr.bf16.mxu1 %v6178_v38  ;;  %4590 = vmatprep.subr.bf16.mxu0 %v6181_v39  ;;  %v6227_v38 = vld [vmem:[%s8934_s5 + $0x528] ss:$16 sps:$4 sm:$0xff]   ;;  %v6232_v39 = vld [vmem:[%s8934_s5 + $0x544] ss:$16 sps:$4 sm:$0xff]  }
 0x225   :  { %4292 = vmatprep.mubr.bf16.mxu1 %v1043_v42  ;;  %4620 = vmatprep.mubr.bf16.mxu0 %v1043_v42  ;;  %v6235_v42 = vld [vmem:[%s8934_s5 + $0x54c] ss:$16 sps:$4 sm:$0xff]  }
 0x227   :  { %4263 = vmatpush1.bf16.msra.mxu1 %v6176_v47  ;;  %4591 = vmatpush1.bf16.msra.mxu0 %v6179_v48  ;;  %v6238_v47 = vld [vmem:[%s8934_s5 + $0x564] ss:$16 sps:$4 sm:$0xff]   ;;  %v6241_v48 = vld [vmem:[%s8934_s5 + $0x56c] ss:$16 sps:$4 sm:$0xff]  }
 0x228   :  { %4264 = vmatprep.subr.bf16.mxu1 %v6184_v51  ;;  %4592 = vmatprep.subr.bf16.mxu0 %v6187_v52  ;;  %v6239_v51 = vld [vmem:[%s8934_s5 + $0x568] ss:$16 sps:$4 sm:$0xff]   ;;  %v6244_v52 = vld [vmem:[%s8934_s5 + $0x584] ss:$16 sps:$4 sm:$0xff]  }
 0x22b   :  { %4265 = vmatpush1.bf16.msra.mxu1 %v6182_v61  ;;  %4593 = vmatpush1.bf16.msra.mxu0 %v6185_v62  ;;  %v6259_v61 = vld [vmem:[%s8934_s5 + $0x5cc] ss:$16 sps:$4 sm:$0xff]   ;;  %v6254_v62 = vld [vmem:[%s8934_s5 + $0x5c0] ss:$16 sps:$4 sm:$0xff]  }
 0x22c   :  { %4266 = vmatprep.subr.bf16.mxu1 %v6190_v0  ;;  %4594 = vmatprep.subr.bf16.mxu0 %v6193_v2  ;;  %v1038_v0 = vadd.f32 %v7374_v34, %v7328_v41  ;;  %v6262_v2 = vld [vmem:[%s8934_s5 + $0x5e4] ss:$16 sps:$4 sm:$0xff]   ;;  %v6263_v34 = vld [vmem:[%s8934_s5 + $0x5e8] ss:$16 sps:$4 sm:$0xff]  }
 0x22f   :  { %4267 = vmatpush1.bf16.msra.mxu1 %v6188_v6  ;;  %4595 = vmatpush1.bf16.msra.mxu0 %v6191_v8  ;;  %v6265_v6 = vld [vmem:[%s8934_s5 + $0x5ec] ss:$16 sps:$4 sm:$0xff]   ;;  %v1047_v8 = vadd.f32 %v7476_v18, %v7331_v45 }
 0x230   :  { %4268 = vmatprep.subr.bf16.mxu1 %v6196_v9  ;;  %4596 = vmatprep.subr.bf16.mxu0 %v6199_v11  ;;  %v6260_v9 = vld [vmem:[%s8934_s5 + $0x5e0] ss:$16 sps:$4 sm:$0xff]   ;;  %v1040_v11 = vmax.f32 %v1038_v0, 0.0  ;;  %v6271_v18 = vld [vmem:[%s8934_s5 + $0x60c] ss:$16 sps:$4 sm:$0xff]  }
 0x231   :  { %v6328_v0 = vld [vmem:[%s8934_s5 + $0x744] ss:$16 sps:$4 sm:$0xff]  }
 0x233   :  { %4269 = vmatpush1.bf16.msra.mxu1 %v6194_v12  ;;  %4597 = vmatpush1.bf16.msra.mxu0 %v6197_v13  ;;  %v6268_v12 = vld [vmem:[%s8934_s5 + $0x604] ss:$16 sps:$4 sm:$0xff]   ;;  %v1049_v13 = vmax.f32 %v1047_v8, 0.0  ;;  %v6329_v8 = vld [vmem:[%s8934_s5 + $0x748] ss:$16 sps:$4 sm:$0xff]  }
 0x234   :  { %4270 = vmatprep.subr.bf16.mxu1 %v6202_v14  ;;  %4598 = vmatprep.subr.bf16.mxu0 %v6205_v7  ;;  %v6266_v14 = vld [vmem:[%s8934_s5 + $0x600] ss:$16 sps:$4 sm:$0xff]   ;;  %v6269_v7 = vld [vmem:[%s8934_s5 + $0x608] ss:$16 sps:$4 sm:$0xff]  }
 0x237   :  { %4271 = vmatpush1.bf16.msra.mxu1 %v6200_v32  ;;  %4599 = vmatpush1.bf16.msra.mxu0 %v6203_v15  ;;  %v1042_v32 = vpack.c.bf16 %v1040_v11, %v1040_v11  ;;  %v6274_v15 = vld [vmem:[%s8934_s5 + $0x624] ss:$16 sps:$4 sm:$0xff]   ;;  %v6332_v11 = vld [vmem:[%s8934_s5 + $0x760] ss:$16 sps:$4 sm:$0xff]  }
 0x238   :  { %4272 = vmatprep.subr.bf16.mxu1 %v6208_v33  ;;  %4600 = vmatprep.subr.bf16.mxu0 %v6211_v17  ;;  %v6277_v33 = vld [vmem:[%s8934_s5 + $0x62c] ss:$16 sps:$4 sm:$0xff]   ;;  %v1051_v17 = vpack.c.bf16 %v1049_v13, %v1049_v13 }
 0x239   :  { %v6343_v13 = vld [vmem:[%s8934_s5 + $0x78c] ss:$16 sps:$4 sm:$0xff]  }
 0x23b   :  { %4273 = vmatpush1.bf16.msra.mxu1 %v6206_v1  ;;  %4601 = vmatpush1.bf16.msra.mxu0 %v6209_v35  ;;  %v6272_v1 = vld [vmem:[%s8934_s5 + $0x620] ss:$16 sps:$4 sm:$0xff]   ;;  %v6275_v35 = vld [vmem:[%s8934_s5 + $0x628] ss:$16 sps:$4 sm:$0xff]  }
 0x23c   :  { %4274 = vmatprep.subr.bf16.mxu1 %v6214_v19  ;;  %4602 = vmatprep.subr.bf16.mxu0 %v6217_v20  ;;  %v6280_v19 = vld [vmem:[%s8934_s5 + $0x644] ss:$16 sps:$4 sm:$0xff]   ;;  %v6283_v20 = vld [vmem:[%s8934_s5 + $0x64c] ss:$16 sps:$4 sm:$0xff]  }
 0x23f   :  { %4275 = vmatpush1.bf16.msra.mxu1 %v6212_v21  ;;  %4603 = vmatpush1.bf16.msra.mxu0 %v6215_v22  ;;  %v6278_v21 = vld [vmem:[%s8934_s5 + $0x640] ss:$16 sps:$4 sm:$0xff]   ;;  %v6281_v22 = vld [vmem:[%s8934_s5 + $0x648] ss:$16 sps:$4 sm:$0xff]  }
 0x240   :  { %4276 = vmatprep.subr.bf16.mxu1 %v6220_v23  ;;  %4604 = vmatprep.subr.bf16.mxu0 %v6223_v24  ;;  %v6286_v23 = vld [vmem:[%s8934_s5 + $0x664] ss:$16 sps:$4 sm:$0xff]   ;;  %v6289_v24 = vld [vmem:[%s8934_s5 + $0x66c] ss:$16 sps:$4 sm:$0xff]  }
 0x243   :  { %4277 = vmatpush1.bf16.msra.mxu1 %v6218_v25  ;;  %4605 = vmatpush1.bf16.msra.mxu0 %v6221_v26  ;;  %v6284_v25 = vld [vmem:[%s8934_s5 + $0x660] ss:$16 sps:$4 sm:$0xff]   ;;  %v6287_v26 = vld [vmem:[%s8934_s5 + $0x668] ss:$16 sps:$4 sm:$0xff]  }
 0x244   :  { %4278 = vmatprep.subr.bf16.mxu1 %v6226_v27  ;;  %4606 = vmatprep.subr.bf16.mxu0 %v6229_v29  ;;  %v6292_v27 = vld [vmem:[%s8934_s5 + $0x684] ss:$16 sps:$4 sm:$0xff]   ;;  %v6295_v29 = vld [vmem:[%s8934_s5 + $0x68c] ss:$16 sps:$4 sm:$0xff]  }
 0x247   :  { %4279 = vmatpush1.bf16.msra.mxu1 %v6224_v37  ;;  %4607 = vmatpush1.bf16.msra.mxu0 %v6227_v38  ;;  %v6290_v37 = vld [vmem:[%s8934_s5 + $0x680] ss:$16 sps:$4 sm:$0xff]   ;;  %v6293_v38 = vld [vmem:[%s8934_s5 + $0x688] ss:$16 sps:$4 sm:$0xff]  }
 0x248   :  { %4280 = vmatprep.subr.bf16.mxu1 %v6232_v39  ;;  %4608 = vmatprep.subr.bf16.mxu0 %v6235_v42  ;;  %v6298_v39 = vld [vmem:[%s8934_s5 + $0x6a4] ss:$16 sps:$4 sm:$0xff]   ;;  %v6301_v42 = vld [vmem:[%s8934_s5 + $0x6ac] ss:$16 sps:$4 sm:$0xff]  }
 0x24b   :  { %4281 = vmatpush1.bf16.msra.mxu1 %v6230_v43  ;;  %4609 = vmatpush1.bf16.msra.mxu0 %v6233_v44  ;;  %v6296_v43 = vld [vmem:[%s8934_s5 + $0x6a0] ss:$16 sps:$4 sm:$0xff]   ;;  %v6299_v44 = vld [vmem:[%s8934_s5 + $0x6a8] ss:$16 sps:$4 sm:$0xff]  }
 0x24c   :  { %4282 = vmatprep.subr.bf16.mxu1 %v6238_v47  ;;  %4610 = vmatprep.subr.bf16.mxu0 %v6241_v48  ;;  %v6304_v47 = vld [vmem:[%s8934_s5 + $0x6c4] ss:$16 sps:$4 sm:$0xff]   ;;  %v6307_v48 = vld [vmem:[%s8934_s5 + $0x6cc] ss:$16 sps:$4 sm:$0xff]  }
 0x24f   :  { %4283 = vmatpush1.bf16.msra.mxu1 %v6236_v50  ;;  %4611 = vmatpush1.bf16.msra.mxu0 %v6239_v51  ;;  %v6302_v50 = vld [vmem:[%s8934_s5 + $0x6c0] ss:$16 sps:$4 sm:$0xff]   ;;  %v6305_v51 = vld [vmem:[%s8934_s5 + $0x6c8] ss:$16 sps:$4 sm:$0xff]  }
 0x250   :  { %4284 = vmatprep.subr.bf16.mxu1 %v6244_v52  ;;  %4612 = vmatprep.subr.bf16.mxu0 %v6247_v53  ;;  %v6310_v52 = vld [vmem:[%s8934_s5 + $0x6e4] ss:$16 sps:$4 sm:$0xff]   ;;  %v6313_v53 = vld [vmem:[%s8934_s5 + $0x6ec] ss:$16 sps:$4 sm:$0xff]  }
 0x253   :  { %4285 = vmatpush1.bf16.msra.mxu1 %v6242_v54  ;;  %4613 = vmatpush1.bf16.msra.mxu0 %v6245_v55  ;;  %v6308_v54 = vld [vmem:[%s8934_s5 + $0x6e0] ss:$16 sps:$4 sm:$0xff]   ;;  %v6311_v55 = vld [vmem:[%s8934_s5 + $0x6e8] ss:$16 sps:$4 sm:$0xff]  }
 0x254   :  { %4286 = vmatprep.subr.bf16.mxu1 %v6250_v56  ;;  %4614 = vmatprep.subr.bf16.mxu0 %v6253_v57  ;;  %v6316_v56 = vld [vmem:[%s8934_s5 + $0x704] ss:$16 sps:$4 sm:$0xff]   ;;  %v6319_v57 = vld [vmem:[%s8934_s5 + $0x70c] ss:$16 sps:$4 sm:$0xff]  }
 0x257   :  { %4287 = vmatpush1.bf16.msra.mxu1 %v6248_v58  ;;  %4615 = vmatpush1.bf16.msra.mxu0 %v6251_v59  ;;  %v6314_v58 = vld [vmem:[%s8934_s5 + $0x700] ss:$16 sps:$4 sm:$0xff]   ;;  %v6317_v59 = vld [vmem:[%s8934_s5 + $0x708] ss:$16 sps:$4 sm:$0xff]  }
 0x258   :  { %4288 = vmatprep.subr.bf16.mxu1 %v6256_v60  ;;  %4616 = vmatprep.subr.bf16.mxu0 %v6259_v61  ;;  %v6322_v60 = vld [vmem:[%s8934_s5 + $0x724] ss:$16 sps:$4 sm:$0xff]   ;;  %v6325_v61 = vld [vmem:[%s8934_s5 + $0x72c] ss:$16 sps:$4 sm:$0xff]  }
 0x25b   :  { %4289 = vmatpush1.bf16.msra.mxu1 %v6254_v62  ;;  %4617 = vmatpush1.bf16.msra.mxu0 %v6257_v63  ;;  %v6320_v62 = vld [vmem:[%s8934_s5 + $0x720] ss:$16 sps:$4 sm:$0xff]   ;;  %v6323_v63 = vld [vmem:[%s8934_s5 + $0x728] ss:$16 sps:$4 sm:$0xff]  }
 0x25c   :  { %4290 = vmatprep.subr.bf16.mxu1 %v6262_v2  ;;  %4618 = vmatprep.subr.bf16.mxu0 %v6265_v6  ;;  %v6331_v2 = vld [vmem:[%s8934_s5 + $0x74c] ss:$16 sps:$4 sm:$0xff]   ;;  %v6326_v6 = vld [vmem:[%s8934_s5 + $0x740] ss:$16 sps:$4 sm:$0xff]  }
 0x25f   :  { %4291 = vmatpush1.bf16.msra.mxu1 %v6260_v9  ;;  %4619 = vmatpush1.bf16.msra.mxu0 %v6263_v34  ;;  %v6334_v9 = vld [vmem:[%s8934_s5 + $0x764] ss:$16 sps:$4 sm:$0xff]   ;;  %v6337_v34 = vld [vmem:[%s8934_s5 + $0x76c] ss:$16 sps:$4 sm:$0xff]  }
 0x260   :  { %4301 = vmatprep.subr.bf16.mxu1 %v6268_v12  ;;  %4629 = vmatprep.subr.bf16.mxu0 %v6271_v18  ;;  %v6335_v12 = vld [vmem:[%s8934_s5 + $0x768] ss:$16 sps:$4 sm:$0xff]   ;;  %v6340_v18 = vld [vmem:[%s8934_s5 + $0x784] ss:$16 sps:$4 sm:$0xff]  }
 0x262   :  { %4293 = vmatmul.mubr.bf16.vlgmr.msra.gmra.mrb[32].mxu1 %v1042_v32  ;;  %4621 = vmatmul.mubr.bf16.vlgmr.msra.gmra.mrb[64].mxu0 %v1042_v32  ;;  %v6346_v32 = vld [vmem:[%s8934_s5 + $0x7a4] ss:$16 sps:$4 sm:$0xff]  }
 0x263   :  { %4302 = vmatpush1.bf16.msra.mxu1 %v6266_v14  ;;  %4630 = vmatpush1.bf16.msra.mxu0 %v6269_v7  ;;  %v6338_v14 = vld [vmem:[%s8934_s5 + $0x780] ss:$16 sps:$4 sm:$0xff]   ;;  %v6341_v7 = vld [vmem:[%s8934_s5 + $0x788] ss:$16 sps:$4 sm:$0xff]  }
 0x264   :  { %4303 = vmatprep.subr.bf16.mxu1 %v6274_v15  ;;  %4631 = vmatprep.subr.bf16.mxu0 %v6277_v33  ;;  %v6349_v15 = vld [vmem:[%s8934_s5 + $0x7ac] ss:$16 sps:$4 sm:$0xff]   ;;  %v6344_v33 = vld [vmem:[%s8934_s5 + $0x7a0] ss:$16 sps:$4 sm:$0xff]  }
 0x265   :  { %4333 = vmatprep.mubr.bf16.mxu1 %v1051_v17  ;;  %4661 = vmatprep.mubr.bf16.mxu0 %v1051_v17  ;;  %v6347_v17 = vld [vmem:[%s8934_s5 + $0x7a8] ss:$16 sps:$4 sm:$0xff]  }
 0x267   :  { %4304 = vmatpush1.bf16.msra.mxu1 %v6272_v1  ;;  %4632 = vmatpush1.bf16.msra.mxu0 %v6275_v35  ;;  %v6352_v1 = vld [vmem:[%s8934_s5 + $0x7c4] ss:$16 sps:$4 sm:$0xff]   ;;  %v6355_v35 = vld [vmem:[%s8934_s5 + $0x7cc] ss:$16 sps:$4 sm:$0xff]  }
 0x268   :  { %4305 = vmatprep.subr.bf16.mxu1 %v6280_v19  ;;  %4633 = vmatprep.subr.bf16.mxu0 %v6283_v20  ;;  %v6350_v19 = vld [vmem:[%s8934_s5 + $0x7c0] ss:$16 sps:$4 sm:$0xff]   ;;  %v6353_v20 = vld [vmem:[%s8934_s5 + $0x7c8] ss:$16 sps:$4 sm:$0xff]  }
 0x26b   :  { %4306 = vmatpush1.bf16.msra.mxu1 %v6278_v21  ;;  %4634 = vmatpush1.bf16.msra.mxu0 %v6281_v22  ;;  %v1046_v21 = vadd.f32 %v7468_v16, %v7328_v41  ;;  %v6358_v22 = vld [vmem:[%s8934_s5 + $0x7e4] ss:$16 sps:$4 sm:$0xff]   ;;  %v6359_v16 = vld [vmem:[%s8934_s5 + $0x7e8] ss:$16 sps:$4 sm:$0xff]  }
 0x26c   :  { %4307 = vmatprep.subr.bf16.mxu1 %v6286_v23  ;;  %4635 = vmatprep.subr.bf16.mxu0 %v6289_v24  ;;  %v6361_v23 = vld [vmem:[%s8934_s5 + $0x7ec] ss:$16 sps:$4 sm:$0xff]   ;;  %v1055_v24 = vadd.f32 %v7504_v49, %v7331_v45 }
 0x26d   :  { %v6367_v49 = vld [vmem:[%s8934_s5 + $0x80c] ss:$16 sps:$4 sm:$0xff]  }
 0x26f   :  { %4308 = vmatpush1.bf16.msra.mxu1 %v6284_v25  ;;  %4636 = vmatpush1.bf16.msra.mxu0 %v6287_v26  ;;  %v6356_v25 = vld [vmem:[%s8934_s5 + $0x7e0] ss:$16 sps:$4 sm:$0xff]   ;;  %v1048_v26 = vmax.f32 %v1046_v21, 0.0 }
 0x270   :  { %4309 = vmatprep.subr.bf16.mxu1 %v6292_v27  ;;  %4637 = vmatprep.subr.bf16.mxu0 %v6295_v29  ;;  %v6364_v27 = vld [vmem:[%s8934_s5 + $0x804] ss:$16 sps:$4 sm:$0xff]   ;;  %v1057_v29 = vmax.f32 %v1055_v24, 0.0  ;;  %v6422_v21 = vld [vmem:[%s8934_s5 + $0x940] ss:$16 sps:$4 sm:$0xff]  }
 0x271   :  { %v6433_v24 = vld [vmem:[%s8934_s5 + $0x96c] ss:$16 sps:$4 sm:$0xff]  }
 0x273   :  { %4310 = vmatpush1.bf16.msra.mxu1 %v6290_v37  ;;  %4638 = vmatpush1.bf16.msra.mxu0 %v6293_v38  ;;  %v6362_v37 = vld [vmem:[%s8934_s5 + $0x800] ss:$16 sps:$4 sm:$0xff]   ;;  %v1050_v38 = vpack.c.bf16 %v1048_v26, %v1048_v26  ;;  %v6436_v26 = vld [vmem:[%s8934_s5 + $0x984] ss:$16 sps:$4 sm:$0xff]  }
 0x274   :  { %4311 = vmatprep.subr.bf16.mxu1 %v6298_v39  ;;  %4639 = vmatprep.subr.bf16.mxu0 %v6301_v42  ;;  %v6365_v39 = vld [vmem:[%s8934_s5 + $0x808] ss:$16 sps:$4 sm:$0xff]   ;;  %v1059_v42 = vpack.c.bf16 %v1057_v29, %v1057_v29 }
 0x275   :  { %v6437_v29 = vld [vmem:[%s8934_s5 + $0x988] ss:$16 sps:$4 sm:$0xff]  }
 0x277   :  { %4312 = vmatpush1.bf16.msra.mxu1 %v6296_v43  ;;  %4640 = vmatpush1.bf16.msra.mxu0 %v6299_v44  ;;  %v6370_v43 = vld [vmem:[%s8934_s5 + $0x824] ss:$16 sps:$4 sm:$0xff]   ;;  %v6373_v44 = vld [vmem:[%s8934_s5 + $0x82c] ss:$16 sps:$4 sm:$0xff]  }
 0x278   :  { %4313 = vmatprep.subr.bf16.mxu1 %v6304_v47  ;;  %4641 = vmatprep.subr.bf16.mxu0 %v6307_v48  ;;  %v6368_v47 = vld [vmem:[%s8934_s5 + $0x820] ss:$16 sps:$4 sm:$0xff]   ;;  %v6371_v48 = vld [vmem:[%s8934_s5 + $0x828] ss:$16 sps:$4 sm:$0xff]  }
 0x27b   :  { %4314 = vmatpush1.bf16.msra.mxu1 %v6302_v50  ;;  %4642 = vmatpush1.bf16.msra.mxu0 %v6305_v51  ;;  %v6376_v50 = vld [vmem:[%s8934_s5 + $0x844] ss:$16 sps:$4 sm:$0xff]   ;;  %v6379_v51 = vld [vmem:[%s8934_s5 + $0x84c] ss:$16 sps:$4 sm:$0xff]  }
 0x27c   :  { %4315 = vmatprep.subr.bf16.mxu1 %v6310_v52  ;;  %4643 = vmatprep.subr.bf16.mxu0 %v6313_v53  ;;  %v6374_v52 = vld [vmem:[%s8934_s5 + $0x840] ss:$16 sps:$4 sm:$0xff]   ;;  %v6377_v53 = vld [vmem:[%s8934_s5 + $0x848] ss:$16 sps:$4 sm:$0xff]  }
 0x27f   :  { %4316 = vmatpush1.bf16.msra.mxu1 %v6308_v54  ;;  %4644 = vmatpush1.bf16.msra.mxu0 %v6311_v55  ;;  %v6382_v54 = vld [vmem:[%s8934_s5 + $0x864] ss:$16 sps:$4 sm:$0xff]   ;;  %v6385_v55 = vld [vmem:[%s8934_s5 + $0x86c] ss:$16 sps:$4 sm:$0xff]  }
 0x280   :  { %4317 = vmatprep.subr.bf16.mxu1 %v6316_v56  ;;  %4645 = vmatprep.subr.bf16.mxu0 %v6319_v57  ;;  %v6380_v56 = vld [vmem:[%s8934_s5 + $0x860] ss:$16 sps:$4 sm:$0xff]   ;;  %v6383_v57 = vld [vmem:[%s8934_s5 + $0x868] ss:$16 sps:$4 sm:$0xff]  }
 0x283   :  { %4318 = vmatpush1.bf16.msra.mxu1 %v6314_v58  ;;  %4646 = vmatpush1.bf16.msra.mxu0 %v6317_v59  ;;  %v6388_v58 = vld [vmem:[%s8934_s5 + $0x884] ss:$16 sps:$4 sm:$0xff]   ;;  %v6391_v59 = vld [vmem:[%s8934_s5 + $0x88c] ss:$16 sps:$4 sm:$0xff]  }
 0x284   :  { %4319 = vmatprep.subr.bf16.mxu1 %v6322_v60  ;;  %4647 = vmatprep.subr.bf16.mxu0 %v6325_v61  ;;  %v6386_v60 = vld [vmem:[%s8934_s5 + $0x880] ss:$16 sps:$4 sm:$0xff]   ;;  %v6389_v61 = vld [vmem:[%s8934_s5 + $0x888] ss:$16 sps:$4 sm:$0xff]  }
 0x287   :  { %4320 = vmatpush1.bf16.msra.mxu1 %v6320_v62  ;;  %4648 = vmatpush1.bf16.msra.mxu0 %v6323_v63  ;;  %v6394_v62 = vld [vmem:[%s8934_s5 + $0x8a4] ss:$16 sps:$4 sm:$0xff]   ;;  %v6397_v63 = vld [vmem:[%s8934_s5 + $0x8ac] ss:$16 sps:$4 sm:$0xff]  }
 0x288   :  { %4321 = vmatprep.subr.bf16.mxu1 %v6328_v0  ;;  %4649 = vmatprep.subr.bf16.mxu0 %v6331_v2  ;;  %v6392_v0 = vld [vmem:[%s8934_s5 + $0x8a0] ss:$16 sps:$4 sm:$0xff]   ;;  %v6395_v2 = vld [vmem:[%s8934_s5 + $0x8a8] ss:$16 sps:$4 sm:$0xff]  }
 0x28b   :  { %4322 = vmatpush1.bf16.msra.mxu1 %v6326_v6  ;;  %4650 = vmatpush1.bf16.msra.mxu0 %v6329_v8  ;;  %v6400_v6 = vld [vmem:[%s8934_s5 + $0x8c4] ss:$16 sps:$4 sm:$0xff]   ;;  %v6403_v8 = vld [vmem:[%s8934_s5 + $0x8cc] ss:$16 sps:$4 sm:$0xff]  }
 0x28c   :  { %4323 = vmatprep.subr.bf16.mxu1 %v6334_v9  ;;  %4651 = vmatprep.subr.bf16.mxu0 %v6337_v34  ;;  %v6398_v9 = vld [vmem:[%s8934_s5 + $0x8c0] ss:$16 sps:$4 sm:$0xff]   ;;  %v6401_v34 = vld [vmem:[%s8934_s5 + $0x8c8] ss:$16 sps:$4 sm:$0xff]  }
 0x28f   :  { %4324 = vmatpush1.bf16.msra.mxu1 %v6332_v11  ;;  %4652 = vmatpush1.bf16.msra.mxu0 %v6335_v12  ;;  %v6406_v11 = vld [vmem:[%s8934_s5 + $0x8e4] ss:$16 sps:$4 sm:$0xff]   ;;  %v6409_v12 = vld [vmem:[%s8934_s5 + $0x8ec] ss:$16 sps:$4 sm:$0xff]  }
 0x290   :  { %4325 = vmatprep.subr.bf16.mxu1 %v6340_v18  ;;  %4653 = vmatprep.subr.bf16.mxu0 %v6343_v13  ;;  %v6404_v18 = vld [vmem:[%s8934_s5 + $0x8e0] ss:$16 sps:$4 sm:$0xff]   ;;  %v6407_v13 = vld [vmem:[%s8934_s5 + $0x8e8] ss:$16 sps:$4 sm:$0xff]  }
 0x293   :  { %4326 = vmatpush1.bf16.msra.mxu1 %v6338_v14  ;;  %4654 = vmatpush1.bf16.msra.mxu0 %v6341_v7  ;;  %v6412_v14 = vld [vmem:[%s8934_s5 + $0x904] ss:$16 sps:$4 sm:$0xff]   ;;  %v6415_v7 = vld [vmem:[%s8934_s5 + $0x90c] ss:$16 sps:$4 sm:$0xff]  }
 0x294   :  { %4327 = vmatprep.subr.bf16.mxu1 %v6346_v32  ;;  %4655 = vmatprep.subr.bf16.mxu0 %v6349_v15  ;;  %v6410_v32 = vld [vmem:[%s8934_s5 + $0x900] ss:$16 sps:$4 sm:$0xff]   ;;  %v6413_v15 = vld [vmem:[%s8934_s5 + $0x908] ss:$16 sps:$4 sm:$0xff]  }
 0x297   :  { %4328 = vmatpush1.bf16.msra.mxu1 %v6344_v33  ;;  %4656 = vmatpush1.bf16.msra.mxu0 %v6347_v17  ;;  %v6418_v33 = vld [vmem:[%s8934_s5 + $0x924] ss:$16 sps:$4 sm:$0xff]   ;;  %v6421_v17 = vld [vmem:[%s8934_s5 + $0x92c] ss:$16 sps:$4 sm:$0xff]  }
 0x298   :  { %4329 = vmatprep.subr.bf16.mxu1 %v6352_v1  ;;  %4657 = vmatprep.subr.bf16.mxu0 %v6355_v35  ;;  %v6416_v1 = vld [vmem:[%s8934_s5 + $0x920] ss:$16 sps:$4 sm:$0xff]   ;;  %v6419_v35 = vld [vmem:[%s8934_s5 + $0x928] ss:$16 sps:$4 sm:$0xff]  }
 0x29b   :  { %4330 = vmatpush1.bf16.msra.mxu1 %v6350_v19  ;;  %4658 = vmatpush1.bf16.msra.mxu0 %v6353_v20  ;;  %v6424_v19 = vld [vmem:[%s8934_s5 + $0x944] ss:$16 sps:$4 sm:$0xff]   ;;  %v6427_v20 = vld [vmem:[%s8934_s5 + $0x94c] ss:$16 sps:$4 sm:$0xff]  }
 0x29c   :  { %4331 = vmatprep.subr.bf16.mxu1 %v6358_v22  ;;  %4659 = vmatprep.subr.bf16.mxu0 %v6361_v23  ;;  %v6425_v22 = vld [vmem:[%s8934_s5 + $0x948] ss:$16 sps:$4 sm:$0xff]   ;;  %v6430_v23 = vld [vmem:[%s8934_s5 + $0x964] ss:$16 sps:$4 sm:$0xff]  }
 0x29f   :  { %4332 = vmatpush1.bf16.msra.mxu1 %v6356_v25  ;;  %4660 = vmatpush1.bf16.msra.mxu0 %v6359_v16  ;;  %v6428_v25 = vld [vmem:[%s8934_s5 + $0x960] ss:$16 sps:$4 sm:$0xff]   ;;  %v6431_v16 = vld [vmem:[%s8934_s5 + $0x968] ss:$16 sps:$4 sm:$0xff]  }
 0x2a0   :  { %4342 = vmatprep.subr.bf16.mxu1 %v6364_v27  ;;  %4670 = vmatprep.subr.bf16.mxu0 %v6367_v49  ;;  %v6439_v27 = vld [vmem:[%s8934_s5 + $0x98c] ss:$16 sps:$4 sm:$0xff]   ;;  %v6434_v49 = vld [vmem:[%s8934_s5 + $0x980] ss:$16 sps:$4 sm:$0xff]  }
 0x2a2   :  { %4334 = vmatmul.mubr.bf16.vlgmr.msra.gmra.mrb[32].mxu1 %v1050_v38  ;;  %4662 = vmatmul.mubr.bf16.vlgmr.msra.gmra.mrb[64].mxu0 %v1050_v38  ;;  %v6445_v38 = vld [vmem:[%s8934_s5 + $0x9ac] ss:$16 sps:$4 sm:$0xff]  }
 0x2a3   :  { %4343 = vmatpush1.bf16.msra.mxu1 %v6362_v37  ;;  %4374 = vmatprep.mubr.bf16.mxu1 %v1059_v42  ;;  %v6442_v37 = vld [vmem:[%s8934_s5 + $0x9a4] ss:$16 sps:$4 sm:$0xff]  }
 0x2a4   :  { %4671 = vmatpush1.bf16.msra.mxu0 %v6365_v39  ;;  %4702 = vmatprep.mubr.bf16.mxu0 %v1059_v42  ;;  %v6440_v39 = vld [vmem:[%s8934_s5 + $0x9a0] ss:$16 sps:$4 sm:$0xff]   ;;  %v6443_v42 = vld [vmem:[%s8934_s5 + $0x9a8] ss:$16 sps:$4 sm:$0xff]  }
 0x2a5   :  { %4344 = vmatprep.subr.bf16.mxu1 %v6370_v43  ;;  %4672 = vmatprep.subr.bf16.mxu0 %v6373_v44  ;;  %v6448_v43 = vld [vmem:[%s8934_s5 + $0x9c4] ss:$16 sps:$4 sm:$0xff]   ;;  %v6451_v44 = vld [vmem:[%s8934_s5 + $0x9cc] ss:$16 sps:$4 sm:$0xff]  }
 0x2a7   :  { %4345 = vmatpush1.bf16.msra.mxu1 %v6368_v47  ;;  %v6446_v47 = vld [vmem:[%s8934_s5 + $0x9c0] ss:$16 sps:$4 sm:$0xff]  }
 0x2a8   :  { %4673 = vmatpush1.bf16.msra.mxu0 %v6371_v48  ;;  %4346 = vmatprep.subr.bf16.mxu1 %v6376_v50  ;;  %v1054_v48 = vadd.f32 %v7496_v46, %v7328_v41  ;;  %v6449_v50 = vld [vmem:[%s8934_s5 + $0x9c8] ss:$16 sps:$4 sm:$0xff]   ;;  %v6452_v46 = vld [vmem:[%s8934_s5 + $0x9e0] ss:$16 sps:$4 sm:$0xff]  }
 0x2a9   :  { %4674 = vmatprep.subr.bf16.mxu0 %v6379_v51  ;;  %v6454_v51 = vld [vmem:[%s8934_s5 + $0x9e4] ss:$16 sps:$4 sm:$0xff]  }
 0x2ab   :  { %4347 = vmatpush1.bf16.msra.mxu1 %v6374_v52  ;;  %v6457_v52 = vld [vmem:[%s8934_s5 + $0x9ec] ss:$16 sps:$4 sm:$0xff]  }
 0x2ac   :  { %4675 = vmatpush1.bf16.msra.mxu0 %v6377_v53  ;;  %4348 = vmatprep.subr.bf16.mxu1 %v6382_v54  ;;  %v1063_v53 = vadd.f32 %v7534_v10, %v7331_v45  ;;  %v1056_v54 = vmax.f32 %v1054_v48, 0.0  ;;  %v6463_v10 = vld [vmem:[%s8934_s5 + $0xa0c] ss:$16 sps:$4 sm:$0xff]   ;;  %v6521_v48 = vld [vmem:[%s8934_s5 + $0xb48] ss:$16 sps:$4 sm:$0xff]  }
 0x2ad   :  { %4676 = vmatprep.subr.bf16.mxu0 %v6385_v55  ;;  %v6455_v55 = vld [vmem:[%s8934_s5 + $0x9e8] ss:$16 sps:$4 sm:$0xff]  }
 0x2af   :  { %4349 = vmatpush1.bf16.msra.mxu1 %v6380_v56  ;;  %v6460_v56 = vld [vmem:[%s8934_s5 + $0xa04] ss:$16 sps:$4 sm:$0xff]  }
 0x2b0   :  { %4677 = vmatpush1.bf16.msra.mxu0 %v6383_v57  ;;  %4350 = vmatprep.subr.bf16.mxu1 %v6388_v58  ;;  %v1065_v57 = vmax.f32 %v1063_v53, 0.0  ;;  %v6458_v58 = vld [vmem:[%s8934_s5 + $0xa00] ss:$16 sps:$4 sm:$0xff]   ;;  %v6527_v53 = vld [vmem:[%s8934_s5 + $0xb68] ss:$16 sps:$4 sm:$0xff]  }
 0x2b1   :  { %4678 = vmatprep.subr.bf16.mxu0 %v6391_v59  ;;  %v1058_v59 = vpack.c.bf16 %v1056_v54, %v1056_v54  ;;  %v6535_v54 = vld [vmem:[%s8934_s5 + $0xb8c] ss:$16 sps:$4 sm:$0xff]  }
 0x2b3   :  { %4351 = vmatpush1.bf16.msra.mxu1 %v6386_v60  ;;  %v6461_v60 = vld [vmem:[%s8934_s5 + $0xa08] ss:$16 sps:$4 sm:$0xff]  }
 0x2b4   :  { %4679 = vmatpush1.bf16.msra.mxu0 %v6389_v61  ;;  %4352 = vmatprep.subr.bf16.mxu1 %v6394_v62  ;;  %v6466_v61 = vld [vmem:[%s8934_s5 + $0xa24] ss:$16 sps:$4 sm:$0xff]   ;;  %v1067_v62 = vpack.c.bf16 %v1065_v57, %v1065_v57  ;;  %v6541_v57 = vld [vmem:[%s8934_s5 + $0xbac] ss:$16 sps:$4 sm:$0xff]  }
 0x2b5   :  { %4680 = vmatprep.subr.bf16.mxu0 %v6397_v63  ;;  %v6469_v63 = vld [vmem:[%s8934_s5 + $0xa2c] ss:$16 sps:$4 sm:$0xff]  }
 0x2b7   :  { %4353 = vmatpush1.bf16.msra.mxu1 %v6392_v0  ;;  %v6464_v0 = vld [vmem:[%s8934_s5 + $0xa20] ss:$16 sps:$4 sm:$0xff]  }
 0x2b8   :  { %4681 = vmatpush1.bf16.msra.mxu0 %v6395_v2  ;;  %4354 = vmatprep.subr.bf16.mxu1 %v6400_v6  ;;  %v6467_v2 = vld [vmem:[%s8934_s5 + $0xa28] ss:$16 sps:$4 sm:$0xff]   ;;  %v6472_v6 = vld [vmem:[%s8934_s5 + $0xa44] ss:$16 sps:$4 sm:$0xff]  }
 0x2b9   :  { %4682 = vmatprep.subr.bf16.mxu0 %v6403_v8  ;;  %v6475_v8 = vld [vmem:[%s8934_s5 + $0xa4c] ss:$16 sps:$4 sm:$0xff]  }
 0x2bb   :  { %4355 = vmatpush1.bf16.msra.mxu1 %v6398_v9  ;;  %v6470_v9 = vld [vmem:[%s8934_s5 + $0xa40] ss:$16 sps:$4 sm:$0xff]  }
 0x2bc   :  { %4683 = vmatpush1.bf16.msra.mxu0 %v6401_v34  ;;  %4356 = vmatprep.subr.bf16.mxu1 %v6406_v11  ;;  %v6473_v34 = vld [vmem:[%s8934_s5 + $0xa48] ss:$16 sps:$4 sm:$0xff]   ;;  %v6478_v11 = vld [vmem:[%s8934_s5 + $0xa64] ss:$16 sps:$4 sm:$0xff]  }
 0x2bd   :  { %4684 = vmatprep.subr.bf16.mxu0 %v6409_v12  ;;  %v6481_v12 = vld [vmem:[%s8934_s5 + $0xa6c] ss:$16 sps:$4 sm:$0xff]  }
 0x2bf   :  { %4357 = vmatpush1.bf16.msra.mxu1 %v6404_v18  ;;  %v6476_v18 = vld [vmem:[%s8934_s5 + $0xa60] ss:$16 sps:$4 sm:$0xff]  }
 0x2c0   :  { %4685 = vmatpush1.bf16.msra.mxu0 %v6407_v13  ;;  %4358 = vmatprep.subr.bf16.mxu1 %v6412_v14  ;;  %v6479_v13 = vld [vmem:[%s8934_s5 + $0xa68] ss:$16 sps:$4 sm:$0xff]   ;;  %v6484_v14 = vld [vmem:[%s8934_s5 + $0xa84] ss:$16 sps:$4 sm:$0xff]  }
 0x2c1   :  { %4686 = vmatprep.subr.bf16.mxu0 %v6415_v7  ;;  %v6487_v7 = vld [vmem:[%s8934_s5 + $0xa8c] ss:$16 sps:$4 sm:$0xff]  }
 0x2c3   :  { %4359 = vmatpush1.bf16.msra.mxu1 %v6410_v32  ;;  %v6482_v32 = vld [vmem:[%s8934_s5 + $0xa80] ss:$16 sps:$4 sm:$0xff]  }
 0x2c4   :  { %4687 = vmatpush1.bf16.msra.mxu0 %v6413_v15  ;;  %4360 = vmatprep.subr.bf16.mxu1 %v6418_v33  ;;  %v6485_v15 = vld [vmem:[%s8934_s5 + $0xa88] ss:$16 sps:$4 sm:$0xff]   ;;  %v6490_v33 = vld [vmem:[%s8934_s5 + $0xaa4] ss:$16 sps:$4 sm:$0xff]  }
 0x2c5   :  { %4688 = vmatprep.subr.bf16.mxu0 %v6421_v17  ;;  %v6493_v17 = vld [vmem:[%s8934_s5 + $0xaac] ss:$16 sps:$4 sm:$0xff]  }
 0x2c7   :  { %4361 = vmatpush1.bf16.msra.mxu1 %v6416_v1  ;;  %v6488_v1 = vld [vmem:[%s8934_s5 + $0xaa0] ss:$16 sps:$4 sm:$0xff]  }
 0x2c8   :  { %4689 = vmatpush1.bf16.msra.mxu0 %v6419_v35  ;;  %4362 = vmatprep.subr.bf16.mxu1 %v6424_v19  ;;  %v6491_v35 = vld [vmem:[%s8934_s5 + $0xaa8] ss:$16 sps:$4 sm:$0xff]   ;;  %v6496_v19 = vld [vmem:[%s8934_s5 + $0xac4] ss:$16 sps:$4 sm:$0xff]  }
 0x2c9   :  { %4690 = vmatprep.subr.bf16.mxu0 %v6427_v20  ;;  %v6499_v20 = vld [vmem:[%s8934_s5 + $0xacc] ss:$16 sps:$4 sm:$0xff]  }
 0x2cb   :  { %4363 = vmatpush1.bf16.msra.mxu1 %v6422_v21  ;;  %v6494_v21 = vld [vmem:[%s8934_s5 + $0xac0] ss:$16 sps:$4 sm:$0xff]  }
 0x2cc   :  { %4691 = vmatpush1.bf16.msra.mxu0 %v6425_v22  ;;  %4364 = vmatprep.subr.bf16.mxu1 %v6430_v23  ;;  %v6497_v22 = vld [vmem:[%s8934_s5 + $0xac8] ss:$16 sps:$4 sm:$0xff]   ;;  %v6502_v23 = vld [vmem:[%s8934_s5 + $0xae4] ss:$16 sps:$4 sm:$0xff]  }
 0x2cd   :  { %4692 = vmatprep.subr.bf16.mxu0 %v6433_v24  ;;  %v6505_v24 = vld [vmem:[%s8934_s5 + $0xaec] ss:$16 sps:$4 sm:$0xff]  }
 0x2cf   :  { %4365 = vmatpush1.bf16.msra.mxu1 %v6428_v25  ;;  %v6500_v25 = vld [vmem:[%s8934_s5 + $0xae0] ss:$16 sps:$4 sm:$0xff]  }
 0x2d0   :  { %4693 = vmatpush1.bf16.msra.mxu0 %v6431_v16  ;;  %4366 = vmatprep.subr.bf16.mxu1 %v6436_v26  ;;  %v6503_v16 = vld [vmem:[%s8934_s5 + $0xae8] ss:$16 sps:$4 sm:$0xff]   ;;  %v6508_v26 = vld [vmem:[%s8934_s5 + $0xb04] ss:$16 sps:$4 sm:$0xff]  }
 0x2d1   :  { %4694 = vmatprep.subr.bf16.mxu0 %v6439_v27  ;;  %v6511_v27 = vld [vmem:[%s8934_s5 + $0xb0c] ss:$16 sps:$4 sm:$0xff]  }
 0x2d3   :  { %4367 = vmatpush1.bf16.msra.mxu1 %v6434_v49  ;;  %v6506_v49 = vld [vmem:[%s8934_s5 + $0xb00] ss:$16 sps:$4 sm:$0xff]  }
 0x2d4   :  { %4695 = vmatpush1.bf16.msra.mxu0 %v6437_v29  ;;  %4368 = vmatprep.subr.bf16.mxu1 %v6442_v37  ;;  %v6509_v29 = vld [vmem:[%s8934_s5 + $0xb08] ss:$16 sps:$4 sm:$0xff]   ;;  %v6514_v37 = vld [vmem:[%s8934_s5 + $0xb24] ss:$16 sps:$4 sm:$0xff]  }
 0x2d5   :  { %4696 = vmatprep.subr.bf16.mxu0 %v6445_v38  ;;  %v6517_v38 = vld [vmem:[%s8934_s5 + $0xb2c] ss:$16 sps:$4 sm:$0xff]  }
 0x2d7   :  { %4369 = vmatpush1.bf16.msra.mxu1 %v6440_v39  ;;  %v6512_v39 = vld [vmem:[%s8934_s5 + $0xb20] ss:$16 sps:$4 sm:$0xff]  }
 0x2d8   :  { %4697 = vmatpush1.bf16.msra.mxu0 %v6443_v42  ;;  %4370 = vmatprep.subr.bf16.mxu1 %v6448_v43  ;;  %v6515_v42 = vld [vmem:[%s8934_s5 + $0xb28] ss:$16 sps:$4 sm:$0xff]   ;;  %v6520_v43 = vld [vmem:[%s8934_s5 + $0xb44] ss:$16 sps:$4 sm:$0xff]  }
 0x2d9   :  { %4698 = vmatprep.subr.bf16.mxu0 %v6451_v44  ;;  %v6523_v44 = vld [vmem:[%s8934_s5 + $0xb4c] ss:$16 sps:$4 sm:$0xff]  }
 0x2db   :  { %4371 = vmatpush1.bf16.msra.mxu1 %v6446_v47  ;;  %v6518_v47 = vld [vmem:[%s8934_s5 + $0xb40] ss:$16 sps:$4 sm:$0xff]  }
 0x2dc   :  { %4699 = vmatpush1.bf16.msra.mxu0 %v6449_v50  ;;  %4372 = vmatprep.subr.bf16.mxu1 %v6454_v51  ;;  %v6526_v50 = vld [vmem:[%s8934_s5 + $0xb64] ss:$16 sps:$4 sm:$0xff]   ;;  %v6529_v51 = vld [vmem:[%s8934_s5 + $0xb6c] ss:$16 sps:$4 sm:$0xff]  }
 0x2dd   :  { %4700 = vmatprep.subr.bf16.mxu0 %v6457_v52  ;;  %v6524_v52 = vld [vmem:[%s8934_s5 + $0xb60] ss:$16 sps:$4 sm:$0xff]  }
 0x2df   :  { %4373 = vmatpush1.bf16.msra.mxu1 %v6452_v46  ;;  %v6532_v46 = vld [vmem:[%s8934_s5 + $0xb84] ss:$16 sps:$4 sm:$0xff]  }
 0x2e0   :  { %4701 = vmatpush1.bf16.msra.mxu0 %v6455_v55  ;;  %4383 = vmatprep.subr.bf16.mxu1 %v6460_v56  ;;  %v6530_v55 = vld [vmem:[%s8934_s5 + $0xb80] ss:$16 sps:$4 sm:$0xff]   ;;  %v6533_v56 = vld [vmem:[%s8934_s5 + $0xb88] ss:$16 sps:$4 sm:$0xff]  }
 0x2e1   :  { %4711 = vmatprep.subr.bf16.mxu0 %v6463_v10  ;;  %v6538_v10 = vld [vmem:[%s8934_s5 + $0xba4] ss:$16 sps:$4 sm:$0xff]  }
 0x2e2   :  { %4375 = vmatmul.mubr.bf16.vlgmr.msra.gmra.mrb[32].mxu1 %v1058_v59 }
 0x2e3   :  { %4703 = vmatmul.mubr.bf16.vlgmr.msra.gmra.mrb[64].mxu0 %v1058_v59  ;;  %4384 = vmatpush1.bf16.msra.mxu1 %v6458_v58  ;;  %v6536_v58 = vld [vmem:[%s8934_s5 + $0xba0] ss:$16 sps:$4 sm:$0xff]   ;;  %v6539_v59 = vld [vmem:[%s8934_s5 + $0xba8] ss:$16 sps:$4 sm:$0xff]  }
 0x2e4   :  { %4415 = vmatprep.mubr.bf16.mxu1 %v1067_v62  ;;  %4712 = vmatpush1.bf16.msra.mxu0 %v6461_v60  ;;  %v6544_v60 = vld [vmem:[%s8934_s5 + $0xbc4] ss:$16 sps:$4 sm:$0xff]  }
 0x2e5   :  { %4743 = vmatprep.mubr.bf16.mxu0 %v1067_v62  ;;  %4385 = vmatprep.subr.bf16.mxu1 %v6466_v61  ;;  %v6547_v61 = vld [vmem:[%s8934_s5 + $0xbcc] ss:$16 sps:$4 sm:$0xff]   ;;  %v6542_v62 = vld [vmem:[%s8934_s5 + $0xbc0] ss:$16 sps:$4 sm:$0xff]  }
 0x2e6   :  { %4713 = vmatprep.subr.bf16.mxu0 %v6469_v63  ;;  %v1062_v63 = vadd.f32 %v7524_v5, %v7328_v41  ;;  %v6548_v5 = vld [vmem:[%s8934_s5 + $0xbe0] ss:$16 sps:$4 sm:$0xff]  }
 0x2e7   :  { %4386 = vmatpush1.bf16.msra.mxu1 %v6464_v0  ;;  %v6545_v0 = vld [vmem:[%s8934_s5 + $0xbc8] ss:$16 sps:$4 sm:$0xff]  }
 0x2e8   :  { %4714 = vmatpush1.bf16.msra.mxu0 %v6467_v2  ;;  %4387 = vmatprep.subr.bf16.mxu1 %v6472_v6  ;;  %v6550_v2 = vld [vmem:[%s8934_s5 + $0xbe4] ss:$16 sps:$4 sm:$0xff]   ;;  %v6553_v6 = vld [vmem:[%s8934_s5 + $0xbec] ss:$16 sps:$4 sm:$0xff]  }
 0x2e9   :  { %4715 = vmatprep.subr.bf16.mxu0 %v6475_v8  ;;  %v1071_v8 = vadd.f32 %v7564_v40, %v7331_v45  ;;  %v6559_v40 = vld [vmem:[%s8934_s5 + $0xc0c] ss:$16 sps:$4 sm:$0xff]  }
 0x2eb   :  { %4388 = vmatpush1.bf16.msra.mxu1 %v6470_v9  ;;  %v1064_v9 = vmax.f32 %v1062_v63, 0.0  ;;  %v6625_v63 = vld [vmem:[%s8934_s5 + $0xd6c] ss:$16 sps:$4 sm:$0xff]  }
 0x2ec   :  { %4716 = vmatpush1.bf16.msra.mxu0 %v6473_v34  ;;  %4389 = vmatprep.subr.bf16.mxu1 %v6478_v11  ;;  %v6551_v34 = vld [vmem:[%s8934_s5 + $0xbe8] ss:$16 sps:$4 sm:$0xff]   ;;  %v6556_v11 = vld [vmem:[%s8934_s5 + $0xc04] ss:$16 sps:$4 sm:$0xff]  }
 0x2ed   :  { %4717 = vmatprep.subr.bf16.mxu0 %v6481_v12  ;;  %v1073_v12 = vmax.f32 %v1071_v8, 0.0  ;;  %v6631_v8 = vld [vmem:[%s8934_s5 + $0xd8c] ss:$16 sps:$4 sm:$0xff]  }
 0x2ef   :  { %4390 = vmatpush1.bf16.msra.mxu1 %v6476_v18  ;;  %v6554_v18 = vld [vmem:[%s8934_s5 + $0xc00] ss:$16 sps:$4 sm:$0xff]  }
 0x2f0   :  { %4718 = vmatpush1.bf16.msra.mxu0 %v6479_v13  ;;  %4391 = vmatprep.subr.bf16.mxu1 %v6484_v14  ;;  %v1066_v13 = vpack.c.bf16 %v1064_v9, %v1064_v9  ;;  %v6557_v14 = vld [vmem:[%s8934_s5 + $0xc08] ss:$16 sps:$4 sm:$0xff]  }
 0x2f1   :  { %4719 = vmatprep.subr.bf16.mxu0 %v6487_v7  ;;  %v6562_v7 = vld [vmem:[%s8934_s5 + $0xc24] ss:$16 sps:$4 sm:$0xff]   ;;  %v6629_v9 = vld [vmem:[%s8934_s5 + $0xd88] ss:$16 sps:$4 sm:$0xff]  }
 0x2f3   :  { %4392 = vmatpush1.bf16.msra.mxu1 %v6482_v32  ;;  %v1075_v32 = vpack.c.bf16 %v1073_v12, %v1073_v12  ;;  %v6635_v12 = vld [vmem:[%s8934_s5 + $0xda8] ss:$16 sps:$4 sm:$0xff]  }
 0x2f4   :  { %4720 = vmatpush1.bf16.msra.mxu0 %v6485_v15  ;;  %4393 = vmatprep.subr.bf16.mxu1 %v6490_v33  ;;  %v6565_v15 = vld [vmem:[%s8934_s5 + $0xc2c] ss:$16 sps:$4 sm:$0xff]   ;;  %v6560_v33 = vld [vmem:[%s8934_s5 + $0xc20] ss:$16 sps:$4 sm:$0xff]  }
 0x2f5   :  { %4721 = vmatprep.subr.bf16.mxu0 %v6493_v17  ;;  %v6563_v17 = vld [vmem:[%s8934_s5 + $0xc28] ss:$16 sps:$4 sm:$0xff]  }
 0x2f7   :  { %4394 = vmatpush1.bf16.msra.mxu1 %v6488_v1  ;;  %v6568_v1 = vld [vmem:[%s8934_s5 + $0xc44] ss:$16 sps:$4 sm:$0xff]  }
 0x2f8   :  { %4722 = vmatpush1.bf16.msra.mxu0 %v6491_v35  ;;  %4395 = vmatprep.subr.bf16.mxu1 %v6496_v19  ;;  %v6571_v35 = vld [vmem:[%s8934_s5 + $0xc4c] ss:$16 sps:$4 sm:$0xff]   ;;  %v6566_v19 = vld [vmem:[%s8934_s5 + $0xc40] ss:$16 sps:$4 sm:$0xff]  }
 0x2f9   :  { %4723 = vmatprep.subr.bf16.mxu0 %v6499_v20  ;;  %v6569_v20 = vld [vmem:[%s8934_s5 + $0xc48] ss:$16 sps:$4 sm:$0xff]  }
 0x2fb   :  { %4396 = vmatpush1.bf16.msra.mxu1 %v6494_v21  ;;  %v6574_v21 = vld [vmem:[%s8934_s5 + $0xc64] ss:$16 sps:$4 sm:$0xff]  }
 0x2fc   :  { %4724 = vmatpush1.bf16.msra.mxu0 %v6497_v22  ;;  %4397 = vmatprep.subr.bf16.mxu1 %v6502_v23  ;;  %v6577_v22 = vld [vmem:[%s8934_s5 + $0xc6c] ss:$16 sps:$4 sm:$0xff]   ;;  %v6572_v23 = vld [vmem:[%s8934_s5 + $0xc60] ss:$16 sps:$4 sm:$0xff]  }
 0x2fd   :  { %4725 = vmatprep.subr.bf16.mxu0 %v6505_v24  ;;  %v6575_v24 = vld [vmem:[%s8934_s5 + $0xc68] ss:$16 sps:$4 sm:$0xff]  }
 0x2ff   :  { %4398 = vmatpush1.bf16.msra.mxu1 %v6500_v25  ;;  %v6580_v25 = vld [vmem:[%s8934_s5 + $0xc84] ss:$16 sps:$4 sm:$0xff]  }
 0x300   :  { %4726 = vmatpush1.bf16.msra.mxu0 %v6503_v16  ;;  %4399 = vmatprep.subr.bf16.mxu1 %v6508_v26  ;;  %v6583_v16 = vld [vmem:[%s8934_s5 + $0xc8c] ss:$16 sps:$4 sm:$0xff]   ;;  %v6578_v26 = vld [vmem:[%s8934_s5 + $0xc80] ss:$16 sps:$4 sm:$0xff]  }
 0x301   :  { %4727 = vmatprep.subr.bf16.mxu0 %v6511_v27  ;;  %v6581_v27 = vld [vmem:[%s8934_s5 + $0xc88] ss:$16 sps:$4 sm:$0xff]  }
 0x303   :  { %4400 = vmatpush1.bf16.msra.mxu1 %v6506_v49  ;;  %v6586_v49 = vld [vmem:[%s8934_s5 + $0xca4] ss:$16 sps:$4 sm:$0xff]  }
 0x304   :  { %4728 = vmatpush1.bf16.msra.mxu0 %v6509_v29  ;;  %4401 = vmatprep.subr.bf16.mxu1 %v6514_v37  ;;  %v6589_v29 = vld [vmem:[%s8934_s5 + $0xcac] ss:$16 sps:$4 sm:$0xff]   ;;  %v6584_v37 = vld [vmem:[%s8934_s5 + $0xca0] ss:$16 sps:$4 sm:$0xff]  }
 0x305   :  { %4729 = vmatprep.subr.bf16.mxu0 %v6517_v38  ;;  %v6587_v38 = vld [vmem:[%s8934_s5 + $0xca8] ss:$16 sps:$4 sm:$0xff]  }
 0x307   :  { %4402 = vmatpush1.bf16.msra.mxu1 %v6512_v39  ;;  %v6592_v39 = vld [vmem:[%s8934_s5 + $0xcc4] ss:$16 sps:$4 sm:$0xff]  }
 0x308   :  { %4730 = vmatpush1.bf16.msra.mxu0 %v6515_v42  ;;  %4403 = vmatprep.subr.bf16.mxu1 %v6520_v43  ;;  %v6595_v42 = vld [vmem:[%s8934_s5 + $0xccc] ss:$16 sps:$4 sm:$0xff]   ;;  %v6590_v43 = vld [vmem:[%s8934_s5 + $0xcc0] ss:$16 sps:$4 sm:$0xff]  }
 0x309   :  { %4731 = vmatprep.subr.bf16.mxu0 %v6523_v44  ;;  %v6593_v44 = vld [vmem:[%s8934_s5 + $0xcc8] ss:$16 sps:$4 sm:$0xff]  }
 0x30b   :  { %4404 = vmatpush1.bf16.msra.mxu1 %v6518_v47  ;;  %v6598_v47 = vld [vmem:[%s8934_s5 + $0xce4] ss:$16 sps:$4 sm:$0xff]  }
 0x30c   :  { %4732 = vmatpush1.bf16.msra.mxu0 %v6521_v48  ;;  %4405 = vmatprep.subr.bf16.mxu1 %v6526_v50  ;;  %v6601_v48 = vld [vmem:[%s8934_s5 + $0xcec] ss:$16 sps:$4 sm:$0xff]   ;;  %v6596_v50 = vld [vmem:[%s8934_s5 + $0xce0] ss:$16 sps:$4 sm:$0xff]  }
 0x30d   :  { %4733 = vmatprep.subr.bf16.mxu0 %v6529_v51  ;;  %v6599_v51 = vld [vmem:[%s8934_s5 + $0xce8] ss:$16 sps:$4 sm:$0xff]  }
 0x30f   :  { %4406 = vmatpush1.bf16.msra.mxu1 %v6524_v52  ;;  %v6604_v52 = vld [vmem:[%s8934_s5 + $0xd04] ss:$16 sps:$4 sm:$0xff]  }
 0x310   :  { %4734 = vmatpush1.bf16.msra.mxu0 %v6527_v53  ;;  %4407 = vmatprep.subr.bf16.mxu1 %v6532_v46  ;;  %v6607_v53 = vld [vmem:[%s8934_s5 + $0xd0c] ss:$16 sps:$4 sm:$0xff]   ;;  %v6602_v46 = vld [vmem:[%s8934_s5 + $0xd00] ss:$16 sps:$4 sm:$0xff]  }
 0x311   :  { %4735 = vmatprep.subr.bf16.mxu0 %v6535_v54  ;;  %v6605_v54 = vld [vmem:[%s8934_s5 + $0xd08] ss:$16 sps:$4 sm:$0xff]  }
 0x313   :  { %4408 = vmatpush1.bf16.msra.mxu1 %v6530_v55  ;;  %v6610_v55 = vld [vmem:[%s8934_s5 + $0xd24] ss:$16 sps:$4 sm:$0xff]  }
 0x314   :  { %4736 = vmatpush1.bf16.msra.mxu0 %v6533_v56  ;;  %4409 = vmatprep.subr.bf16.mxu1 %v6538_v10  ;;  %v6613_v56 = vld [vmem:[%s8934_s5 + $0xd2c] ss:$16 sps:$4 sm:$0xff]   ;;  %v6608_v10 = vld [vmem:[%s8934_s5 + $0xd20] ss:$16 sps:$4 sm:$0xff]  }
 0x315   :  { %4737 = vmatprep.subr.bf16.mxu0 %v6541_v57  ;;  %v6611_v57 = vld [vmem:[%s8934_s5 + $0xd28] ss:$16 sps:$4 sm:$0xff]  }
 0x317   :  { %4410 = vmatpush1.bf16.msra.mxu1 %v6536_v58  ;;  %v6616_v58 = vld [vmem:[%s8934_s5 + $0xd44] ss:$16 sps:$4 sm:$0xff]  }
 0x318   :  { %4738 = vmatpush1.bf16.msra.mxu0 %v6539_v59  ;;  %4411 = vmatprep.subr.bf16.mxu1 %v6544_v60  ;;  %v6619_v59 = vld [vmem:[%s8934_s5 + $0xd4c] ss:$16 sps:$4 sm:$0xff]   ;;  %v6614_v60 = vld [vmem:[%s8934_s5 + $0xd40] ss:$16 sps:$4 sm:$0xff]  }
 0x319   :  { %4739 = vmatprep.subr.bf16.mxu0 %v6547_v61  ;;  %v6617_v61 = vld [vmem:[%s8934_s5 + $0xd48] ss:$16 sps:$4 sm:$0xff]  }
 0x31b   :  { %4412 = vmatpush1.bf16.msra.mxu1 %v6542_v62  ;;  %v6622_v62 = vld [vmem:[%s8934_s5 + $0xd64] ss:$16 sps:$4 sm:$0xff]  }
 0x31c   :  { %4740 = vmatpush1.bf16.msra.mxu0 %v6545_v0  ;;  %4413 = vmatprep.subr.bf16.mxu1 %v6550_v2  ;;  %v6620_v0 = vld [vmem:[%s8934_s5 + $0xd60] ss:$16 sps:$4 sm:$0xff]   ;;  %v6623_v2 = vld [vmem:[%s8934_s5 + $0xd68] ss:$16 sps:$4 sm:$0xff]  }
 0x31d   :  { %4741 = vmatprep.subr.bf16.mxu0 %v6553_v6  ;;  %v6628_v6 = vld [vmem:[%s8934_s5 + $0xd84] ss:$16 sps:$4 sm:$0xff]  }
 0x31f   :  { %4414 = vmatpush1.bf16.msra.mxu1 %v6548_v5  ;;  %v6626_v5 = vld [vmem:[%s8934_s5 + $0xd80] ss:$16 sps:$4 sm:$0xff]  }
 0x320   :  { %4742 = vmatpush1.bf16.msra.mxu0 %v6551_v34  ;;  %4424 = vmatprep.subr.bf16.mxu1 %v6556_v11  ;;  %v6634_v34 = vld [vmem:[%s8934_s5 + $0xda4] ss:$16 sps:$4 sm:$0xff]   ;;  %v6637_v11 = vld [vmem:[%s8934_s5 + $0xdac] ss:$16 sps:$4 sm:$0xff]  }
 0x321   :  { %4752 = vmatprep.subr.bf16.mxu0 %v6559_v40  ;;  %v6632_v40 = vld [vmem:[%s8934_s5 + $0xda0] ss:$16 sps:$4 sm:$0xff]  }
 0x322   :  { %4416 = vmatmul.mubr.bf16.vlgmr.msra.gmra.mrb[32].mxu1 %v1066_v13 }
 0x323   :  { %4744 = vmatmul.mubr.bf16.vlgmr.msra.gmra.mrb[64].mxu0 %v1066_v13  ;;  %4425 = vmatpush1.bf16.msra.mxu1 %v6554_v18  ;;  %v6640_v18 = vld [vmem:[%s8934_s5 + $0xdc4] ss:$16 sps:$4 sm:$0xff]   ;;  %v6643_v13 = vld [vmem:[%s8934_s5 + $0xdcc] ss:$16 sps:$4 sm:$0xff]  }
 0x324   :  { %4456 = vmatprep.mubr.bf16.mxu1 %v1075_v32  ;;  %4753 = vmatpush1.bf16.msra.mxu0 %v6557_v14  ;;  %v6638_v14 = vld [vmem:[%s8934_s5 + $0xdc0] ss:$16 sps:$4 sm:$0xff]  }
 0x325   :  { %4784 = vmatprep.mubr.bf16.mxu0 %v1075_v32  ;;  %4426 = vmatprep.subr.bf16.mxu1 %v6562_v7  ;;  %v1070_v7 = vadd.f32 %v7556_v36, %v7328_v41  ;;  %v6641_v32 = vld [vmem:[%s8934_s5 + $0xdc8] ss:$16 sps:$4 sm:$0xff]   ;;  %v6644_v36 = vld [vmem:[%s8934_s5 + $0xde0] ss:$16 sps:$4 sm:$0xff]  }
 0x326   :  { %4754 = vmatprep.subr.bf16.mxu0 %v6565_v15  ;;  %v6646_v15 = vld [vmem:[%s8934_s5 + $0xde4] ss:$16 sps:$4 sm:$0xff]  }
 0x327   :  { %4427 = vmatpush1.bf16.msra.mxu1 %v6560_v33  ;;  %v6649_v33 = vld [vmem:[%s8934_s5 + $0xdec] ss:$16 sps:$4 sm:$0xff]  }
 0x328   :  { %4755 = vmatpush1.bf16.msra.mxu0 %v6563_v17  ;;  %4428 = vmatprep.subr.bf16.mxu1 %v6568_v1  ;;  %v1079_v17 = vadd.f32 %v7592_v4, %v7331_v45  ;;  %v1072_v1 = vmax.f32 %v1070_v7, 0.0  ;;  %v6655_v45 = vld [vmem:[%s8934_s5 + $0xe0c] ss:$16 sps:$4 sm:$0xff]   ;;  %v6724_v7 = vld [vmem:[%s8934_s5 + $0xf84] ss:$16 sps:$4 sm:$0xff]  }
 0x329   :  { %4756 = vmatprep.subr.bf16.mxu0 %v6571_v35  ;;  %v6647_v35 = vld [vmem:[%s8934_s5 + $0xde8] ss:$16 sps:$4 sm:$0xff]  }
 0x32a   :  { %v1081_v4 = vmax.f32 %v1079_v17, 0.0  ;;  %v6730_v17 = vld [vmem:[%s8934_s5 + $0xfa4] ss:$16 sps:$4 sm:$0xff]  }
 0x32b   :  { %4429 = vmatpush1.bf16.msra.mxu1 %v6566_v19  ;;  %v6652_v19 = vld [vmem:[%s8934_s5 + $0xe04] ss:$16 sps:$4 sm:$0xff]  }
 0x32c   :  { %4757 = vmatpush1.bf16.msra.mxu0 %v6569_v20  ;;  %4430 = vmatprep.subr.bf16.mxu1 %v6574_v21  ;;  %v6650_v20 = vld [vmem:[%s8934_s5 + $0xe00] ss:$16 sps:$4 sm:$0xff]   ;;  %v1074_v21 = vpack.c.bf16 %v1072_v1, %v1072_v1 }
 0x32d   :  { %4758 = vmatprep.subr.bf16.mxu0 %v6577_v22  ;;  %v6653_v22 = vld [vmem:[%s8934_s5 + $0xe08] ss:$16 sps:$4 sm:$0xff]   ;;  %v6728_v1 = vld [vmem:[%s8934_s5 + $0xfa0] ss:$16 sps:$4 sm:$0xff]  }
 0x32f   :  { %4431 = vmatpush1.bf16.msra.mxu1 %v6572_v23  ;;  %v6658_v23 = vld [vmem:[%s8934_s5 + $0xe24] ss:$16 sps:$4 sm:$0xff]  }
 0x330   :  { %4759 = vmatpush1.bf16.msra.mxu0 %v6575_v24  ;;  %4432 = vmatprep.subr.bf16.mxu1 %v6580_v25  ;;  %v1083_v24 = vpack.c.bf16 %v1081_v4, %v1081_v4  ;;  %v6661_v25 = vld [vmem:[%s8934_s5 + $0xe2c] ss:$16 sps:$4 sm:$0xff]   ;;  %v6734_v4 = vld [vmem:[%s8934_s5 + $0xfc0] ss:$16 sps:$4 sm:$0xff]  }
 0x331   :  { %4760 = vmatprep.subr.bf16.mxu0 %v6583_v16  ;;  %v6656_v16 = vld [vmem:[%s8934_s5 + $0xe20] ss:$16 sps:$4 sm:$0xff]  }
 0x333   :  { %4433 = vmatpush1.bf16.msra.mxu1 %v6578_v26  ;;  %v6659_v26 = vld [vmem:[%s8934_s5 + $0xe28] ss:$16 sps:$4 sm:$0xff]  }
 0x334   :  { %4761 = vmatpush1.bf16.msra.mxu0 %v6581_v27  ;;  %4434 = vmatprep.subr.bf16.mxu1 %v6586_v49  ;;  %v6664_v27 = vld [vmem:[%s8934_s5 + $0xe44] ss:$16 sps:$4 sm:$0xff]   ;;  %v6667_v49 = vld [vmem:[%s8934_s5 + $0xe4c] ss:$16 sps:$4 sm:$0xff]  }
 0x335   :  { %4762 = vmatprep.subr.bf16.mxu0 %v6589_v29  ;;  %v6662_v29 = vld [vmem:[%s8934_s5 + $0xe40] ss:$16 sps:$4 sm:$0xff]  }
 0x337   :  { %4435 = vmatpush1.bf16.msra.mxu1 %v6584_v37  ;;  %v6665_v37 = vld [vmem:[%s8934_s5 + $0xe48] ss:$16 sps:$4 sm:$0xff]  }
 0x338   :  { %4763 = vmatpush1.bf16.msra.mxu0 %v6587_v38  ;;  %4436 = vmatprep.subr.bf16.mxu1 %v6592_v39  ;;  %v6670_v38 = vld [vmem:[%s8934_s5 + $0xe64] ss:$16 sps:$4 sm:$0xff]   ;;  %v6673_v39 = vld [vmem:[%s8934_s5 + $0xe6c] ss:$16 sps:$4 sm:$0xff]  }
 0x339   :  { %4764 = vmatprep.subr.bf16.mxu0 %v6595_v42  ;;  %v6668_v42 = vld [vmem:[%s8934_s5 + $0xe60] ss:$16 sps:$4 sm:$0xff]  }
 0x33b   :  { %4437 = vmatpush1.bf16.msra.mxu1 %v6590_v43  ;;  %v6671_v43 = vld [vmem:[%s8934_s5 + $0xe68] ss:$16 sps:$4 sm:$0xff]  }
 0x33c   :  { %4765 = vmatpush1.bf16.msra.mxu0 %v6593_v44  ;;  %4438 = vmatprep.subr.bf16.mxu1 %v6598_v47  ;;  %v6676_v44 = vld [vmem:[%s8934_s5 + $0xe84] ss:$16 sps:$4 sm:$0xff]   ;;  %v6679_v47 = vld [vmem:[%s8934_s5 + $0xe8c] ss:$16 sps:$4 sm:$0xff]  }
 0x33d   :  { %4766 = vmatprep.subr.bf16.mxu0 %v6601_v48  ;;  %v6674_v48 = vld [vmem:[%s8934_s5 + $0xe80] ss:$16 sps:$4 sm:$0xff]  }
 0x33f   :  { %4439 = vmatpush1.bf16.msra.mxu1 %v6596_v50  ;;  %v6677_v50 = vld [vmem:[%s8934_s5 + $0xe88] ss:$16 sps:$4 sm:$0xff]  }
 0x340   :  { %4767 = vmatpush1.bf16.msra.mxu0 %v6599_v51  ;;  %4440 = vmatprep.subr.bf16.mxu1 %v6604_v52  ;;  %v6682_v51 = vld [vmem:[%s8934_s5 + $0xea4] ss:$16 sps:$4 sm:$0xff]   ;;  %v6685_v52 = vld [vmem:[%s8934_s5 + $0xeac] ss:$16 sps:$4 sm:$0xff]  }
 0x341   :  { %4768 = vmatprep.subr.bf16.mxu0 %v6607_v53  ;;  %v6680_v53 = vld [vmem:[%s8934_s5 + $0xea0] ss:$16 sps:$4 sm:$0xff]  }
 0x343   :  { %4441 = vmatpush1.bf16.msra.mxu1 %v6602_v46  ;;  %v6683_v46 = vld [vmem:[%s8934_s5 + $0xea8] ss:$16 sps:$4 sm:$0xff]  }
 0x344   :  { %4769 = vmatpush1.bf16.msra.mxu0 %v6605_v54  ;;  %4442 = vmatprep.subr.bf16.mxu1 %v6610_v55  ;;  %v6688_v54 = vld [vmem:[%s8934_s5 + $0xec4] ss:$16 sps:$4 sm:$0xff]   ;;  %v6691_v55 = vld [vmem:[%s8934_s5 + $0xecc] ss:$16 sps:$4 sm:$0xff]  }
 0x345   :  { %4770 = vmatprep.subr.bf16.mxu0 %v6613_v56  ;;  %v6686_v56 = vld [vmem:[%s8934_s5 + $0xec0] ss:$16 sps:$4 sm:$0xff]  }
 0x347   :  { %4443 = vmatpush1.bf16.msra.mxu1 %v6608_v10  ;;  %v6689_v10 = vld [vmem:[%s8934_s5 + $0xec8] ss:$16 sps:$4 sm:$0xff]  }
 0x348   :  { %4771 = vmatpush1.bf16.msra.mxu0 %v6611_v57  ;;  %4444 = vmatprep.subr.bf16.mxu1 %v6616_v58  ;;  %v6694_v57 = vld [vmem:[%s8934_s5 + $0xee4] ss:$16 sps:$4 sm:$0xff]   ;;  %v6697_v58 = vld [vmem:[%s8934_s5 + $0xeec] ss:$16 sps:$4 sm:$0xff]  }
 0x349   :  { %4772 = vmatprep.subr.bf16.mxu0 %v6619_v59  ;;  %v6692_v59 = vld [vmem:[%s8934_s5 + $0xee0] ss:$16 sps:$4 sm:$0xff]  }
 0x34b   :  { %4445 = vmatpush1.bf16.msra.mxu1 %v6614_v60  ;;  %v6695_v60 = vld [vmem:[%s8934_s5 + $0xee8] ss:$16 sps:$4 sm:$0xff]  }
 0x34c   :  { %4773 = vmatpush1.bf16.msra.mxu0 %v6617_v61  ;;  %4446 = vmatprep.subr.bf16.mxu1 %v6622_v62  ;;  %v6700_v61 = vld [vmem:[%s8934_s5 + $0xf04] ss:$16 sps:$4 sm:$0xff]   ;;  %v6703_v62 = vld [vmem:[%s8934_s5 + $0xf0c] ss:$16 sps:$4 sm:$0xff]  }
 0x34d   :  { %4774 = vmatprep.subr.bf16.mxu0 %v6625_v63  ;;  %v6698_v63 = vld [vmem:[%s8934_s5 + $0xf00] ss:$16 sps:$4 sm:$0xff]  }
 0x34f   :  { %4447 = vmatpush1.bf16.msra.mxu1 %v6620_v0  ;;  %v6701_v0 = vld [vmem:[%s8934_s5 + $0xf08] ss:$16 sps:$4 sm:$0xff]  }
 0x350   :  { %4775 = vmatpush1.bf16.msra.mxu0 %v6623_v2  ;;  %4448 = vmatprep.subr.bf16.mxu1 %v6628_v6  ;;  %v6706_v2 = vld [vmem:[%s8934_s5 + $0xf24] ss:$16 sps:$4 sm:$0xff]   ;;  %v6709_v6 = vld [vmem:[%s8934_s5 + $0xf2c] ss:$16 sps:$4 sm:$0xff]  }
 0x351   :  { %4776 = vmatprep.subr.bf16.mxu0 %v6631_v8  ;;  %v6704_v8 = vld [vmem:[%s8934_s5 + $0xf20] ss:$16 sps:$4 sm:$0xff]  }
 0x353   :  { %4449 = vmatpush1.bf16.msra.mxu1 %v6626_v5  ;;  %v6707_v5 = vld [vmem:[%s8934_s5 + $0xf28] ss:$16 sps:$4 sm:$0xff]  }
 0x354   :  { %4777 = vmatpush1.bf16.msra.mxu0 %v6629_v9  ;;  %4450 = vmatprep.subr.bf16.mxu1 %v6634_v34  ;;  %v6712_v9 = vld [vmem:[%s8934_s5 + $0xf44] ss:$16 sps:$4 sm:$0xff]   ;;  %v6715_v34 = vld [vmem:[%s8934_s5 + $0xf4c] ss:$16 sps:$4 sm:$0xff]  }
 0x355   :  { %4778 = vmatprep.subr.bf16.mxu0 %v6637_v11  ;;  %v6710_v11 = vld [vmem:[%s8934_s5 + $0xf40] ss:$16 sps:$4 sm:$0xff]  }
 0x357   :  { %4451 = vmatpush1.bf16.msra.mxu1 %v6632_v40  ;;  %v6713_v40 = vld [vmem:[%s8934_s5 + $0xf48] ss:$16 sps:$4 sm:$0xff]  }
 0x358   :  { %4779 = vmatpush1.bf16.msra.mxu0 %v6635_v12  ;;  %4452 = vmatprep.subr.bf16.mxu1 %v6640_v18  ;;  %v6718_v12 = vld [vmem:[%s8934_s5 + $0xf64] ss:$16 sps:$4 sm:$0xff]   ;;  %v6721_v18 = vld [vmem:[%s8934_s5 + $0xf6c] ss:$16 sps:$4 sm:$0xff]  }
 0x359   :  { %4780 = vmatprep.subr.bf16.mxu0 %v6643_v13  ;;  %v6716_v13 = vld [vmem:[%s8934_s5 + $0xf60] ss:$16 sps:$4 sm:$0xff]  }
 0x35b   :  { %4453 = vmatpush1.bf16.msra.mxu1 %v6638_v14  ;;  %v6719_v14 = vld [vmem:[%s8934_s5 + $0xf68] ss:$16 sps:$4 sm:$0xff]  }
 0x35c   :  { %4781 = vmatpush1.bf16.msra.mxu0 %v6641_v32  ;;  %4454 = vmatprep.subr.bf16.mxu1 %v6646_v15  ;;  %v6727_v32 = vld [vmem:[%s8934_s5 + $0xf8c] ss:$16 sps:$4 sm:$0xff]   ;;  %v6722_v15 = vld [vmem:[%s8934_s5 + $0xf80] ss:$16 sps:$4 sm:$0xff]  }
 0x35d   :  { %4782 = vmatprep.subr.bf16.mxu0 %v6649_v33  ;;  %v6725_v33 = vld [vmem:[%s8934_s5 + $0xf88] ss:$16 sps:$4 sm:$0xff]  }
 0x35f   :  { %4455 = vmatpush1.bf16.msra.mxu1 %v6644_v36  ;;  %v6733_v36 = vld [vmem:[%s8934_s5 + $0xfac] ss:$16 sps:$4 sm:$0xff]  }
 0x360   :  { %4783 = vmatpush1.bf16.msra.mxu0 %v6647_v35  ;;  %4465 = vmatprep.subr.bf16.mxu1 %v6652_v19  ;;  %v6731_v35 = vld [vmem:[%s8934_s5 + $0xfa8] ss:$16 sps:$4 sm:$0xff]   ;;  %v6736_v19 = vld [vmem:[%s8934_s5 + $0xfc4] ss:$16 sps:$4 sm:$0xff]  }
 0x361   :  { %4793 = vmatprep.subr.bf16.mxu0 %v6655_v45  ;;  %v6739_v45 = vld [vmem:[%s8934_s5 + $0xfcc] ss:$16 sps:$4 sm:$0xff]  }
 0x362   :  { %4457 = vmatmul.mubr.bf16.vlgmr.msra.gmra.mrb[32].mxu1 %v1074_v21 }
 0x363   :  { %4785 = vmatmul.mubr.bf16.vlgmr.msra.gmra.mrb[64].mxu0 %v1074_v21  ;;  %4466 = vmatpush1.bf16.msra.mxu1 %v6650_v20  ;;  %v1078_v20 = vadd.f32 %v7590_v3, %v7328_v41  ;;  %v6737_v21 = vld [vmem:[%s8934_s5 + $0xfc8] ss:$16 sps:$4 sm:$0xff]   ;;  %v4886_v3 = vld [vmem:[%s8937_s7 + $0x180] sm:$0xff] }
 0x364   :  { %4497 = vmatprep.mubr.bf16.mxu1 %v1083_v24  ;;  %4794 = vmatpush1.bf16.msra.mxu0 %v6653_v22  ;;  %v6742_v22 = vld [vmem:[%s8934_s5 + $0xfe4] ss:$16 sps:$4 sm:$0xff]   ;;  %v4855_v41 = vld [vmem:[%s8937_s7 + $0x88] sm:$0xff] }
 0x365   :  { %4825 = vmatprep.mubr.bf16.mxu0 %v1083_v24  ;;  %4467 = vmatprep.subr.bf16.mxu1 %v6658_v23  ;;  %v6745_v23 = vld [vmem:[%s8934_s5 + $0xfec] ss:$16 sps:$4 sm:$0xff]   ;;  %v4854_v24 = vld [vmem:[%s8937_s7 + $0x80] sm:$0xff] }
 0x366   :  { %4795 = vmatprep.subr.bf16.mxu0 %v6661_v25  ;;  %v4887_v25 = vld [vmem:[%s8937_s7 + $0x188] sm:$0xff] }
 0x367   :  { %4468 = vmatpush1.bf16.msra.mxu1 %v6656_v16  ;;  %v6740_v16 = vld [vmem:[%s8934_s5 + $0xfe0] ss:$16 sps:$4 sm:$0xff]  }
 0x368   :  { %4796 = vmatpush1.bf16.msra.mxu0 %v6659_v26  ;;  %4469 = vmatprep.subr.bf16.mxu1 %v6664_v27  ;;  %v6743_v26 = vld [vmem:[%s8934_s5 + $0xfe8] ss:$16 sps:$4 sm:$0xff]   ;;  %v1080_v27 = vmax.f32 %v1078_v20, 0.0  ;;  %v4846_v20 = vld [vmem:[%s8937_s7 + $0x40] sm:$0xff] }
 0x369   :  { %4797 = vmatprep.subr.bf16.mxu0 %v6667_v49  ;;  %v5725_v49 = vpack.c.bf16 %v4855_v41, %v4854_v24  ;;  %v4878_v24 = vld [vmem:[%s8937_s7 + $0x140] sm:$0xff]  ;;  %v4879_v41 = vld [vmem:[%s8937_s7 + $0x148] sm:$0xff] }
 0x36b   :  { %4470 = vmatpush1.bf16.msra.mxu1 %v6662_v29  ;;  %v4838_v29 = vld [vmem:[%s8937_s7] sm:$0xff] }
 0x36c   :  { %4798 = vmatpush1.bf16.msra.mxu0 %v6665_v37  ;;  %4471 = vmatprep.subr.bf16.mxu1 %v6670_v38  ;;  %v4839_v37 = vld [vmem:[%s8937_s7 + $0x8] sm:$0xff]  ;;  %v4870_v38 = vld [vmem:[%s8937_s7 + $0x100] sm:$0xff] }
 0x36d   :  { %4799 = vmatprep.subr.bf16.mxu0 %v6673_v39  ;;  %v5757_v39 = vpack.c.bf16 %v4887_v25, %v4886_v3  ;;  %v5775_v3 = vpack.c.bf16 %v4879_v41, %v4878_v24  ;;  %v4864_v25 = vld [vmem:[%s8937_s7 + $0xd0] sm:$0xff]  ;;  %v5654_v24 = vld [vmem:[%s8939_s8] ss:$0 sm:$0xff] }
 0x36f   :  { %4472 = vmatpush1.bf16.msra.mxu1 %v6668_v42  ;;  %v4871_v42 = vld [vmem:[%s8937_s7 + $0x108] sm:$0xff] }
 0x370   :  { %4800 = vmatpush1.bf16.msra.mxu0 %v6671_v43  ;;  %4473 = vmatprep.subr.bf16.mxu1 %v6676_v44  ;;  %v4856_v43 = vld [vmem:[%s8937_s7 + $0x90] sm:$0xff]  ;;  %v4857_v44 = vld [vmem:[%s8937_s7 + $0x98] sm:$0xff] }
 0x371   :  { %4801 = vmatprep.subr.bf16.mxu0 %v6679_v47  ;;  %v4888_v47 = vld [vmem:[%s8937_s7 + $0x190] sm:$0xff] }
 0x373   :  { %4474 = vmatpush1.bf16.msra.mxu1 %v6674_v48  ;;  %v4889_v48 = vld [vmem:[%s8937_s7 + $0x198] sm:$0xff] }
 0x374   :  { %4802 = vmatpush1.bf16.msra.mxu0 %v6677_v50  ;;  %4475 = vmatprep.subr.bf16.mxu1 %v6682_v51  ;;  %v5727_v50 = vpack.c.bf16 %v4839_v37, %v4838_v29  ;;  %v1082_v51 = vpack.c.bf16 %v1080_v27, %v1080_v27  ;;  %v4848_v29 = vld [vmem:[%s8937_s7 + $0x50] sm:$0xff]  ;;  %v4849_v37 = vld [vmem:[%s8937_s7 + $0x58] sm:$0xff] }
 0x375   :  { %4803 = vmatprep.subr.bf16.mxu0 %v6685_v52  ;;  %v5759_v52 = vpack.c.bf16 %v4871_v42, %v4870_v38  ;;  %v4880_v42 = vld [vmem:[%s8937_s7 + $0x150] sm:$0xff] }
 0x377   :  { %4476 = vmatpush1.bf16.msra.mxu1 %v6680_v53  ;;  %v5729_v53 = vpack.c.bf16 %v4857_v44, %v4856_v43  ;;  %v4881_v43 = vld [vmem:[%s8937_s7 + $0x158] sm:$0xff] }
 0x378   :  { %4804 = vmatpush1.bf16.msra.mxu0 %v6683_v46  ;;  %4477 = vmatprep.subr.bf16.mxu1 %v6688_v54  ;;  %v4840_v46 = vld [vmem:[%s8937_s7 + $0x10] sm:$0xff]  ;;  %v4841_v54 = vld [vmem:[%s8937_s7 + $0x18] sm:$0xff]  ;;  %v5779_v44 = vpack.c.bf16 %v4881_v43, %v4880_v42 }
 0x379   :  { %4805 = vmatprep.subr.bf16.mxu0 %v6691_v55  ;;  %v4872_v55 = vld [vmem:[%s8937_s7 + $0x110] sm:$0xff] }
 0x37b   :  { %4478 = vmatpush1.bf16.msra.mxu1 %v6686_v56  ;;  %v5761_v56 = vpack.c.bf16 %v4889_v48, %v4888_v47  ;;  %v4866_v47 = vld [vmem:[%s8937_s7 + $0xe0] sm:$0xff]  ;;  %v4867_v48 = vld [vmem:[%s8937_s7 + $0xe8] sm:$0xff] }
 0x37c   :  { %4806 = vmatpush1.bf16.msra.mxu0 %v6689_v10  ;;  %4479 = vmatprep.subr.bf16.mxu1 %v6694_v57  ;;  %v4873_v10 = vld [vmem:[%s8937_s7 + $0x118] sm:$0xff]  ;;  %v4858_v57 = vld [vmem:[%s8937_s7 + $0xa0] sm:$0xff] }
 0x37d   :  { %4807 = vmatprep.subr.bf16.mxu0 %v6697_v58  ;;  %v4859_v58 = vld [vmem:[%s8937_s7 + $0xa8] sm:$0xff] }
 0x37f   :  { %4480 = vmatpush1.bf16.msra.mxu1 %v6692_v59  ;;  %v4890_v59 = vld [vmem:[%s8937_s7 + $0x1a0] sm:$0xff] }
 0x380   :  { %4808 = vmatpush1.bf16.msra.mxu0 %v6695_v60  ;;  %4481 = vmatprep.subr.bf16.mxu1 %v6700_v61  ;;  %v4891_v60 = vld [vmem:[%s8937_s7 + $0x1a8] sm:$0xff]  ;;  %v5731_v61 = vpack.c.bf16 %v4841_v54, %v4840_v46 }
 0x381   :  { %4809 = vmatprep.subr.bf16.mxu0 %v6703_v62  ;;  %v5763_v62 = vpack.c.bf16 %v4873_v10, %v4872_v55  ;;  %v4851_v46 = vld [vmem:[%s8937_s7 + $0x68] sm:$0xff] }
 0x382   :  { %v4883_v10 = vld [vmem:[%s8937_s7 + $0x168] sm:$0xff] }
 0x383   :  { %4482 = vmatpush1.bf16.msra.mxu1 %v6698_v63  ;;  %v5733_v63 = vpack.c.bf16 %v4859_v58, %v4858_v57  ;;  %v4868_v57 = vld [vmem:[%s8937_s7 + $0xf0] sm:$0xff] }
 0x384   :  { %4810 = vmatpush1.bf16.msra.mxu0 %v6701_v0  ;;  %4483 = vmatprep.subr.bf16.mxu1 %v6706_v2  ;;  %v4842_v0 = vld [vmem:[%s8937_s7 + $0x20] sm:$0xff]  ;;  %v4843_v2 = vld [vmem:[%s8937_s7 + $0x28] sm:$0xff] }
 0x385   :  { %4811 = vmatprep.subr.bf16.mxu0 %v6709_v6  ;;  %v4874_v6 = vld [vmem:[%s8937_s7 + $0x120] sm:$0xff] }
 0x387   :  { %4484 = vmatpush1.bf16.msra.mxu1 %v6704_v8  ;;  %v5765_v8 = vpack.c.bf16 %v4891_v60, %v4890_v59  ;;  %v4869_v59 = vld [vmem:[%s8937_s7 + $0xf8] sm:$0xff]  ;;  %v4900_v60 = vld [vmem:[%s8937_s7 + $0x1f0] sm:$0xff] }
 0x388   :  { %4812 = vmatpush1.bf16.msra.mxu0 %v6707_v5  ;;  %4485 = vmatprep.subr.bf16.mxu1 %v6712_v9  ;;  %v4875_v5 = vld [vmem:[%s8937_s7 + $0x128] sm:$0xff]  ;;  %v4860_v9 = vld [vmem:[%s8937_s7 + $0xb0] sm:$0xff] }
 0x389   :  { %4813 = vmatprep.subr.bf16.mxu0 %v6715_v34  ;;  %v4861_v34 = vld [vmem:[%s8937_s7 + $0xb8] sm:$0xff] }
 0x38b   :  { %4486 = vmatpush1.bf16.msra.mxu1 %v6710_v11  ;;  %v4892_v11 = vld [vmem:[%s8937_s7 + $0x1b0] sm:$0xff] }
 0x38c   :  { %4814 = vmatpush1.bf16.msra.mxu0 %v6713_v40  ;;  %4487 = vmatprep.subr.bf16.mxu1 %v6718_v12  ;;  %v4893_v40 = vld [vmem:[%s8937_s7 + $0x1b8] sm:$0xff]  ;;  %v5735_v12 = vpack.c.bf16 %v4843_v2, %v4842_v0  ;;  %v4852_v0 = vld [vmem:[%s8937_s7 + $0x70] sm:$0xff] }
 0x38d   :  { %4815 = vmatprep.subr.bf16.mxu0 %v6721_v18  ;;  %v5767_v18 = vpack.c.bf16 %v4875_v5, %v4874_v6  ;;  %v4853_v2 = vld [vmem:[%s8937_s7 + $0x78] sm:$0xff]  ;;  %v4884_v6 = vld [vmem:[%s8937_s7 + $0x170] sm:$0xff] }
 0x38e   :  { %v4885_v5 = vld [vmem:[%s8937_s7 + $0x178] sm:$0xff] }
 0x38f   :  { %4488 = vmatpush1.bf16.msra.mxu1 %v6716_v13  ;;  %v5737_v13 = vpack.c.bf16 %v4861_v34, %v4860_v9  ;;  %v5787_v9 = vpack.c.bf16 %v4885_v5, %v4884_v6  ;;  %v1596_v34 = vld [vmem:[%s8938_s6] sm:$0xf] }
 0x390   :  { %4816 = vmatpush1.bf16.msra.mxu0 %v6719_v14  ;;  %4489 = vmatprep.subr.bf16.mxu1 %v6724_v7  ;;  %v4844_v14 = vld [vmem:[%s8937_s7 + $0x30] sm:$0xff]  ;;  %v4845_v7 = vld [vmem:[%s8937_s7 + $0x38] sm:$0xff] }
 0x391   :  { %4817 = vmatprep.subr.bf16.mxu0 %v6727_v32  ;;  %v5769_v32 = vpack.c.bf16 %v4893_v40, %v4892_v11  ;;  %v1608_v11 = vsub.s32 2, %v7083_v28  ;;  %v1612_v40 = vsub.s32 3, %v7083_v28 }
 0x393   :  { %4490 = vmatpush1.bf16.msra.mxu1 %v6722_v15  ;;  %v4876_v15 = vld [vmem:[%s8937_s7 + $0x130] sm:$0xff] }
 0x394   :  { %4818 = vmatpush1.bf16.msra.mxu0 %v6725_v33  ;;  %4491 = vmatprep.subr.bf16.mxu1 %v6730_v17  ;;  %v4877_v33 = vld [vmem:[%s8937_s7 + $0x138] sm:$0xff]  ;;  %v5739_v17 = vpack.c.bf16 %v4845_v7, %v4844_v14  ;;  %v1613_v14 = vrot.slane %v1596_v34, %v1612_v40 }
 0x395   :  { %4819 = vmatprep.subr.bf16.mxu0 %v6733_v36  ;;  %v5771_v36 = vpack.c.bf16 %v4877_v33, %v4876_v15 }
 0x397   :  { %4492 = vmatpush1.bf16.msra.mxu1 %v6728_v1  ;;  %v4862_v1 = vld [vmem:[%s8937_s7 + $0xc0] sm:$0xff] }
 0x398   :  { %4820 = vmatpush1.bf16.msra.mxu0 %v6731_v35  ;;  %4493 = vmatprep.subr.bf16.mxu1 %v6736_v19  ;;  %v4863_v35 = vld [vmem:[%s8937_s7 + $0xc8] sm:$0xff]  ;;  %v4894_v19 = vld [vmem:[%s8937_s7 + $0x1c0] sm:$0xff] }
 0x399   :  { %4821 = vmatprep.subr.bf16.mxu0 %v6739_v45  ;;  %v5741_v45 = vpack.c.bf16 %v4863_v35, %v4862_v1 }
 0x39b   :  { %4494 = vmatpush1.bf16.msra.mxu1 %v6734_v4  ;;  %v4895_v4 = vld [vmem:[%s8937_s7 + $0x1c8] sm:$0xff] }
 0x39c   :  { %4822 = vmatpush1.bf16.msra.mxu0 %v6737_v21  ;;  %4495 = vmatprep.subr.bf16.mxu1 %v6742_v22  ;;  %v4847_v21 = vld [vmem:[%s8937_s7 + $0x48] sm:$0xff]  ;;  %v5773_v22 = vpack.c.bf16 %v4895_v4, %v4894_v19 }
 0x39d   :  { %4823 = vmatprep.subr.bf16.mxu0 %v6745_v23  ;;  %v5743_v23 = vpack.c.bf16 %v4847_v21, %v4846_v20 }
 0x39f   :  { %4496 = vmatpush1.bf16.msra.mxu1 %v6740_v16  ;;  %v4865_v16 = vld [vmem:[%s8937_s7 + $0xd8] sm:$0xff] }
 0x3a0   :  { %4824 = vmatpush1.bf16.msra.mxu0 %v6743_v26  ;;  %5726 = vmatprep.subr.bf16.mxu1 %v5725_v49  ;;  %v4896_v26 = vld [vmem:[%s8937_s7 + $0x1d0] sm:$0xff]  ;;  %v5745_v27 = vpack.c.bf16 %v4865_v16, %v4864_v25  ;;  %v4897_v49 = vld [vmem:[%s8937_s7 + $0x1d8] sm:$0xff] }
 0x3a1   :  { %5758 = vmatprep.subr.bf16.mxu0 %v5757_v39  ;;  %v5777_v38 = vpack.c.bf16 %v4897_v49, %v4896_v26  ;;  %v5747_v39 = vpack.c.bf16 %v4849_v37, %v4848_v29 }
 0x3a2   :  { %4498 = vmatmul.mubr.bf16.vlgmr.msra.gmra.mrb[32].mxu1 %v1082_v51 }
 0x3a3   :  { %4826 = vmatmul.mubr.bf16.vlgmr.msra.gmra.mrb[64].mxu0 %v1082_v51  ;;  %5728 = vmatpush3.bf16.msra.mxu1 %v5727_v50  ;;  %v4898_v50 = vld [vmem:[%s8937_s7 + $0x1e0] sm:$0xff]  ;;  %v5749_v51 = vpack.c.bf16 %v4867_v48, %v4866_v47 }
 0x3a4   :  { %5760 = vmatpush3.bf16.msra.mxu0 %v5759_v52  ;;  %5730 = vmatprep.subr.bf16.mxu1 %v5729_v53  ;;  %v4899_v52 = vld [vmem:[%s8937_s7 + $0x1e8] sm:$0xff]  ;;  %v4850_v53 = vld [vmem:[%s8937_s7 + $0x60] sm:$0xff] }
 0x3a5   :  { %5762 = vmatprep.subr.bf16.mxu0 %v5761_v56  ;;  %v5781_v54 = vpack.c.bf16 %v4899_v52, %v4898_v50  ;;  %v5751_v55 = vpack.c.bf16 %v4851_v46, %v4850_v53  ;;  %v4882_v56 = vld [vmem:[%s8937_s7 + $0x160] sm:$0xff] }
 0x3a6   :  { %v5783_v58 = vpack.c.bf16 %v4883_v10, %v4882_v56 }
 0x3a7   :  { %5732 = vmatpush3.bf16.msra.mxu1 %v5731_v61  ;;  %v4901_v61 = vld [vmem:[%s8937_s7 + $0x1f8] sm:$0xff] }
 0x3a8   :  { %5764 = vmatpush3.bf16.msra.mxu0 %v5763_v62  ;;  %5734 = vmatprep.subr.bf16.mxu1 %v5733_v63  ;;  %v5753_v62 = vpack.c.bf16 %v4869_v59, %v4868_v57  ;;  %v5785_v63 = vpack.c.bf16 %v4901_v61, %v4900_v60 }
 0x3a9   :  { %5766 = vmatprep.subr.bf16.mxu0 %v5765_v8  ;;  %v5755_v8 = vpack.c.bf16 %v4853_v2, %v4852_v0 }
 0x3ab   :  { %5736 = vmatpush3.bf16.msra.mxu1 %v5735_v12  ;;  %v1601_v12 = vrot.slane %v1596_v34, %v7089_v30 }
 0x3ac   :  { %5768 = vmatpush3.bf16.msra.mxu0 %v5767_v18  ;;  %5738 = vmatprep.subr.bf16.mxu1 %v5737_v13  ;;  %v1605_v18 = vrot.slane %v1596_v34, %v7092_v31  ;;  %v1609_v13 = vrot.slane %v1596_v34, %v1608_v11 }
 0x3ad   :  { %5770 = vmatprep.subr.bf16.mxu0 %v5769_v32 }
 0x3af   :  { %5740 = vmatpush3.bf16.msra.mxu1 %v5739_v17 }
 0x3b0   :  { %5772 = vmatpush3.bf16.msra.mxu0 %v5771_v36  ;;  %5742 = vmatprep.subr.bf16.mxu1 %v5741_v45 }
 0x3b1   :  { %5774 = vmatprep.subr.bf16.mxu0 %v5773_v22 }
 0x3b3   :  { %5744 = vmatpush3.bf16.msra.mxu1 %v5743_v23 }
 0x3b4   :  { %5776 = vmatpush3.bf16.msra.mxu0 %v5775_v3  ;;  %5746 = vmatprep.subr.bf16.mxu1 %v5745_v27 }
 0x3b5   :  { %5778 = vmatprep.subr.bf16.mxu0 %v5777_v38 }
 0x3b7   :  { %5748 = vmatpush3.bf16.msra.mxu1 %v5747_v39 }
 0x3b8   :  { %5780 = vmatpush3.bf16.msra.mxu0 %v5779_v44  ;;  %5750 = vmatprep.subr.bf16.mxu1 %v5749_v51 }
 0x3b9   :  { %5782 = vmatprep.subr.bf16.mxu0 %v5781_v54 }
 0x3bb   :  { %5752 = vmatpush3.bf16.msra.mxu1 %v5751_v55 }
 0x3bc   :  { %5784 = vmatpush3.bf16.msra.mxu0 %v5783_v58  ;;  %5754 = vmatprep.subr.bf16.mxu1 %v5753_v62 }
 0x3bd   :  { %5786 = vmatprep.subr.bf16.mxu0 %v5785_v63 }
 0x3bf   :  { %5756 = vmatpush3.bf16.msra.mxu1 %v5755_v8 }
 0x3c0   :  { %5788 = vmatpush3.bf16.msra.mxu0 %v5787_v9 }
 0x475   :  { %v4499_v7 = vpop.f32.mrb[32].mxu1 }
 0x476   :  { %v5789_v32 = vadd.f32 %v4499_v7, %v1601_v12  ;;  %v4827_v15 = vpop.f32.mrb[64].mxu0  ;;  %v4501_v33 = vpop.f32.mrb[33].mxu1 }
 0x477   :  { %v5790_v17 = vadd.f32 %v4501_v33, %v1605_v18  ;;  %v4829_v36 = vpop.f32.mrb[65].mxu0  ;;  %v4503_v1 = vpop.f32.mrb[34].mxu1  ;;  %v5791_v35 = vadd.f32 %v4827_v15, %v1609_v13 }
 0x478   :  { %v5792_v19 = vadd.f32 %v4829_v36, %v1613_v14  ;;  %v4831_v45 = vpop.f32.mrb[66].mxu0  ;;  %v4504_v4 = vpop.f32.mrb[35].mxu1  ;;  %6746 = vtanh.f32 %v5789_v32 }
 0x479   :  { %v4832_v20 = vpop.f32.mrb[67].mxu0  ;;  %6748 = vtanh.f32 %v5790_v17 }
 0x47a   :  { %6750 = vtanh.f32 %v5792_v19 }
 0x47b   :  { %6752 = vtanh.f32 %v5791_v35 }
 0x482   :  { %v6747_v28 = vpop.eup %6746 }
 0x483   :  { %v6749_v30 = vpop.eup %6748 }
 0x484   :  { %v6751_v31 = vpop.eup %6750  ;;  %4973 = vmatprep.mubr.f32.mxu1 %v6749_v30 }
 0x485   :  { %v6753_v21 = vpop.eup %6752  ;;  %5043 = vmatprep.mubr.f32.mxu0 %v6751_v31  ;;  %4974 = vmatmul.mubr.f32.vlgmr.msra.gmra.mrb[36].mxu1 %v6747_v28 }
 0x486   :  { %5044 = vmatmul.mubr.f32.vlgmr.msra.gmra.mrb[68].mxu0 %v6753_v21 }
 0x558   :  { %v5687_v22 = vpop.f32.mrb[36].mxu1 }
 0x559   :  { %v5722_v23 = vpop.f32.mrb[68].mxu0  ;;  %v5688_v41 = vpop.f32.mrb[37].mxu1 }
 0x55a   :  { %v5689_v3 = vadd.f32 %v5688_v41, %v5687_v22  ;;  %v5723_v25 = vpop.f32.mrb[69].mxu0 }
 0x55b   :  { %v5724_v16 = vadd.f32 %v5723_v25, %v5722_v23 }
 0x55c   :  { %v4976_v26 = vadd.f32 %v5689_v3, %v5654_v24 }
 0x55e   :  { %v5046_v27 = vadd.f32 %v5724_v16, %v4976_v26 }
 0x560   :  { %5049 = vst [vmem:[%s8940_s9] sm:$0xff] %v5046_v27 }

</bundles_post_ra>
